<compile_context>
chip_gen: v7x
topology: tpu7x:2x2x1
jax: 0.10.0
libtpu: 0.0.40
codegen_flags: <defaults>
</compile_context>

<pallas_src>
import jax
import jax.numpy as jnp
from jax.experimental import pallas as pl
from jax.experimental.pallas import tpu as pltpu

# ----------------------------- small config ---------------------------------
BATCH = 2
NUM_CHANNELS = 3
IMAGE_SIZE = 16
PATCH_SIZE = 4
HIDDEN = 256                 # hidden_size
INTERMEDIATE = 512           # intermediate_size
NUM_HEADS = 2                # num_attention_heads
NUM_LAYERS = 2               # num_hidden_layers
EPS = 1e-6                   # layer_norm_eps

N_PATCHES = (IMAGE_SIZE // PATCH_SIZE) ** 2          # 16
PATCH_DIM = NUM_CHANNELS * PATCH_SIZE * PATCH_SIZE   # 48
D_HEAD = HIDDEN // NUM_HEADS                         # 128 (lane-aligned)
TOKENS = BATCH * N_PATCHES                           # 32 rows (sublane multiple)


# ----------------------------- kernel helpers --------------------------------
def _layernorm(x, w, b, eps=EPS):
    # x: [M, D], w/b broadcastable [1, D]; biased variance like torch LayerNorm.
    mu = jnp.mean(x, axis=-1, keepdims=True)
    var = jnp.mean(jnp.square(x - mu), axis=-1, keepdims=True)
    return (x - mu) * jax.lax.rsqrt(var + eps) * w + b


def _mm(a, b):
    # bf16 MXU operands, f32 accumulation.
    return jnp.dot(a.astype(jnp.bfloat16), b.astype(jnp.bfloat16),
                   preferred_element_type=jnp.float32)


def _mm_nt(a, b):
    # a @ b.T with bf16 operands, f32 accumulation.
    return jax.lax.dot_general(a.astype(jnp.bfloat16), b.astype(jnp.bfloat16),
                               (((1,), (1,)), ((), ())),
                               preferred_element_type=jnp.float32)


# ----------------------------- fused Pallas kernel ---------------------------
def _fused_forward_kernel(
        patches_ref, pw_ref, pb_ref, pos_ref,
        ln1w_ref, ln1b_ref, wqkv_ref, bqkv_ref, wproj_ref, bproj_ref,
        ln2w_ref, ln2b_ref, wfc1_ref, bfc1_ref, wfc2_ref, bfc2_ref,
        postw_ref, postb_ref, o_ref, ctx_sc):
    # ---- patch embedding + position embedding ----
    # patches_ref: [B*N, 48] bf16; pw_ref: [48, D] bf16; pos_ref pre-tiled [B*N, D] f32
    x = jnp.dot(patches_ref[...], pw_ref[...],
                preferred_element_type=jnp.float32)
    x = x + pb_ref[...] + pos_ref[...]                   # [B*N, D] f32

    scale = D_HEAD ** (-0.5)
    for l in range(NUM_LAYERS):                          # static unroll (L small)
        # -------- attention block --------
        h = _layernorm(x, ln1w_ref[l], ln1b_ref[l])
        qkv = _mm(h, wqkv_ref[l]) + bqkv_ref[l]          # [B*N, 3D] f32
        for b in range(BATCH):                           # static unroll
            r0 = b * N_PATCHES
            for hh in range(NUM_HEADS):                  # static unroll
                lo = hh * D_HEAD
                q = qkv[r0:r0 + N_PATCHES, lo:lo + D_HEAD]
                k = qkv[r0:r0 + N_PATCHES, HIDDEN + lo:HIDDEN + lo + D_HEAD]
                v = qkv[r0:r0 + N_PATCHES, 2 * HIDDEN + lo:2 * HIDDEN + lo + D_HEAD]
                dots = _mm_nt(q, k) * scale              # [N, N] f32
                # hand-rolled softmax; divide -> EUP approx reciprocal
                m = jnp.max(dots, axis=-1, keepdims=True)
                e = jnp.exp(dots - m)
                s = jnp.sum(e, axis=-1, keepdims=True)
                attn = e * pl.reciprocal(s, approx=True)
                # attention dropout: identity (eval mode, training=False)
                # write head context at lane-aligned column offset -> one proj matmul
                ctx_sc[r0:r0 + N_PATCHES, lo:lo + D_HEAD] = _mm(attn, v)
        # single output projection with full K = HIDDEN contraction
        x = x + _mm(ctx_sc[...], wproj_ref[l]) + bproj_ref[l]

        # -------- MLP block --------
        h = _layernorm(x, ln2w_ref[l], ln2b_ref[l])
        h = _mm(h, wfc1_ref[l]) + bfc1_ref[l]
        h = jax.nn.gelu(h, approximate=True)             # tanh approximation (f32)
        x = x + _mm(h, wfc2_ref[l]) + bfc2_ref[l]

    # ---- final LayerNorm ----
    o_ref[...] = _layernorm(x, postw_ref[...], postb_ref[...])


# ----------------------------- one-time weight prep ---------------------------
def prepare_params(params, batch=BATCH):
    """Stack per-layer weights, cast matmul weights to bf16, pre-tile pos.

    Runs ONCE (outside the per-call jit) so no weight restacking / casting HBM
    traffic happens on the forward path.
    """
    bf16 = jnp.bfloat16

    def stack(name, dtype=jnp.float32):
        return jnp.stack([lp[name] for lp in params["layers"]]).astype(dtype)

    prep = {
        "patch_w": params["patch_w"].astype(bf16),           # [48, D]
        "patch_b": params["patch_b"],                        # [1, D]
        "pos": jnp.tile(params["pos"], (batch, 1)),          # [B*N, D]
        "ln1_w": stack("ln1_w"), "ln1_b": stack("ln1_b"),
        "wqkv": stack("wqkv", bf16), "bqkv": stack("bqkv"),
        "wproj": stack("wproj", bf16), "bproj": stack("bproj"),
        "ln2_w": stack("ln2_w"), "ln2_b": stack("ln2_b"),
        "wfc1": stack("wfc1", bf16), "bfc1": stack("bfc1"),
        "wfc2": stack("wfc2", bf16), "bfc2": stack("bfc2"),
        "post_w": params["post_w"], "post_b": params["post_b"],
    }
    return jax.tree_util.tree_map(jax.block_until_ready, prep)


# ----------------------------- pallas_call wrapper ----------------------------
_VMEM_SPEC = pl.BlockSpec(memory_space=pltpu.MemorySpace.VMEM)


@jax.jit
def siglip_vision_transformer(pixel_values, prep):
    # pixel_values: [B, C, H, W] (NCHW) -> im2col patches, batch folded into M.
    B, C, H, W = pixel_values.shape
    gh, gw = H // PATCH_SIZE, W // PATCH_SIZE
    patches = pixel_values.reshape(B, C, gh, PATCH_SIZE, gw, PATCH_SIZE)
    patches = patches.transpose(0, 2, 4, 1, 3, 5).reshape(B * gh * gw, PATCH_DIM)
    patches = patches.astype(jnp.bfloat16)               # MXU input dtype

    inputs = (
        patches, prep["patch_w"], prep["patch_b"], prep["pos"],
        prep["ln1_w"], prep["ln1_b"], prep["wqkv"], prep["bqkv"],
        prep["wproj"], prep["bproj"], prep["ln2_w"], prep["ln2_b"],
        prep["wfc1"], prep["bfc1"], prep["wfc2"], prep["bfc2"],
        prep["post_w"], prep["post_b"],
    )

    out = pl.pallas_call(
        _fused_forward_kernel,
        out_shape=jax.ShapeDtypeStruct((B * N_PATCHES, HIDDEN), jnp.float32),
        in_specs=[_VMEM_SPEC] * len(inputs),              # whole arrays, VMEM-resident
        out_specs=_VMEM_SPEC,
        scratch_shapes=[pltpu.VMEM((B * N_PATCHES, HIDDEN), jnp.float32)],
    )(*inputs)
    return out.reshape(B, N_PATCHES, HIDDEN)


# ----------------------------- pure-JAX reference -----------------------------
def _ref_ln(x, w, b):
    mu = jnp.mean(x, axis=-1, keepdims=True)
    var = jnp.mean(jnp.square(x - mu), axis=-1, keepdims=True)
    return (x - mu) * jax.lax.rsqrt(var + EPS) * w + b


def _ref_layer(x, lp):
    h = _ref_ln(x, lp["ln1_w"], lp["ln1_b"])
    qkv = h @ lp["wqkv"] + lp["bqkv"]
    q, k, v = jnp.split(qkv, 3, axis=-1)
    B, N, D = q.shape

    def to_heads(t):
        return t.reshape(B, N, NUM_HEADS, D_HEAD).transpose(0, 2, 1, 3)

    q, k, v = to_heads(q), to_heads(k), to_heads(v)
    dots = jnp.einsum("bhid,bhjd->bhij", q, k) * (D_HEAD ** -0.5)
    attn = jax.nn.softmax(dots, axis=-1)
    out = jnp.einsum("bhij,bhjd->bhid", attn, v)
    out = out.transpose(0, 2, 1, 3).reshape(B, N, D)
    out = out @ lp["wproj"] + lp["bproj"]
    x = x + out
    h = _ref_ln(x, lp["ln2_w"], lp["ln2_b"])
    h = h @ lp["wfc1"] + lp["bfc1"]
    h = jax.nn.gelu(h, approximate=True)
    h = h @ lp["wfc2"] + lp["bfc2"]
    return x + h


def reference_forward(pixel_values, params):
    # patch conv done with lax.conv to validate the im2col path end-to-end
    w4 = params["patch_w"].T.reshape(HIDDEN, NUM_CHANNELS, PATCH_SIZE, PATCH_SIZE)
    x = jax.lax.conv_general_dilated(
        pixel_values, w4, (PATCH_SIZE, PATCH_SIZE), "VALID",
        dimension_numbers=("NCHW", "OIHW", "NCHW"))
    x = x + params["patch_b"].reshape(1, HIDDEN, 1, 1)
    B = x.shape[0]
    x = x.reshape(B, HIDDEN, -1).transpose(0, 2, 1)     # b (n1 n2) c
    x = x + params["pos"][None]
    for lp in params["layers"]:
        x = _ref_layer(x, lp)
    return _ref_ln(x, params["post_w"], params["post_b"])


# ----------------------------- parameter init ---------------------------------
def init_params(key):
    keys = iter(jax.random.split(key, 64))

    def normal(shape, scale=0.02):
        v = scale * jax.random.normal(next(keys), shape, dtype=jnp.float32)
        # Round to bf16-representable values so the bf16 weight casts used by
        # the kernel are exact; the f32 reference then differs only by
        # activation rounding (keeps the numerical comparison tight).
        return v.astype(jnp.bfloat16).astype(jnp.float32)

    params = {
        "patch_w": normal((PATCH_DIM, HIDDEN)),          # conv weight, [C*P*P, D]
        "patch_b": normal((1, HIDDEN)),
        "pos": normal((N_PATCHES, HIDDEN)),              # nn.Embedding table
        "post_w": 1.0 + normal((1, HIDDEN)),
        "post_b": normal((1, HIDDEN)),
        "layers": [],
    }
    for _ in range(NUM_LAYERS):
        params["layers"].append({
            "ln1_w": 1.0 + normal((1, HIDDEN)),
            "ln1_b": normal((1, HIDDEN)),
            "wqkv": normal((HIDDEN, 3 * HIDDEN)),
            "bqkv": normal((1, 3 * HIDDEN)),
            "wproj": normal((HIDDEN, HIDDEN)),
            "bproj": normal((1, HIDDEN)),
            "ln2_w": 1.0 + normal((1, HIDDEN)),
            "ln2_b": normal((1, HIDDEN)),
            "wfc1": normal((HIDDEN, INTERMEDIATE)),
            "bfc1": normal((1, INTERMEDIATE)),
            "wfc2": normal((INTERMEDIATE, HIDDEN)),
            "bfc2": normal((1, HIDDEN)),
        })
    return params


# ----------------------------- main -------------------------------------------
if __name__ == "__main__":
    key = jax.random.PRNGKey(0)
    pkey, wkey = jax.random.split(key)
    pixel_values = jax.random.normal(
        pkey, (BATCH, NUM_CHANNELS, IMAGE_SIZE, IMAGE_SIZE), dtype=jnp.float32)
    params = init_params(wkey)

    # One-time weight preparation (stack / bf16 cast / pos tiling) — NOT on
    # the per-call forward path.
    prep = prepare_params(params, batch=BATCH)

    out = siglip_vision_transformer(pixel_values, prep)
    out = jax.block_until_ready(out)
    assert out.shape == (BATCH, N_PATCHES, HIDDEN)

    ref = reference_forward(pixel_values, params)
    max_err = float(jnp.max(jnp.abs(out - ref)))
    assert max_err < 5e-2, f"mismatch vs reference: max abs err = {max_err}"

    print("KERNEL_OK")
</pallas_src>

<mosaic_0001>
module attributes {stable_mosaic.version = 11 : i64} {
  func.func @_fused_forward_kernel(%arg0: memref<32x48xbf16, #tpu.memory_space<vmem>>, %arg1: memref<48x256xbf16, #tpu.memory_space<vmem>>, %arg2: memref<1x256xf32, #tpu.memory_space<vmem>>, %arg3: memref<32x256xf32, #tpu.memory_space<vmem>>, %arg4: memref<2x1x256xf32, #tpu.memory_space<vmem>>, %arg5: memref<2x1x256xf32, #tpu.memory_space<vmem>>, %arg6: memref<2x256x768xbf16, #tpu.memory_space<vmem>>, %arg7: memref<2x1x768xf32, #tpu.memory_space<vmem>>, %arg8: memref<2x256x256xbf16, #tpu.memory_space<vmem>>, %arg9: memref<2x1x256xf32, #tpu.memory_space<vmem>>, %arg10: memref<2x1x256xf32, #tpu.memory_space<vmem>>, %arg11: memref<2x1x256xf32, #tpu.memory_space<vmem>>, %arg12: memref<2x256x512xbf16, #tpu.memory_space<vmem>>, %arg13: memref<2x1x512xf32, #tpu.memory_space<vmem>>, %arg14: memref<2x512x256xbf16, #tpu.memory_space<vmem>>, %arg15: memref<2x1x256xf32, #tpu.memory_space<vmem>>, %arg16: memref<1x256xf32, #tpu.memory_space<vmem>>, %arg17: memref<1x256xf32, #tpu.memory_space<vmem>>, %arg18: memref<32x256xf32, #tpu.memory_space<vmem>>, %arg19: memref<32x256xf32, #tpu.memory_space<vmem>>) attributes {dimension_semantics = [], scalar_prefetch = 0 : i64, scratch_operands = 1 : i64, tpu.core_type = #tpu.core_type<tc>} {
    %c0 = arith.constant 0 : index
    %c0_0 = arith.constant 0 : index
    %0 = vector.load %arg0[%c0, %c0_0] : memref<32x48xbf16, #tpu.memory_space<vmem>>, vector<32x48xbf16>
    %c0_1 = arith.constant 0 : index
    %c0_2 = arith.constant 0 : index
    %1 = vector.load %arg1[%c0_1, %c0_2] : memref<48x256xbf16, #tpu.memory_space<vmem>>, vector<48x256xbf16>
    %cst = arith.constant dense<0.000000e+00> : vector<32x256xf32>
    %2 = tpu.matmul %0, %1, %cst {dimension_numbers = #tpu.dot_dimension_numbers<[1], [0], [0], [1], [0, 0, 1, 1], [], []>} : vector<32x48xbf16>, vector<48x256xbf16>, vector<32x256xf32> -> vector<32x256xf32>
    %c0_3 = arith.constant 0 : index
    %c0_4 = arith.constant 0 : index
    %3 = vector.load %arg2[%c0_3, %c0_4] : memref<1x256xf32, #tpu.memory_space<vmem>>, vector<1x256xf32>
    %4 = vector.broadcast %3 : vector<1x256xf32> to vector<32x256xf32>
    %5 = arith.addf %2, %4 : vector<32x256xf32>
    %c0_5 = arith.constant 0 : index
    %c0_6 = arith.constant 0 : index
    %6 = vector.load %arg3[%c0_5, %c0_6] : memref<32x256xf32, #tpu.memory_space<vmem>>, vector<32x256xf32>
    %7 = arith.addf %5, %6 : vector<32x256xf32>
    %c0_7 = arith.constant 0 : index
    %c0_8 = arith.constant 0 : index
    %c0_9 = arith.constant 0 : index
    %8 = vector.load %arg4[%c0_7, %c0_8, %c0_9] : memref<2x1x256xf32, #tpu.memory_space<vmem>>, vector<1x1x256xf32>
    %9 = vector.shape_cast %8 : vector<1x1x256xf32> to vector<1x256xf32>
    %c0_10 = arith.constant 0 : index
    %c0_11 = arith.constant 0 : index
    %c0_12 = arith.constant 0 : index
    %10 = vector.load %arg5[%c0_10, %c0_11, %c0_12] : memref<2x1x256xf32, #tpu.memory_space<vmem>>, vector<1x1x256xf32>
    %11 = vector.shape_cast %10 : vector<1x1x256xf32> to vector<1x256xf32>
    %cst_13 = arith.constant dense<0.000000e+00> : vector<32xf32>
    %12 = vector.multi_reduction <add>, %7, %cst_13 [1] : vector<32x256xf32> to vector<32xf32>
    %13 = vector.shape_cast %12 : vector<32xf32> to vector<32x1xf32>
    %cst_14 = arith.constant 2.560000e+02 : f32
    %14 = vector.broadcast %cst_14 : f32 to vector<32x1xf32>
    %15 = arith.divf %13, %14 : vector<32x1xf32>
    %16 = vector.broadcast %15 : vector<32x1xf32> to vector<32x256xf32>
    %17 = arith.subf %7, %16 : vector<32x256xf32>
    %18 = arith.mulf %17, %17 : vector<32x256xf32>
    %cst_15 = arith.constant dense<0.000000e+00> : vector<32xf32>
    %19 = vector.multi_reduction <add>, %18, %cst_15 [1] : vector<32x256xf32> to vector<32xf32>
    %20 = vector.shape_cast %19 : vector<32xf32> to vector<32x1xf32>
    %cst_16 = arith.constant 2.560000e+02 : f32
    %21 = vector.broadcast %cst_16 : f32 to vector<32x1xf32>
    %22 = arith.divf %20, %21 : vector<32x1xf32>
    %23 = vector.broadcast %15 : vector<32x1xf32> to vector<32x256xf32>
    %24 = arith.subf %7, %23 : vector<32x256xf32>
    %cst_17 = arith.constant 9.99999997E-7 : f32
    %25 = vector.broadcast %cst_17 : f32 to vector<32x1xf32>
    %26 = arith.addf %22, %25 : vector<32x1xf32>
    %27 = math.rsqrt %26 : vector<32x1xf32>
    %28 = vector.broadcast %27 : vector<32x1xf32> to vector<32x256xf32>
    %29 = arith.mulf %24, %28 : vector<32x256xf32>
    %30 = vector.broadcast %9 : vector<1x256xf32> to vector<32x256xf32>
    %31 = arith.mulf %29, %30 : vector<32x256xf32>
    %32 = vector.broadcast %11 : vector<1x256xf32> to vector<32x256xf32>
    %33 = arith.addf %31, %32 : vector<32x256xf32>
    %c0_18 = arith.constant 0 : index
    %c0_19 = arith.constant 0 : index
    %c0_20 = arith.constant 0 : index
    %34 = vector.load %arg6[%c0_18, %c0_19, %c0_20] : memref<2x256x768xbf16, #tpu.memory_space<vmem>>, vector<1x256x768xbf16>
    %35 = vector.shape_cast %34 : vector<1x256x768xbf16> to vector<256x768xbf16>
    %36 = arith.truncf %33 : vector<32x256xf32> to vector<32x256xbf16>
    %cst_21 = arith.constant dense<0.000000e+00> : vector<32x768xf32>
    %37 = tpu.matmul %36, %35, %cst_21 {dimension_numbers = #tpu.dot_dimension_numbers<[1], [0], [0], [1], [0, 0, 1, 1], [], []>} : vector<32x256xbf16>, vector<256x768xbf16>, vector<32x768xf32> -> vector<32x768xf32>
    %c0_22 = arith.constant 0 : index
    %c0_23 = arith.constant 0 : index
    %c0_24 = arith.constant 0 : index
    %38 = vector.load %arg7[%c0_22, %c0_23, %c0_24] : memref<2x1x768xf32, #tpu.memory_space<vmem>>, vector<1x1x768xf32>
    %39 = vector.shape_cast %38 : vector<1x1x768xf32> to vector<1x768xf32>
    %40 = vector.broadcast %39 : vector<1x768xf32> to vector<32x768xf32>
    %41 = arith.addf %37, %40 : vector<32x768xf32>
    %42 = vector.extract_strided_slice %41 {offsets = [0, 0], sizes = [16, 128], strides = [1, 1]} : vector<32x768xf32> to vector<16x128xf32>
    %43 = vector.extract_strided_slice %41 {offsets = [0, 256], sizes = [16, 128], strides = [1, 1]} : vector<32x768xf32> to vector<16x128xf32>
    %44 = vector.extract_strided_slice %41 {offsets = [0, 512], sizes = [16, 128], strides = [1, 1]} : vector<32x768xf32> to vector<16x128xf32>
    %45 = arith.truncf %42 : vector<16x128xf32> to vector<16x128xbf16>
    %46 = arith.truncf %43 : vector<16x128xf32> to vector<16x128xbf16>
    %cst_25 = arith.constant dense<0.000000e+00> : vector<16x16xf32>
    %47 = tpu.matmul %45, %46, %cst_25 {dimension_numbers = #tpu.dot_dimension_numbers<[1], [1], [0], [0], [0, 0, 1, 0], [], []>} : vector<16x128xbf16>, vector<16x128xbf16>, vector<16x16xf32> -> vector<16x16xf32>
    %cst_26 = arith.constant 0.0883883461 : f32
    %48 = vector.broadcast %cst_26 : f32 to vector<16x16xf32>
    %49 = arith.mulf %47, %48 : vector<16x16xf32>
    %cst_27 = arith.constant dense<0xFF800000> : vector<16xf32>
    %50 = vector.multi_reduction <maximumf>, %49, %cst_27 [1] : vector<16x16xf32> to vector<16xf32>
    %51 = vector.shape_cast %50 : vector<16xf32> to vector<16x1xf32>
    %52 = vector.broadcast %51 : vector<16x1xf32> to vector<16x16xf32>
    %53 = arith.subf %49, %52 : vector<16x16xf32>
    %54 = math.exp %53 : vector<16x16xf32>
    %cst_28 = arith.constant dense<0.000000e+00> : vector<16xf32>
    %55 = vector.multi_reduction <add>, %54, %cst_28 [1] : vector<16x16xf32> to vector<16xf32>
    %56 = vector.shape_cast %55 : vector<16xf32> to vector<16x1xf32>
    %57 = tpu.reciprocal %56 {approx = true} : vector<16x1xf32> -> vector<16x1xf32>
    %58 = vector.broadcast %57 : vector<16x1xf32> to vector<16x16xf32>
    %59 = arith.mulf %54, %58 : vector<16x16xf32>
    %60 = arith.truncf %59 : vector<16x16xf32> to vector<16x16xbf16>
    %61 = arith.truncf %44 : vector<16x128xf32> to vector<16x128xbf16>
    %cst_29 = arith.constant dense<0.000000e+00> : vector<16x128xf32>
    %62 = tpu.matmul %60, %61, %cst_29 {dimension_numbers = #tpu.dot_dimension_numbers<[1], [0], [0], [1], [0, 0, 1, 1], [], []>} : vector<16x16xbf16>, vector<16x128xbf16>, vector<16x128xf32> -> vector<16x128xf32>
    %c0_30 = arith.constant 0 : index
    %c0_31 = arith.constant 0 : index
    %63 = vector.load %arg19[%c0_30, %c0_31] : memref<32x256xf32, #tpu.memory_space<vmem>>, vector<16x128xf32>
    tpu.vector_store %arg19[%c0_30, %c0_31], %62 {strides = array<i32>} : memref<32x256xf32, #tpu.memory_space<vmem>>, vector<16x128xf32>,
    %64 = vector.extract_strided_slice %41 {offsets = [0, 128], sizes = [16, 128], strides = [1, 1]} : vector<32x768xf32> to vector<16x128xf32>
    %65 = vector.extract_strided_slice %41 {offsets = [0, 384], sizes = [16, 128], strides = [1, 1]} : vector<32x768xf32> to vector<16x128xf32>
    %66 = vector.extract_strided_slice %41 {offsets = [0, 640], sizes = [16, 128], strides = [1, 1]} : vector<32x768xf32> to vector<16x128xf32>
    %67 = arith.truncf %64 : vector<16x128xf32> to vector<16x128xbf16>
    %68 = arith.truncf %65 : vector<16x128xf32> to vector<16x128xbf16>
    %cst_32 = arith.constant dense<0.000000e+00> : vector<16x16xf32>
    %69 = tpu.matmul %67, %68, %cst_32 {dimension_numbers = #tpu.dot_dimension_numbers<[1], [1], [0], [0], [0, 0, 1, 0], [], []>} : vector<16x128xbf16>, vector<16x128xbf16>, vector<16x16xf32> -> vector<16x16xf32>
    %cst_33 = arith.constant 0.0883883461 : f32
    %70 = vector.broadcast %cst_33 : f32 to vector<16x16xf32>
    %71 = arith.mulf %69, %70 : vector<16x16xf32>
    %cst_34 = arith.constant dense<0xFF800000> : vector<16xf32>
    %72 = vector.multi_reduction <maximumf>, %71, %cst_34 [1] : vector<16x16xf32> to vector<16xf32>
    %73 = vector.shape_cast %72 : vector<16xf32> to vector<16x1xf32>
    %74 = vector.broadcast %73 : vector<16x1xf32> to vector<16x16xf32>
    %75 = arith.subf %71, %74 : vector<16x16xf32>
    %76 = math.exp %75 : vector<16x16xf32>
    %cst_35 = arith.constant dense<0.000000e+00> : vector<16xf32>
    %77 = vector.multi_reduction <add>, %76, %cst_35 [1] : vector<16x16xf32> to vector<16xf32>
    %78 = vector.shape_cast %77 : vector<16xf32> to vector<16x1xf32>
    %79 = tpu.reciprocal %78 {approx = true} : vector<16x1xf32> -> vector<16x1xf32>
    %80 = vector.broadcast %79 : vector<16x1xf32> to vector<16x16xf32>
    %81 = arith.mulf %76, %80 : vector<16x16xf32>
    %82 = arith.truncf %81 : vector<16x16xf32> to vector<16x16xbf16>
    %83 = arith.truncf %66 : vector<16x128xf32> to vector<16x128xbf16>
    %cst_36 = arith.constant dense<0.000000e+00> : vector<16x128xf32>
    %84 = tpu.matmul %82, %83, %cst_36 {dimension_numbers = #tpu.dot_dimension_numbers<[1], [0], [0], [1], [0, 0, 1, 1], [], []>} : vector<16x16xbf16>, vector<16x128xbf16>, vector<16x128xf32> -> vector<16x128xf32>
    %c0_37 = arith.constant 0 : index
    %c128 = arith.constant 128 : index
    %85 = vector.load %arg19[%c0_37, %c128] : memref<32x256xf32, #tpu.memory_space<vmem>>, vector<16x128xf32>
    tpu.vector_store %arg19[%c0_37, %c128], %84 {strides = array<i32>} : memref<32x256xf32, #tpu.memory_space<vmem>>, vector<16x128xf32>,
    %86 = vector.extract_strided_slice %41 {offsets = [16, 0], sizes = [16, 128], strides = [1, 1]} : vector<32x768xf32> to vector<16x128xf32>
    %87 = vector.extract_strided_slice %41 {offsets = [16, 256], sizes = [16, 128], strides = [1, 1]} : vector<32x768xf32> to vector<16x128xf32>
    %88 = vector.extract_strided_slice %41 {offsets = [16, 512], sizes = [16, 128], strides = [1, 1]} : vector<32x768xf32> to vector<16x128xf32>
    %89 = arith.truncf %86 : vector<16x128xf32> to vector<16x128xbf16>
    %90 = arith.truncf %87 : vector<16x128xf32> to vector<16x128xbf16>
    %cst_38 = arith.constant dense<0.000000e+00> : vector<16x16xf32>
    %91 = tpu.matmul %89, %90, %cst_38 {dimension_numbers = #tpu.dot_dimension_numbers<[1], [1], [0], [0], [0, 0, 1, 0], [], []>} : vector<16x128xbf16>, vector<16x128xbf16>, vector<16x16xf32> -> vector<16x16xf32>
    %cst_39 = arith.constant 0.0883883461 : f32
    %92 = vector.broadcast %cst_39 : f32 to vector<16x16xf32>
    %93 = arith.mulf %91, %92 : vector<16x16xf32>
    %cst_40 = arith.constant dense<0xFF800000> : vector<16xf32>
    %94 = vector.multi_reduction <maximumf>, %93, %cst_40 [1] : vector<16x16xf32> to vector<16xf32>
    %95 = vector.shape_cast %94 : vector<16xf32> to vector<16x1xf32>
    %96 = vector.broadcast %95 : vector<16x1xf32> to vector<16x16xf32>
    %97 = arith.subf %93, %96 : vector<16x16xf32>
    %98 = math.exp %97 : vector<16x16xf32>
    %cst_41 = arith.constant dense<0.000000e+00> : vector<16xf32>
    %99 = vector.multi_reduction <add>, %98, %cst_41 [1] : vector<16x16xf32> to vector<16xf32>
    %100 = vector.shape_cast %99 : vector<16xf32> to vector<16x1xf32>
    %101 = tpu.reciprocal %100 {approx = true} : vector<16x1xf32> -> vector<16x1xf32>
    %102 = vector.broadcast %101 : vector<16x1xf32> to vector<16x16xf32>
    %103 = arith.mulf %98, %102 : vector<16x16xf32>
    %104 = arith.truncf %103 : vector<16x16xf32> to vector<16x16xbf16>
    %105 = arith.truncf %88 : vector<16x128xf32> to vector<16x128xbf16>
    %cst_42 = arith.constant dense<0.000000e+00> : vector<16x128xf32>
    %106 = tpu.matmul %104, %105, %cst_42 {dimension_numbers = #tpu.dot_dimension_numbers<[1], [0], [0], [1], [0, 0, 1, 1], [], []>} : vector<16x16xbf16>, vector<16x128xbf16>, vector<16x128xf32> -> vector<16x128xf32>
    %c16 = arith.constant 16 : index
    %c0_43 = arith.constant 0 : index
    %107 = vector.load %arg19[%c16, %c0_43] : memref<32x256xf32, #tpu.memory_space<vmem>>, vector<16x128xf32>
    tpu.vector_store %arg19[%c16, %c0_43], %106 {strides = array<i32>} : memref<32x256xf32, #tpu.memory_space<vmem>>, vector<16x128xf32>,
    %108 = vector.extract_strided_slice %41 {offsets = [16, 128], sizes = [16, 128], strides = [1, 1]} : vector<32x768xf32> to vector<16x128xf32>
    %109 = vector.extract_strided_slice %41 {offsets = [16, 384], sizes = [16, 128], strides = [1, 1]} : vector<32x768xf32> to vector<16x128xf32>
    %110 = vector.extract_strided_slice %41 {offsets = [16, 640], sizes = [16, 128], strides = [1, 1]} : vector<32x768xf32> to vector<16x128xf32>
    %111 = arith.truncf %108 : vector<16x128xf32> to vector<16x128xbf16>
    %112 = arith.truncf %109 : vector<16x128xf32> to vector<16x128xbf16>
    %cst_44 = arith.constant dense<0.000000e+00> : vector<16x16xf32>
    %113 = tpu.matmul %111, %112, %cst_44 {dimension_numbers = #tpu.dot_dimension_numbers<[1], [1], [0], [0], [0, 0, 1, 0], [], []>} : vector<16x128xbf16>, vector<16x128xbf16>, vector<16x16xf32> -> vector<16x16xf32>
    %cst_45 = arith.constant 0.0883883461 : f32
    %114 = vector.broadcast %cst_45 : f32 to vector<16x16xf32>
    %115 = arith.mulf %113, %114 : vector<16x16xf32>
    %cst_46 = arith.constant dense<0xFF800000> : vector<16xf32>
    %116 = vector.multi_reduction <maximumf>, %115, %cst_46 [1] : vector<16x16xf32> to vector<16xf32>
    %117 = vector.shape_cast %116 : vector<16xf32> to vector<16x1xf32>
    %118 = vector.broadcast %117 : vector<16x1xf32> to vector<16x16xf32>
    %119 = arith.subf %115, %118 : vector<16x16xf32>
    %120 = math.exp %119 : vector<16x16xf32>
    %cst_47 = arith.constant dense<0.000000e+00> : vector<16xf32>
    %121 = vector.multi_reduction <add>, %120, %cst_47 [1] : vector<16x16xf32> to vector<16xf32>
    %122 = vector.shape_cast %121 : vector<16xf32> to vector<16x1xf32>
    %123 = tpu.reciprocal %122 {approx = true} : vector<16x1xf32> -> vector<16x1xf32>
    %124 = vector.broadcast %123 : vector<16x1xf32> to vector<16x16xf32>
    %125 = arith.mulf %120, %124 : vector<16x16xf32>
    %126 = arith.truncf %125 : vector<16x16xf32> to vector<16x16xbf16>
    %127 = arith.truncf %110 : vector<16x128xf32> to vector<16x128xbf16>
    %cst_48 = arith.constant dense<0.000000e+00> : vector<16x128xf32>
    %128 = tpu.matmul %126, %127, %cst_48 {dimension_numbers = #tpu.dot_dimension_numbers<[1], [0], [0], [1], [0, 0, 1, 1], [], []>} : vector<16x16xbf16>, vector<16x128xbf16>, vector<16x128xf32> -> vector<16x128xf32>
    %c16_49 = arith.constant 16 : index
    %c128_50 = arith.constant 128 : index
    %129 = vector.load %arg19[%c16_49, %c128_50] : memref<32x256xf32, #tpu.memory_space<vmem>>, vector<16x128xf32>
    tpu.vector_store %arg19[%c16_49, %c128_50], %128 {strides = array<i32>} : memref<32x256xf32, #tpu.memory_space<vmem>>, vector<16x128xf32>,
    %c0_51 = arith.constant 0 : index
    %c0_52 = arith.constant 0 : index
    %130 = vector.load %arg19[%c0_51, %c0_52] : memref<32x256xf32, #tpu.memory_space<vmem>>, vector<32x256xf32>
    %c0_53 = arith.constant 0 : index
    %c0_54 = arith.constant 0 : index
    %c0_55 = arith.constant 0 : index
    %131 = vector.load %arg8[%c0_53, %c0_54, %c0_55] : memref<2x256x256xbf16, #tpu.memory_space<vmem>>, vector<1x256x256xbf16>
    %132 = vector.shape_cast %131 : vector<1x256x256xbf16> to vector<256x256xbf16>
    %133 = arith.truncf %130 : vector<32x256xf32> to vector<32x256xbf16>
    %cst_56 = arith.constant dense<0.000000e+00> : vector<32x256xf32>
    %134 = tpu.matmul %133, %132, %cst_56 {dimension_numbers = #tpu.dot_dimension_numbers<[1], [0], [0], [1], [0, 0, 1, 1], [], []>} : vector<32x256xbf16>, vector<256x256xbf16>, vector<32x256xf32> -> vector<32x256xf32>
    %135 = arith.addf %7, %134 : vector<32x256xf32>
    %c0_57 = arith.constant 0 : index
    %c0_58 = arith.constant 0 : index
    %c0_59 = arith.constant 0 : index
    %136 = vector.load %arg9[%c0_57, %c0_58, %c0_59] : memref<2x1x256xf32, #tpu.memory_space<vmem>>, vector<1x1x256xf32>
    %137 = vector.shape_cast %136 : vector<1x1x256xf32> to vector<1x256xf32>
    %138 = vector.broadcast %137 : vector<1x256xf32> to vector<32x256xf32>
    %139 = arith.addf %135, %138 : vector<32x256xf32>
    %c0_60 = arith.constant 0 : index
    %c0_61 = arith.constant 0 : index
    %c0_62 = arith.constant 0 : index
    %140 = vector.load %arg10[%c0_60, %c0_61, %c0_62] : memref<2x1x256xf32, #tpu.memory_space<vmem>>, vector<1x1x256xf32>
    %141 = vector.shape_cast %140 : vector<1x1x256xf32> to vector<1x256xf32>
    %c0_63 = arith.constant 0 : index
    %c0_64 = arith.constant 0 : index
    %c0_65 = arith.constant 0 : index
    %142 = vector.load %arg11[%c0_63, %c0_64, %c0_65] : memref<2x1x256xf32, #tpu.memory_space<vmem>>, vector<1x1x256xf32>
    %143 = vector.shape_cast %142 : vector<1x1x256xf32> to vector<1x256xf32>
    %cst_66 = arith.constant dense<0.000000e+00> : vector<32xf32>
    %144 = vector.multi_reduction <add>, %139, %cst_66 [1] : vector<32x256xf32> to vector<32xf32>
    %145 = vector.shape_cast %144 : vector<32xf32> to vector<32x1xf32>
    %cst_67 = arith.constant 2.560000e+02 : f32
    %146 = vector.broadcast %cst_67 : f32 to vector<32x1xf32>
    %147 = arith.divf %145, %146 : vector<32x1xf32>
    %148 = vector.broadcast %147 : vector<32x1xf32> to vector<32x256xf32>
    %149 = arith.subf %139, %148 : vector<32x256xf32>
    %150 = arith.mulf %149, %149 : vector<32x256xf32>
    %cst_68 = arith.constant dense<0.000000e+00> : vector<32xf32>
    %151 = vector.multi_reduction <add>, %150, %cst_68 [1] : vector<32x256xf32> to vector<32xf32>
    %152 = vector.shape_cast %151 : vector<32xf32> to vector<32x1xf32>
    %cst_69 = arith.constant 2.560000e+02 : f32
    %153 = vector.broadcast %cst_69 : f32 to vector<32x1xf32>
    %154 = arith.divf %152, %153 : vector<32x1xf32>
    %155 = vector.broadcast %147 : vector<32x1xf32> to vector<32x256xf32>
    %156 = arith.subf %139, %155 : vector<32x256xf32>
    %cst_70 = arith.constant 9.99999997E-7 : f32
    %157 = vector.broadcast %cst_70 : f32 to vector<32x1xf32>
    %158 = arith.addf %154, %157 : vector<32x1xf32>
    %159 = math.rsqrt %158 : vector<32x1xf32>
    %160 = vector.broadcast %159 : vector<32x1xf32> to vector<32x256xf32>
    %161 = arith.mulf %156, %160 : vector<32x256xf32>
    %162 = vector.broadcast %141 : vector<1x256xf32> to vector<32x256xf32>
    %163 = arith.mulf %161, %162 : vector<32x256xf32>
    %164 = vector.broadcast %143 : vector<1x256xf32> to vector<32x256xf32>
    %165 = arith.addf %163, %164 : vector<32x256xf32>
    %c0_71 = arith.constant 0 : index
    %c0_72 = arith.constant 0 : index
    %c0_73 = arith.constant 0 : index
    %166 = vector.load %arg12[%c0_71, %c0_72, %c0_73] : memref<2x256x512xbf16, #tpu.memory_space<vmem>>, vector<1x256x512xbf16>
    %167 = vector.shape_cast %166 : vector<1x256x512xbf16> to vector<256x512xbf16>
    %168 = arith.truncf %165 : vector<32x256xf32> to vector<32x256xbf16>
    %cst_74 = arith.constant dense<0.000000e+00> : vector<32x512xf32>
    %169 = tpu.matmul %168, %167, %cst_74 {dimension_numbers = #tpu.dot_dimension_numbers<[1], [0], [0], [1], [0, 0, 1, 1], [], []>} : vector<32x256xbf16>, vector<256x512xbf16>, vector<32x512xf32> -> vector<32x512xf32>
    %c0_75 = arith.constant 0 : index
    %c0_76 = arith.constant 0 : index
    %c0_77 = arith.constant 0 : index
    %170 = vector.load %arg13[%c0_75, %c0_76, %c0_77] : memref<2x1x512xf32, #tpu.memory_space<vmem>>, vector<1x1x512xf32>
    %171 = vector.shape_cast %170 : vector<1x1x512xf32> to vector<1x512xf32>
    %172 = vector.broadcast %171 : vector<1x512xf32> to vector<32x512xf32>
    %173 = arith.addf %169, %172 : vector<32x512xf32>
    %174 = arith.mulf %173, %173 : vector<32x512xf32>
    %175 = arith.mulf %173, %174 : vector<32x512xf32>
    %cst_78 = arith.constant 4.471500e-02 : f32
    %176 = vector.broadcast %cst_78 : f32 to vector<32x512xf32>
    %177 = arith.mulf %176, %175 : vector<32x512xf32>
    %178 = arith.addf %173, %177 : vector<32x512xf32>
    %cst_79 = arith.constant 0.797884583 : f32
    %179 = vector.broadcast %cst_79 : f32 to vector<32x512xf32>
    %180 = arith.mulf %179, %178 : vector<32x512xf32>
    %181 = math.tanh %180 : vector<32x512xf32>
    %cst_80 = arith.constant 1.000000e+00 : f32
    %182 = vector.broadcast %cst_80 : f32 to vector<32x512xf32>
    %183 = arith.addf %182, %181 : vector<32x512xf32>
    %cst_81 = arith.constant 5.000000e-01 : f32
    %184 = vector.broadcast %cst_81 : f32 to vector<32x512xf32>
    %185 = arith.mulf %184, %183 : vector<32x512xf32>
    %186 = arith.mulf %173, %185 : vector<32x512xf32>
    %c0_82 = arith.constant 0 : index
    %c0_83 = arith.constant 0 : index
    %c0_84 = arith.constant 0 : index
    %187 = vector.load %arg14[%c0_82, %c0_83, %c0_84] : memref<2x512x256xbf16, #tpu.memory_space<vmem>>, vector<1x512x256xbf16>
    %188 = vector.shape_cast %187 : vector<1x512x256xbf16> to vector<512x256xbf16>
    %189 = arith.truncf %186 : vector<32x512xf32> to vector<32x512xbf16>
    %cst_85 = arith.constant dense<0.000000e+00> : vector<32x256xf32>
    %190 = tpu.matmul %189, %188, %cst_85 {dimension_numbers = #tpu.dot_dimension_numbers<[1], [0], [0], [1], [0, 0, 1, 1], [], []>} : vector<32x512xbf16>, vector<512x256xbf16>, vector<32x256xf32> -> vector<32x256xf32>
    %191 = arith.addf %139, %190 : vector<32x256xf32>
    %c0_86 = arith.constant 0 : index
    %c0_87 = arith.constant 0 : index
    %c0_88 = arith.constant 0 : index
    %192 = vector.load %arg15[%c0_86, %c0_87, %c0_88] : memref<2x1x256xf32, #tpu.memory_space<vmem>>, vector<1x1x256xf32>
    %193 = vector.shape_cast %192 : vector<1x1x256xf32> to vector<1x256xf32>
    %194 = vector.broadcast %193 : vector<1x256xf32> to vector<32x256xf32>
    %195 = arith.addf %191, %194 : vector<32x256xf32>
    %c1 = arith.constant 1 : index
    %c0_89 = arith.constant 0 : index
    %c0_90 = arith.constant 0 : index
    %196 = vector.load %arg4[%c1, %c0_89, %c0_90] : memref<2x1x256xf32, #tpu.memory_space<vmem>>, vector<1x1x256xf32>
    %197 = vector.shape_cast %196 : vector<1x1x256xf32> to vector<1x256xf32>
    %c1_91 = arith.constant 1 : index
    %c0_92 = arith.constant 0 : index
    %c0_93 = arith.constant 0 : index
    %198 = vector.load %arg5[%c1_91, %c0_92, %c0_93] : memref<2x1x256xf32, #tpu.memory_space<vmem>>, vector<1x1x256xf32>
    %199 = vector.shape_cast %198 : vector<1x1x256xf32> to vector<1x256xf32>
    %cst_94 = arith.constant dense<0.000000e+00> : vector<32xf32>
    %200 = vector.multi_reduction <add>, %195, %cst_94 [1] : vector<32x256xf32> to vector<32xf32>
    %201 = vector.shape_cast %200 : vector<32xf32> to vector<32x1xf32>
    %cst_95 = arith.constant 2.560000e+02 : f32
    %202 = vector.broadcast %cst_95 : f32 to vector<32x1xf32>
    %203 = arith.divf %201, %202 : vector<32x1xf32>
    %204 = vector.broadcast %203 : vector<32x1xf32> to vector<32x256xf32>
    %205 = arith.subf %195, %204 : vector<32x256xf32>
    %206 = arith.mulf %205, %205 : vector<32x256xf32>
    %cst_96 = arith.constant dense<0.000000e+00> : vector<32xf32>
    %207 = vector.multi_reduction <add>, %206, %cst_96 [1] : vector<32x256xf32> to vector<32xf32>
    %208 = vector.shape_cast %207 : vector<32xf32> to vector<32x1xf32>
    %cst_97 = arith.constant 2.560000e+02 : f32
    %209 = vector.broadcast %cst_97 : f32 to vector<32x1xf32>
    %210 = arith.divf %208, %209 : vector<32x1xf32>
    %211 = vector.broadcast %203 : vector<32x1xf32> to vector<32x256xf32>
    %212 = arith.subf %195, %211 : vector<32x256xf32>
    %cst_98 = arith.constant 9.99999997E-7 : f32
    %213 = vector.broadcast %cst_98 : f32 to vector<32x1xf32>
    %214 = arith.addf %210, %213 : vector<32x1xf32>
    %215 = math.rsqrt %214 : vector<32x1xf32>
    %216 = vector.broadcast %215 : vector<32x1xf32> to vector<32x256xf32>
    %217 = arith.mulf %212, %216 : vector<32x256xf32>
    %218 = vector.broadcast %197 : vector<1x256xf32> to vector<32x256xf32>
    %219 = arith.mulf %217, %218 : vector<32x256xf32>
    %220 = vector.broadcast %199 : vector<1x256xf32> to vector<32x256xf32>
    %221 = arith.addf %219, %220 : vector<32x256xf32>
    %c1_99 = arith.constant 1 : index
    %c0_100 = arith.constant 0 : index
    %c0_101 = arith.constant 0 : index
    %222 = vector.load %arg6[%c1_99, %c0_100, %c0_101] : memref<2x256x768xbf16, #tpu.memory_space<vmem>>, vector<1x256x768xbf16>
    %223 = vector.shape_cast %222 : vector<1x256x768xbf16> to vector<256x768xbf16>
    %224 = arith.truncf %221 : vector<32x256xf32> to vector<32x256xbf16>
    %cst_102 = arith.constant dense<0.000000e+00> : vector<32x768xf32>
    %225 = tpu.matmul %224, %223, %cst_102 {dimension_numbers = #tpu.dot_dimension_numbers<[1], [0], [0], [1], [0, 0, 1, 1], [], []>} : vector<32x256xbf16>, vector<256x768xbf16>, vector<32x768xf32> -> vector<32x768xf32>
    %c1_103 = arith.constant 1 : index
    %c0_104 = arith.constant 0 : index
    %c0_105 = arith.constant 0 : index
    %226 = vector.load %arg7[%c1_103, %c0_104, %c0_105] : memref<2x1x768xf32, #tpu.memory_space<vmem>>, vector<1x1x768xf32>
    %227 = vector.shape_cast %226 : vector<1x1x768xf32> to vector<1x768xf32>
    %228 = vector.broadcast %227 : vector<1x768xf32> to vector<32x768xf32>
    %229 = arith.addf %225, %228 : vector<32x768xf32>
    %230 = vector.extract_strided_slice %229 {offsets = [0, 0], sizes = [16, 128], strides = [1, 1]} : vector<32x768xf32> to vector<16x128xf32>
    %231 = vector.extract_strided_slice %229 {offsets = [0, 256], sizes = [16, 128], strides = [1, 1]} : vector<32x768xf32> to vector<16x128xf32>
    %232 = vector.extract_strided_slice %229 {offsets = [0, 512], sizes = [16, 128], strides = [1, 1]} : vector<32x768xf32> to vector<16x128xf32>
    %233 = arith.truncf %230 : vector<16x128xf32> to vector<16x128xbf16>
    %234 = arith.truncf %231 : vector<16x128xf32> to vector<16x128xbf16>
    %cst_106 = arith.constant dense<0.000000e+00> : vector<16x16xf32>
    %235 = tpu.matmul %233, %234, %cst_106 {dimension_numbers = #tpu.dot_dimension_numbers<[1], [1], [0], [0], [0, 0, 1, 0], [], []>} : vector<16x128xbf16>, vector<16x128xbf16>, vector<16x16xf32> -> vector<16x16xf32>
    %cst_107 = arith.constant 0.0883883461 : f32
    %236 = vector.broadcast %cst_107 : f32 to vector<16x16xf32>
    %237 = arith.mulf %235, %236 : vector<16x16xf32>
    %cst_108 = arith.constant dense<0xFF800000> : vector<16xf32>
    %238 = vector.multi_reduction <maximumf>, %237, %cst_108 [1] : vector<16x16xf32> to vector<16xf32>
    %239 = vector.shape_cast %238 : vector<16xf32> to vector<16x1xf32>
    %240 = vector.broadcast %239 : vector<16x1xf32> to vector<16x16xf32>
    %241 = arith.subf %237, %240 : vector<16x16xf32>
    %242 = math.exp %241 : vector<16x16xf32>
    %cst_109 = arith.constant dense<0.000000e+00> : vector<16xf32>
    %243 = vector.multi_reduction <add>, %242, %cst_109 [1] : vector<16x16xf32> to vector<16xf32>
    %244 = vector.shape_cast %243 : vector<16xf32> to vector<16x1xf32>
    %245 = tpu.reciprocal %244 {approx = true} : vector<16x1xf32> -> vector<16x1xf32>
    %246 = vector.broadcast %245 : vector<16x1xf32> to vector<16x16xf32>
    %247 = arith.mulf %242, %246 : vector<16x16xf32>
    %248 = arith.truncf %247 : vector<16x16xf32> to vector<16x16xbf16>
    %249 = arith.truncf %232 : vector<16x128xf32> to vector<16x128xbf16>
    %cst_110 = arith.constant dense<0.000000e+00> : vector<16x128xf32>
    %250 = tpu.matmul %248, %249, %cst_110 {dimension_numbers = #tpu.dot_dimension_numbers<[1], [0], [0], [1], [0, 0, 1, 1], [], []>} : vector<16x16xbf16>, vector<16x128xbf16>, vector<16x128xf32> -> vector<16x128xf32>
    %c0_111 = arith.constant 0 : index
    %c0_112 = arith.constant 0 : index
    %251 = vector.load %arg19[%c0_111, %c0_112] : memref<32x256xf32, #tpu.memory_space<vmem>>, vector<16x128xf32>
    tpu.vector_store %arg19[%c0_111, %c0_112], %250 {strides = array<i32>} : memref<32x256xf32, #tpu.memory_space<vmem>>, vector<16x128xf32>,
    %252 = vector.extract_strided_slice %229 {offsets = [0, 128], sizes = [16, 128], strides = [1, 1]} : vector<32x768xf32> to vector<16x128xf32>
    %253 = vector.extract_strided_slice %229 {offsets = [0, 384], sizes = [16, 128], strides = [1, 1]} : vector<32x768xf32> to vector<16x128xf32>
    %254 = vector.extract_strided_slice %229 {offsets = [0, 640], sizes = [16, 128], strides = [1, 1]} : vector<32x768xf32> to vector<16x128xf32>
    %255 = arith.truncf %252 : vector<16x128xf32> to vector<16x128xbf16>
    %256 = arith.truncf %253 : vector<16x128xf32> to vector<16x128xbf16>
    %cst_113 = arith.constant dense<0.000000e+00> : vector<16x16xf32>
    %257 = tpu.matmul %255, %256, %cst_113 {dimension_numbers = #tpu.dot_dimension_numbers<[1], [1], [0], [0], [0, 0, 1, 0], [], []>} : vector<16x128xbf16>, vector<16x128xbf16>, vector<16x16xf32> -> vector<16x16xf32>
    %cst_114 = arith.constant 0.0883883461 : f32
    %258 = vector.broadcast %cst_114 : f32 to vector<16x16xf32>
    %259 = arith.mulf %257, %258 : vector<16x16xf32>
    %cst_115 = arith.constant dense<0xFF800000> : vector<16xf32>
    %260 = vector.multi_reduction <maximumf>, %259, %cst_115 [1] : vector<16x16xf32> to vector<16xf32>
    %261 = vector.shape_cast %260 : vector<16xf32> to vector<16x1xf32>
    %262 = vector.broadcast %261 : vector<16x1xf32> to vector<16x16xf32>
    %263 = arith.subf %259, %262 : vector<16x16xf32>
    %264 = math.exp %263 : vector<16x16xf32>
    %cst_116 = arith.constant dense<0.000000e+00> : vector<16xf32>
    %265 = vector.multi_reduction <add>, %264, %cst_116 [1] : vector<16x16xf32> to vector<16xf32>
    %266 = vector.shape_cast %265 : vector<16xf32> to vector<16x1xf32>
    %267 = tpu.reciprocal %266 {approx = true} : vector<16x1xf32> -> vector<16x1xf32>
    %268 = vector.broadcast %267 : vector<16x1xf32> to vector<16x16xf32>
    %269 = arith.mulf %264, %268 : vector<16x16xf32>
    %270 = arith.truncf %269 : vector<16x16xf32> to vector<16x16xbf16>
    %271 = arith.truncf %254 : vector<16x128xf32> to vector<16x128xbf16>
    %cst_117 = arith.constant dense<0.000000e+00> : vector<16x128xf32>
    %272 = tpu.matmul %270, %271, %cst_117 {dimension_numbers = #tpu.dot_dimension_numbers<[1], [0], [0], [1], [0, 0, 1, 1], [], []>} : vector<16x16xbf16>, vector<16x128xbf16>, vector<16x128xf32> -> vector<16x128xf32>
    %c0_118 = arith.constant 0 : index
    %c128_119 = arith.constant 128 : index
    %273 = vector.load %arg19[%c0_118, %c128_119] : memref<32x256xf32, #tpu.memory_space<vmem>>, vector<16x128xf32>
    tpu.vector_store %arg19[%c0_118, %c128_119], %272 {strides = array<i32>} : memref<32x256xf32, #tpu.memory_space<vmem>>, vector<16x128xf32>,
    %274 = vector.extract_strided_slice %229 {offsets = [16, 0], sizes = [16, 128], strides = [1, 1]} : vector<32x768xf32> to vector<16x128xf32>
    %275 = vector.extract_strided_slice %229 {offsets = [16, 256], sizes = [16, 128], strides = [1, 1]} : vector<32x768xf32> to vector<16x128xf32>
    %276 = vector.extract_strided_slice %229 {offsets = [16, 512], sizes = [16, 128], strides = [1, 1]} : vector<32x768xf32> to vector<16x128xf32>
    %277 = arith.truncf %274 : vector<16x128xf32> to vector<16x128xbf16>
    %278 = arith.truncf %275 : vector<16x128xf32> to vector<16x128xbf16>
    %cst_120 = arith.constant dense<0.000000e+00> : vector<16x16xf32>
    %279 = tpu.matmul %277, %278, %cst_120 {dimension_numbers = #tpu.dot_dimension_numbers<[1], [1], [0], [0], [0, 0, 1, 0], [], []>} : vector<16x128xbf16>, vector<16x128xbf16>, vector<16x16xf32> -> vector<16x16xf32>
    %cst_121 = arith.constant 0.0883883461 : f32
    %280 = vector.broadcast %cst_121 : f32 to vector<16x16xf32>
    %281 = arith.mulf %279, %280 : vector<16x16xf32>
    %cst_122 = arith.constant dense<0xFF800000> : vector<16xf32>
    %282 = vector.multi_reduction <maximumf>, %281, %cst_122 [1] : vector<16x16xf32> to vector<16xf32>
    %283 = vector.shape_cast %282 : vector<16xf32> to vector<16x1xf32>
    %284 = vector.broadcast %283 : vector<16x1xf32> to vector<16x16xf32>
    %285 = arith.subf %281, %284 : vector<16x16xf32>
    %286 = math.exp %285 : vector<16x16xf32>
    %cst_123 = arith.constant dense<0.000000e+00> : vector<16xf32>
    %287 = vector.multi_reduction <add>, %286, %cst_123 [1] : vector<16x16xf32> to vector<16xf32>
    %288 = vector.shape_cast %287 : vector<16xf32> to vector<16x1xf32>
    %289 = tpu.reciprocal %288 {approx = true} : vector<16x1xf32> -> vector<16x1xf32>
    %290 = vector.broadcast %289 : vector<16x1xf32> to vector<16x16xf32>
    %291 = arith.mulf %286, %290 : vector<16x16xf32>
    %292 = arith.truncf %291 : vector<16x16xf32> to vector<16x16xbf16>
    %293 = arith.truncf %276 : vector<16x128xf32> to vector<16x128xbf16>
    %cst_124 = arith.constant dense<0.000000e+00> : vector<16x128xf32>
    %294 = tpu.matmul %292, %293, %cst_124 {dimension_numbers = #tpu.dot_dimension_numbers<[1], [0], [0], [1], [0, 0, 1, 1], [], []>} : vector<16x16xbf16>, vector<16x128xbf16>, vector<16x128xf32> -> vector<16x128xf32>
    %c16_125 = arith.constant 16 : index
    %c0_126 = arith.constant 0 : index
    %295 = vector.load %arg19[%c16_125, %c0_126] : memref<32x256xf32, #tpu.memory_space<vmem>>, vector<16x128xf32>
    tpu.vector_store %arg19[%c16_125, %c0_126], %294 {strides = array<i32>} : memref<32x256xf32, #tpu.memory_space<vmem>>, vector<16x128xf32>,
    %296 = vector.extract_strided_slice %229 {offsets = [16, 128], sizes = [16, 128], strides = [1, 1]} : vector<32x768xf32> to vector<16x128xf32>
    %297 = vector.extract_strided_slice %229 {offsets = [16, 384], sizes = [16, 128], strides = [1, 1]} : vector<32x768xf32> to vector<16x128xf32>
    %298 = vector.extract_strided_slice %229 {offsets = [16, 640], sizes = [16, 128], strides = [1, 1]} : vector<32x768xf32> to vector<16x128xf32>
    %299 = arith.truncf %296 : vector<16x128xf32> to vector<16x128xbf16>
    %300 = arith.truncf %297 : vector<16x128xf32> to vector<16x128xbf16>
    %cst_127 = arith.constant dense<0.000000e+00> : vector<16x16xf32>
    %301 = tpu.matmul %299, %300, %cst_127 {dimension_numbers = #tpu.dot_dimension_numbers<[1], [1], [0], [0], [0, 0, 1, 0], [], []>} : vector<16x128xbf16>, vector<16x128xbf16>, vector<16x16xf32> -> vector<16x16xf32>
    %cst_128 = arith.constant 0.0883883461 : f32
    %302 = vector.broadcast %cst_128 : f32 to vector<16x16xf32>
    %303 = arith.mulf %301, %302 : vector<16x16xf32>
    %cst_129 = arith.constant dense<0xFF800000> : vector<16xf32>
    %304 = vector.multi_reduction <maximumf>, %303, %cst_129 [1] : vector<16x16xf32> to vector<16xf32>
    %305 = vector.shape_cast %304 : vector<16xf32> to vector<16x1xf32>
    %306 = vector.broadcast %305 : vector<16x1xf32> to vector<16x16xf32>
    %307 = arith.subf %303, %306 : vector<16x16xf32>
    %308 = math.exp %307 : vector<16x16xf32>
    %cst_130 = arith.constant dense<0.000000e+00> : vector<16xf32>
    %309 = vector.multi_reduction <add>, %308, %cst_130 [1] : vector<16x16xf32> to vector<16xf32>
    %310 = vector.shape_cast %309 : vector<16xf32> to vector<16x1xf32>
    %311 = tpu.reciprocal %310 {approx = true} : vector<16x1xf32> -> vector<16x1xf32>
    %312 = vector.broadcast %311 : vector<16x1xf32> to vector<16x16xf32>
    %313 = arith.mulf %308, %312 : vector<16x16xf32>
    %314 = arith.truncf %313 : vector<16x16xf32> to vector<16x16xbf16>
    %315 = arith.truncf %298 : vector<16x128xf32> to vector<16x128xbf16>
    %cst_131 = arith.constant dense<0.000000e+00> : vector<16x128xf32>
    %316 = tpu.matmul %314, %315, %cst_131 {dimension_numbers = #tpu.dot_dimension_numbers<[1], [0], [0], [1], [0, 0, 1, 1], [], []>} : vector<16x16xbf16>, vector<16x128xbf16>, vector<16x128xf32> -> vector<16x128xf32>
    %c16_132 = arith.constant 16 : index
    %c128_133 = arith.constant 128 : index
    %317 = vector.load %arg19[%c16_132, %c128_133] : memref<32x256xf32, #tpu.memory_space<vmem>>, vector<16x128xf32>
    tpu.vector_store %arg19[%c16_132, %c128_133], %316 {strides = array<i32>} : memref<32x256xf32, #tpu.memory_space<vmem>>, vector<16x128xf32>,
    %c0_134 = arith.constant 0 : index
    %c0_135 = arith.constant 0 : index
    %318 = vector.load %arg19[%c0_134, %c0_135] : memref<32x256xf32, #tpu.memory_space<vmem>>, vector<32x256xf32>
    %c1_136 = arith.constant 1 : index
    %c0_137 = arith.constant 0 : index
    %c0_138 = arith.constant 0 : index
    %319 = vector.load %arg8[%c1_136, %c0_137, %c0_138] : memref<2x256x256xbf16, #tpu.memory_space<vmem>>, vector<1x256x256xbf16>
    %320 = vector.shape_cast %319 : vector<1x256x256xbf16> to vector<256x256xbf16>
    %321 = arith.truncf %318 : vector<32x256xf32> to vector<32x256xbf16>
    %cst_139 = arith.constant dense<0.000000e+00> : vector<32x256xf32>
    %322 = tpu.matmul %321, %320, %cst_139 {dimension_numbers = #tpu.dot_dimension_numbers<[1], [0], [0], [1], [0, 0, 1, 1], [], []>} : vector<32x256xbf16>, vector<256x256xbf16>, vector<32x256xf32> -> vector<32x256xf32>
    %323 = arith.addf %195, %322 : vector<32x256xf32>
    %c1_140 = arith.constant 1 : index
    %c0_141 = arith.constant 0 : index
    %c0_142 = arith.constant 0 : index
    %324 = vector.load %arg9[%c1_140, %c0_141, %c0_142] : memref<2x1x256xf32, #tpu.memory_space<vmem>>, vector<1x1x256xf32>
    %325 = vector.shape_cast %324 : vector<1x1x256xf32> to vector<1x256xf32>
    %326 = vector.broadcast %325 : vector<1x256xf32> to vector<32x256xf32>
    %327 = arith.addf %323, %326 : vector<32x256xf32>
    %c1_143 = arith.constant 1 : index
    %c0_144 = arith.constant 0 : index
    %c0_145 = arith.constant 0 : index
    %328 = vector.load %arg10[%c1_143, %c0_144, %c0_145] : memref<2x1x256xf32, #tpu.memory_space<vmem>>, vector<1x1x256xf32>
    %329 = vector.shape_cast %328 : vector<1x1x256xf32> to vector<1x256xf32>
    %c1_146 = arith.constant 1 : index
    %c0_147 = arith.constant 0 : index
    %c0_148 = arith.constant 0 : index
    %330 = vector.load %arg11[%c1_146, %c0_147, %c0_148] : memref<2x1x256xf32, #tpu.memory_space<vmem>>, vector<1x1x256xf32>
    %331 = vector.shape_cast %330 : vector<1x1x256xf32> to vector<1x256xf32>
    %cst_149 = arith.constant dense<0.000000e+00> : vector<32xf32>
    %332 = vector.multi_reduction <add>, %327, %cst_149 [1] : vector<32x256xf32> to vector<32xf32>
    %333 = vector.shape_cast %332 : vector<32xf32> to vector<32x1xf32>
    %cst_150 = arith.constant 2.560000e+02 : f32
    %334 = vector.broadcast %cst_150 : f32 to vector<32x1xf32>
    %335 = arith.divf %333, %334 : vector<32x1xf32>
    %336 = vector.broadcast %335 : vector<32x1xf32> to vector<32x256xf32>
    %337 = arith.subf %327, %336 : vector<32x256xf32>
    %338 = arith.mulf %337, %337 : vector<32x256xf32>
    %cst_151 = arith.constant dense<0.000000e+00> : vector<32xf32>
    %339 = vector.multi_reduction <add>, %338, %cst_151 [1] : vector<32x256xf32> to vector<32xf32>
    %340 = vector.shape_cast %339 : vector<32xf32> to vector<32x1xf32>
    %cst_152 = arith.constant 2.560000e+02 : f32
    %341 = vector.broadcast %cst_152 : f32 to vector<32x1xf32>
    %342 = arith.divf %340, %341 : vector<32x1xf32>
    %343 = vector.broadcast %335 : vector<32x1xf32> to vector<32x256xf32>
    %344 = arith.subf %327, %343 : vector<32x256xf32>
    %cst_153 = arith.constant 9.99999997E-7 : f32
    %345 = vector.broadcast %cst_153 : f32 to vector<32x1xf32>
    %346 = arith.addf %342, %345 : vector<32x1xf32>
    %347 = math.rsqrt %346 : vector<32x1xf32>
    %348 = vector.broadcast %347 : vector<32x1xf32> to vector<32x256xf32>
    %349 = arith.mulf %344, %348 : vector<32x256xf32>
    %350 = vector.broadcast %329 : vector<1x256xf32> to vector<32x256xf32>
    %351 = arith.mulf %349, %350 : vector<32x256xf32>
    %352 = vector.broadcast %331 : vector<1x256xf32> to vector<32x256xf32>
    %353 = arith.addf %351, %352 : vector<32x256xf32>
    %c1_154 = arith.constant 1 : index
    %c0_155 = arith.constant 0 : index
    %c0_156 = arith.constant 0 : index
    %354 = vector.load %arg12[%c1_154, %c0_155, %c0_156] : memref<2x256x512xbf16, #tpu.memory_space<vmem>>, vector<1x256x512xbf16>
    %355 = vector.shape_cast %354 : vector<1x256x512xbf16> to vector<256x512xbf16>
    %356 = arith.truncf %353 : vector<32x256xf32> to vector<32x256xbf16>
    %cst_157 = arith.constant dense<0.000000e+00> : vector<32x512xf32>
    %357 = tpu.matmul %356, %355, %cst_157 {dimension_numbers = #tpu.dot_dimension_numbers<[1], [0], [0], [1], [0, 0, 1, 1], [], []>} : vector<32x256xbf16>, vector<256x512xbf16>, vector<32x512xf32> -> vector<32x512xf32>
    %c1_158 = arith.constant 1 : index
    %c0_159 = arith.constant 0 : index
    %c0_160 = arith.constant 0 : index
    %358 = vector.load %arg13[%c1_158, %c0_159, %c0_160] : memref<2x1x512xf32, #tpu.memory_space<vmem>>, vector<1x1x512xf32>
    %359 = vector.shape_cast %358 : vector<1x1x512xf32> to vector<1x512xf32>
    %360 = vector.broadcast %359 : vector<1x512xf32> to vector<32x512xf32>
    %361 = arith.addf %357, %360 : vector<32x512xf32>
    %362 = arith.mulf %361, %361 : vector<32x512xf32>
    %363 = arith.mulf %361, %362 : vector<32x512xf32>
    %cst_161 = arith.constant 4.471500e-02 : f32
    %364 = vector.broadcast %cst_161 : f32 to vector<32x512xf32>
    %365 = arith.mulf %364, %363 : vector<32x512xf32>
    %366 = arith.addf %361, %365 : vector<32x512xf32>
    %cst_162 = arith.constant 0.797884583 : f32
    %367 = vector.broadcast %cst_162 : f32 to vector<32x512xf32>
    %368 = arith.mulf %367, %366 : vector<32x512xf32>
    %369 = math.tanh %368 : vector<32x512xf32>
    %cst_163 = arith.constant 1.000000e+00 : f32
    %370 = vector.broadcast %cst_163 : f32 to vector<32x512xf32>
    %371 = arith.addf %370, %369 : vector<32x512xf32>
    %cst_164 = arith.constant 5.000000e-01 : f32
    %372 = vector.broadcast %cst_164 : f32 to vector<32x512xf32>
    %373 = arith.mulf %372, %371 : vector<32x512xf32>
    %374 = arith.mulf %361, %373 : vector<32x512xf32>
    %c1_165 = arith.constant 1 : index
    %c0_166 = arith.constant 0 : index
    %c0_167 = arith.constant 0 : index
    %375 = vector.load %arg14[%c1_165, %c0_166, %c0_167] : memref<2x512x256xbf16, #tpu.memory_space<vmem>>, vector<1x512x256xbf16>
    %376 = vector.shape_cast %375 : vector<1x512x256xbf16> to vector<512x256xbf16>
    %377 = arith.truncf %374 : vector<32x512xf32> to vector<32x512xbf16>
    %cst_168 = arith.constant dense<0.000000e+00> : vector<32x256xf32>
    %378 = tpu.matmul %377, %376, %cst_168 {dimension_numbers = #tpu.dot_dimension_numbers<[1], [0], [0], [1], [0, 0, 1, 1], [], []>} : vector<32x512xbf16>, vector<512x256xbf16>, vector<32x256xf32> -> vector<32x256xf32>
    %379 = arith.addf %327, %378 : vector<32x256xf32>
    %c1_169 = arith.constant 1 : index
    %c0_170 = arith.constant 0 : index
    %c0_171 = arith.constant 0 : index
    %380 = vector.load %arg15[%c1_169, %c0_170, %c0_171] : memref<2x1x256xf32, #tpu.memory_space<vmem>>, vector<1x1x256xf32>
    %381 = vector.shape_cast %380 : vector<1x1x256xf32> to vector<1x256xf32>
    %382 = vector.broadcast %381 : vector<1x256xf32> to vector<32x256xf32>
    %383 = arith.addf %379, %382 : vector<32x256xf32>
    %c0_172 = arith.constant 0 : index
    %c0_173 = arith.constant 0 : index
    %384 = vector.load %arg16[%c0_172, %c0_173] : memref<1x256xf32, #tpu.memory_space<vmem>>, vector<1x256xf32>
    %c0_174 = arith.constant 0 : index
    %c0_175 = arith.constant 0 : index
    %385 = vector.load %arg17[%c0_174, %c0_175] : memref<1x256xf32, #tpu.memory_space<vmem>>, vector<1x256xf32>
    %cst_176 = arith.constant dense<0.000000e+00> : vector<32xf32>
    %386 = vector.multi_reduction <add>, %383, %cst_176 [1] : vector<32x256xf32> to vector<32xf32>
    %387 = vector.shape_cast %386 : vector<32xf32> to vector<32x1xf32>
    %cst_177 = arith.constant 2.560000e+02 : f32
    %388 = vector.broadcast %cst_177 : f32 to vector<32x1xf32>
    %389 = arith.divf %387, %388 : vector<32x1xf32>
    %390 = vector.broadcast %389 : vector<32x1xf32> to vector<32x256xf32>
    %391 = arith.subf %383, %390 : vector<32x256xf32>
    %392 = arith.mulf %391, %391 : vector<32x256xf32>
    %cst_178 = arith.constant dense<0.000000e+00> : vector<32xf32>
    %393 = vector.multi_reduction <add>, %392, %cst_178 [1] : vector<32x256xf32> to vector<32xf32>
    %394 = vector.shape_cast %393 : vector<32xf32> to vector<32x1xf32>
    %cst_179 = arith.constant 2.560000e+02 : f32
    %395 = vector.broadcast %cst_179 : f32 to vector<32x1xf32>
    %396 = arith.divf %394, %395 : vector<32x1xf32>
    %397 = vector.broadcast %389 : vector<32x1xf32> to vector<32x256xf32>
    %398 = arith.subf %383, %397 : vector<32x256xf32>
    %cst_180 = arith.constant 9.99999997E-7 : f32
    %399 = vector.broadcast %cst_180 : f32 to vector<32x1xf32>
    %400 = arith.addf %396, %399 : vector<32x1xf32>
    %401 = math.rsqrt %400 : vector<32x1xf32>
    %402 = vector.broadcast %401 : vector<32x1xf32> to vector<32x256xf32>
    %403 = arith.mulf %398, %402 : vector<32x256xf32>
    %404 = vector.broadcast %384 : vector<1x256xf32> to vector<32x256xf32>
    %405 = arith.mulf %403, %404 : vector<32x256xf32>
    %406 = vector.broadcast %385 : vector<1x256xf32> to vector<32x256xf32>
    %407 = arith.addf %405, %406 : vector<32x256xf32>
    %c0_181 = arith.constant 0 : index
    %c0_182 = arith.constant 0 : index
    %408 = vector.load %arg18[%c0_181, %c0_182] : memref<32x256xf32, #tpu.memory_space<vmem>>, vector<32x256xf32>
    tpu.vector_store %arg18[%c0_181, %c0_182], %407 {strides = array<i32>} : memref<32x256xf32, #tpu.memory_space<vmem>>, vector<32x256xf32>,
    return
  }
}

</mosaic_0001>

<bundles_post_ra>
// kernel: siglip_vision_transformer.1
= control target key start
LH: loop header
LB: loop body
LE: loop exit
PB: predicated region body
PF: predicated region fallthrough
CT: control target
= control target key end

     0   :  { %s10298_s0 = inlined_call_operand.vmem [shape: bf16[32,48], index: 0, kind: input, shape index: {}]   ;;  %s10299_s1 = inlined_call_operand.hbm [shape: bf16[48,256], index: 1, kind: input, shape index: {}]   ;;  %s10300_s2 = inlined_call_operand.hbm [shape: f32[1,256], index: 2, kind: input, shape index: {}]   ;;  %s10301_s3 = inlined_call_operand.hbm [shape: f32[32,256], index: 3, kind: input, shape index: {}]   ;;  %s10302_s4 = inlined_call_operand.vmem [shape: f32[2,1,256], index: 4, kind: input, shape index: {}]   ;;  %s10303_s5 = inlined_call_operand.hbm [shape: f32[2,1,256], index: 5, kind: input, shape index: {}]   ;;  %s10304_s6 = inlined_call_operand.hbm [shape: bf16[2,256,768], index: 6, kind: input, shape index: {}]   ;;  %s10305_s7 = inlined_call_operand.hbm [shape: f32[2,1,768], index: 7, kind: input, shape index: {}]   ;;  %s10306_s8 = inlined_call_operand.hbm [shape: bf16[2,256,256], index: 8, kind: input, shape index: {}]   ;;  %s10307_s9 = inlined_call_operand.hbm [shape: f32[2,1,256], index: 9, kind: input, shape index: {}]   ;;  %s10308_s10 = inlined_call_operand.hbm [shape: f32[2,1,256], index: 10, kind: input, shape index: {}]   ;;  %s10309_s11 = inlined_call_operand.hbm [shape: f32[2,1,256], index: 11, kind: input, shape index: {}]   ;;  %s10310_s12 = inlined_call_operand.vmem [shape: bf16[2,256,512], index: 12, kind: input, shape index: {}]   ;;  %s10311_s13 = inlined_call_operand.hbm [shape: f32[2,1,512], index: 13, kind: input, shape index: {}]   ;;  %s10312_s14 = inlined_call_operand.hbm [shape: bf16[2,512,256], index: 14, kind: input, shape index: {}]   ;;  %s10313_s15 = inlined_call_operand.hbm [shape: f32[2,1,256], index: 15, kind: input, shape index: {}]   ;;  %s10314_s16 = inlined_call_operand.hbm [shape: f32[1,256], index: 16, kind: input, shape index: {}]   ;;  %s10315_s17 = inlined_call_operand.hbm [shape: f32[1,256], index: 17, kind: input, shape index: {}]   ;;  %s10316_s18 = inlined_call_operand.hbm [shape: f32[32,256], index: 18, kind: output, shape index: {}]  }
   0x1   :  { %10324 = sst [smem:[#allocation37_spill]] %s10298_s0 }
   0x2   :  { %10325 = sst [smem:[#allocation38_spill]] %s10299_s1 }
   0x3   :  { %10326 = sst [smem:[#allocation39_spill]] %s10300_s2 }
   0x4   :  { %23 = vsyncpa [#allocation4], 0 }
   0x5   :  { %24 = vsyncpa [#allocation7], 0 }
   0x6   :  { %25 = vsyncpa [#allocation10], 0 }
   0x7   :  { %26 = vsyncpa [#allocation13], 0 }
   0x8   :  { %27 = vsyncpa [#allocation16], 0 }
   0x9   :  { %28 = vsyncpa [#allocation19], 0 }
   0xa   :  { %29 = vsyncpa [#allocation22], 0 }
   0xb   :  { %30 = vsyncpa [#allocation25], 0 }
   0xc   :  { %31 = vsyncpa [#allocation5], 0  ;;  %s8453_s27 = smov [#allocation6]   ;;  %s8454_s29 = smov [#allocation9]  }
   0xd   :  { %s52_s28 = sshll.u32 %s8453_s27, 4  ;;  %s75_s30 = sshll.u32 %s8454_s29, 4  ;;  %s53_s28 = int_to_ptr.vmem [resolvable:$true] %s52_s28  ;;  %s8579_s30 = int_to_ptr.vmem [resolvable:$true] %s75_s30 }
   0xe   :  { %s10327_s1 = sld [smem:[#allocation39_spill]] }
  0x14   :  { %s8083_s20 = scalar_lea.hbm %s10327_s1, 32 }
  0x15   :  { %p8084_p0 = scmp.ne.s32.totalorder %s10327_s1, %s8083_s20  ;;  %p8087_p1 = scmp.lt.u32.totalorder %s8083_s20, %s10327_s1 }
  0x17   :  { %p8089_p2 = pnand %p8087_p1, %p8084_p0 }
  0x19   :  { %8092 = shalt.err (!%p8089_p2)
}
  0x1a   :  { %s8093_s24 = scalar_lea.vmem %s53_s28, 32  ;;  %p8098_p4 = scmp.lt.s32.totalorder %s53_s28, %s53_s28 }
  0x1b   :  { %p8094_p3 = scmp.ne.s32.totalorder %s53_s28, %s8093_s24  ;;  %p8099_p5 = scmp.lt.s32.totalorder %s8093_s24, %s8093_s24 }
  0x1d   :  { %p8100_p6 = por %p8099_p5, %p8098_p4 }
  0x1f   :  { %p8101_p7 = pnand %p8100_p6, %p8094_p3 }
  0x21   :  { %8104 = shalt.err (!%p8101_p7)
}
  0x22   :  { %55 = dma.hbm_to_vmem [thread:$0]  %s10327_s1, 32, %s53_s28, [#allocation7]  }
  0x23   :  { %s8105_s0 = scalar_lea.hbm %s10303_s5, 64 }
  0x24   :  { %p8106_p8 = scmp.ne.s32.totalorder %s10303_s5, %s8105_s0  ;;  %p8109_p9 = scmp.lt.u32.totalorder %s8105_s0, %s10303_s5 }
  0x26   :  { %p8111_p10 = pnand %p8109_p9, %p8106_p8 }
  0x28   :  { %8114 = shalt.err (!%p8111_p10)
}
  0x29   :  { %s8115_s2 = scalar_lea.vmem %s8579_s30, 64  ;;  %p8120_p12 = scmp.lt.s32.totalorder %s8579_s30, %s8579_s30 }
  0x2a   :  { %p8116_p11 = scmp.ne.s32.totalorder %s8579_s30, %s8115_s2  ;;  %p8121_p13 = scmp.lt.s32.totalorder %s8115_s2, %s8115_s2 }
  0x2c   :  { %p8122_p0 = por %p8121_p13, %p8120_p12 }
  0x2e   :  { %p8123_p1 = pnand %p8122_p0, %p8116_p11 }
  0x30   :  { %8126 = shalt.err (!%p8123_p1)
}
  0x31   :  { %s10320_s28 = smov 32   ;;  %s10322_s1 = smov 2  }
  0x32   :  { %81 = dma.hbm_to_vmem [thread:$0]  %s10303_s5, 64, %s8579_s30, [#allocation10], %s10320_s28, %s10320_s28, %s10322_s1  }
  0x33   :  { %s8457_s25 = smov [#allocation12]   ;;  %s8127_s0 = scalar_lea.hbm %s10305_s7, 192 }
  0x34   :  { %s99_s26 = sshll.u32 %s8457_s25, 4  ;;  %p8128_p2 = scmp.ne.s32.totalorder %s10305_s7, %s8127_s0  ;;  %s100_s26 = int_to_ptr.vmem [resolvable:$true] %s99_s26 }
  0x35   :  { %p8131_p3 = scmp.lt.u32.totalorder %s8127_s0, %s10305_s7 }
  0x37   :  { %p8133_p4 = pnand %p8131_p3, %p8128_p2 }
  0x39   :  { %8136 = shalt.err (!%p8133_p4)
}
  0x3a   :  { %s8137_s2 = scalar_lea.vmem %s100_s26, 192  ;;  %p8142_p6 = scmp.lt.s32.totalorder %s100_s26, %s100_s26 }
  0x3b   :  { %p8138_p5 = scmp.ne.s32.totalorder %s100_s26, %s8137_s2  ;;  %p8143_p7 = scmp.lt.s32.totalorder %s8137_s2, %s8137_s2 }
  0x3d   :  { %p8144_p8 = por %p8143_p7, %p8142_p6 }
  0x3f   :  { %p8145_p9 = pnand %p8144_p8, %p8138_p5 }
  0x41   :  { %8148 = shalt.err (!%p8145_p9)
}
  0x42   :  { %s8458_s5 = smov 96   ;;  %s8459_s30 = smov 6  }
  0x43   :  { %105 = dma.hbm_to_vmem [thread:$0]  %s10305_s7, 192, %s100_s26, [#allocation13], %s8458_s5, %s8458_s5, %s8459_s30  }
  0x44   :  { %s8460_s25 = smov [#allocation15]   ;;  %s8461_s29 = smov [#allocation18]  }
  0x45   :  { %s123_s27 = sshll.u32 %s8460_s25, 4  ;;  %s147_s0 = sshll.u32 %s8461_s29, 4  ;;  %s124_s27 = int_to_ptr.vmem [resolvable:$true] %s123_s27  ;;  %s148_s0 = int_to_ptr.vmem [resolvable:$true] %s147_s0 }
  0x46   :  { %s8149_s20 = scalar_lea.hbm %s10307_s9, 64 }
  0x47   :  { %p8150_p10 = scmp.ne.s32.totalorder %s10307_s9, %s8149_s20  ;;  %p8153_p11 = scmp.lt.u32.totalorder %s8149_s20, %s10307_s9 }
  0x49   :  { %p8155_p12 = pnand %p8153_p11, %p8150_p10 }
  0x4b   :  { %8158 = shalt.err (!%p8155_p12)
}
  0x4c   :  { %s8159_s7 = scalar_lea.vmem %s124_s27, 64  ;;  %p8164_p0 = scmp.lt.s32.totalorder %s124_s27, %s124_s27 }
  0x4d   :  { %p8160_p13 = scmp.ne.s32.totalorder %s124_s27, %s8159_s7  ;;  %p8165_p1 = scmp.lt.s32.totalorder %s8159_s7, %s8159_s7 }
  0x4f   :  { %p8166_p2 = por %p8165_p1, %p8164_p0 }
  0x51   :  { %p8167_p3 = pnand %p8166_p2, %p8160_p13 }
  0x53   :  { %8170 = shalt.err (!%p8167_p3)
}
  0x54   :  { %s10328_s26 = smov 2   ;;  %s10329_s5 = smov 32  }
  0x55   :  { %129 = dma.hbm_to_vmem [thread:$0]  %s10307_s9, 64, %s124_s27, [#allocation16], %s10329_s5, %s10329_s5, %s10328_s26  }
  0x56   :  { %s8171_s1 = scalar_lea.hbm %s10309_s11, 64 }
  0x57   :  { %p8172_p4 = scmp.ne.s32.totalorder %s10309_s11, %s8171_s1  ;;  %p8175_p5 = scmp.lt.u32.totalorder %s8171_s1, %s10309_s11 }
  0x59   :  { %p8177_p6 = pnand %p8175_p5, %p8172_p4 }
  0x5b   :  { %8180 = shalt.err (!%p8177_p6)
}
  0x5c   :  { %s8181_s20 = scalar_lea.vmem %s148_s0, 64  ;;  %p8186_p8 = scmp.lt.s32.totalorder %s148_s0, %s148_s0 }
  0x5d   :  { %p8182_p7 = scmp.ne.s32.totalorder %s148_s0, %s8181_s20  ;;  %p8187_p9 = scmp.lt.s32.totalorder %s8181_s20, %s8181_s20 }
  0x5f   :  { %p8188_p10 = por %p8187_p9, %p8186_p8 }
  0x61   :  { %p8189_p11 = pnand %p8188_p10, %p8182_p7 }
  0x63   :  { %8192 = shalt.err (!%p8189_p11)
}
  0x64   :  { %153 = dma.hbm_to_vmem [thread:$0]  %s10309_s11, 64, %s148_s0, [#allocation19], %s10329_s5, %s10329_s5, %s10328_s26  }
  0x65   :  { %s8462_s22 = smov [#allocation21]   ;;  %s8463_s7 = smov [#allocation24]  }
  0x66   :  { %s173_s2 = sshll.u32 %s8462_s22, 4  ;;  %s198_s30 = sshll.u32 %s8463_s7, 4  ;;  %s174_s2 = int_to_ptr.vmem [resolvable:$true] %s173_s2  ;;  %s199_s30 = int_to_ptr.vmem [resolvable:$true] %s198_s30 }
  0x67   :  { %s8193_s28 = scalar_lea.hbm %s10312_s14, 16384 }
  0x68   :  { %p8194_p12 = scmp.ne.s32.totalorder %s10312_s14, %s8193_s28  ;;  %p8197_p13 = scmp.lt.u32.totalorder %s8193_s28, %s10312_s14 }
  0x6a   :  { %p8199_p0 = pnand %p8197_p13, %p8194_p12 }
  0x6c   :  { %8202 = shalt.err (!%p8199_p0)
}
  0x6d   :  { %s8203_s11 = scalar_lea.vmem %s174_s2, 16384  ;;  %p8208_p2 = scmp.lt.s32.totalorder %s174_s2, %s174_s2 }
  0x6e   :  { %p8204_p1 = scmp.ne.s32.totalorder %s174_s2, %s8203_s11  ;;  %p8209_p3 = scmp.lt.s32.totalorder %s8203_s11, %s8203_s11 }
  0x70   :  { %p8210_p4 = por %p8209_p3, %p8208_p2 }
  0x72   :  { %p8211_p5 = pnand %p8210_p4, %p8204_p1 }
  0x74   :  { %8214 = shalt.err (!%p8211_p5)
}
  0x75   :  { %s8464_s0 = smov 128   ;;  %s8465_s21 = smov 8  }
  0x76   :  { %179 = dma.hbm_to_vmem [thread:$0]  %s10312_s14, 16384, %s174_s2, [#allocation22], %s8464_s0, %s8464_s0, %s8465_s21  }
  0x77   :  { %s8215_s7 = scalar_lea.hbm %s10314_s16, 32 }
  0x78   :  { %p8216_p6 = scmp.ne.s32.totalorder %s10314_s16, %s8215_s7  ;;  %p8219_p7 = scmp.lt.u32.totalorder %s8215_s7, %s10314_s16 }
  0x7a   :  { %p8221_p8 = pnand %p8219_p7, %p8216_p6 }
  0x7c   :  { %8224 = shalt.err (!%p8221_p8)
}
  0x7d   :  { %s8225_s25 = scalar_lea.vmem %s199_s30, 32  ;;  %p8230_p10 = scmp.lt.s32.totalorder %s199_s30, %s199_s30 }
  0x7e   :  { %p8226_p9 = scmp.ne.s32.totalorder %s199_s30, %s8225_s25  ;;  %p8231_p11 = scmp.lt.s32.totalorder %s8225_s25, %s8225_s25 }
  0x80   :  { %p8232_p12 = por %p8231_p11, %p8230_p10 }
  0x82   :  { %p8233_p13 = pnand %p8232_p12, %p8226_p9 }
  0x84   :  { %8236 = shalt.err (!%p8233_p13)
}
  0x85   :  { %201 = dma.hbm_to_vmem [thread:$0]  %s10314_s16, 32, %s199_s30, [#allocation25]  }
  0x86   :  { %s8466_s29 = smov [#allocation3]   ;;  %s8467_s11 = smov [#allocation8]  }
  0x87   :  { %s39_s19 = sshll.u32 %s8466_s29, 4  ;;  %s61_s20 = sshll.u32 %s8467_s11, 4  ;;  %s40_s19 = int_to_ptr.vmem [resolvable:$true] %s39_s19  ;;  %s62_s20 = int_to_ptr.vmem [resolvable:$true] %s61_s20 }
  0x88   :  { %s10330_s22 = sld [smem:[#allocation38_spill]] }
  0x8e   :  { %s8237_s7 = scalar_lea.hbm %s10330_s22, 768 }
  0x8f   :  { %p8238_p0 = scmp.ne.s32.totalorder %s10330_s22, %s8237_s7  ;;  %p8241_p1 = scmp.lt.u32.totalorder %s8237_s7, %s10330_s22 }
  0x91   :  { %p8243_p2 = pnand %p8241_p1, %p8238_p0 }
  0x93   :  { %8246 = shalt.err (!%p8243_p2)
}
  0x94   :  { %s8247_s16 = scalar_lea.vmem %s40_s19, 768  ;;  %p8252_p4 = scmp.lt.s32.totalorder %s40_s19, %s40_s19 }
  0x95   :  { %p8248_p3 = scmp.ne.s32.totalorder %s40_s19, %s8247_s16  ;;  %p8253_p5 = scmp.lt.s32.totalorder %s8247_s16, %s8247_s16 }
  0x97   :  { %p8254_p6 = por %p8253_p5, %p8252_p4 }
  0x99   :  { %p8255_p7 = pnand %p8254_p6, %p8248_p3 }
  0x9b   :  { %8258 = shalt.err (!%p8255_p7)
}
  0x9c   :  { %45 = dma.hbm_to_vmem [thread:$0]  %s10330_s22, 768, %s40_s19, [#allocation4], %s8464_s0, %s8464_s0, %s8465_s21  }
  0x9d   :  { %s8259_s29 = scalar_lea.hbm %s10301_s3, 1024 }
  0x9e   :  { %p8260_p8 = scmp.ne.s32.totalorder %s10301_s3, %s8259_s29  ;;  %p8263_p9 = scmp.lt.u32.totalorder %s8259_s29, %s10301_s3 }
  0xa0   :  { %p8265_p10 = pnand %p8263_p9, %p8260_p8 }
  0xa2   :  { %8268 = shalt.err (!%p8265_p10)
}
  0xa3   :  { %s8269_s23 = scalar_lea.vmem %s62_s20, 1024  ;;  %p8274_p12 = scmp.lt.s32.totalorder %s62_s20, %s62_s20 }
  0xa4   :  { %p8270_p11 = scmp.ne.s32.totalorder %s62_s20, %s8269_s23  ;;  %p8275_p13 = scmp.lt.s32.totalorder %s8269_s23, %s8269_s23 }
  0xa6   :  { %p8276_p0 = por %p8275_p13, %p8274_p12 }
  0xa8   :  { %p8277_p1 = pnand %p8276_p0, %p8270_p11 }
  0xaa   :  { %8280 = shalt.err (!%p8277_p1)
}
  0xab   :  { %s8468_s19 = smov 256   ;;  %s8469_s22 = smov 16  }
  0xac   :  { %67 = dma.hbm_to_vmem [thread:$0]  %s10301_s3, 1024, %s62_s20, [#allocation7], %s8468_s19, %s8468_s19, %s8469_s22  }
  0xad   :  { %s8470_s1 = smov [#allocation11]   ;;  %s8281_s14 = scalar_lea.hbm %s10304_s6, 24576 }
  0xae   :  { %s87_s16 = sshll.u32 %s8470_s1, 4  ;;  %p8282_p2 = scmp.ne.s32.totalorder %s10304_s6, %s8281_s14  ;;  %s88_s16 = int_to_ptr.vmem [resolvable:$true] %s87_s16 }
  0xaf   :  { %p8285_p3 = scmp.lt.u32.totalorder %s8281_s14, %s10304_s6 }
  0xb1   :  { %p8287_p4 = pnand %p8285_p3, %p8282_p2 }
  0xb3   :  { %8290 = shalt.err (!%p8287_p4)
}
  0xb4   :  { %s8291_s27 = scalar_lea.vmem %s88_s16, 24576  ;;  %p8296_p6 = scmp.lt.s32.totalorder %s88_s16, %s88_s16 }
  0xb5   :  { %p8292_p5 = scmp.ne.s32.totalorder %s88_s16, %s8291_s27  ;;  %p8297_p7 = scmp.lt.s32.totalorder %s8291_s27, %s8291_s27 }
  0xb7   :  { %p8298_p8 = por %p8297_p7, %p8296_p6 }
  0xb9   :  { %p8299_p9 = pnand %p8298_p8, %p8292_p5 }
  0xbb   :  { %8302 = shalt.err (!%p8299_p9)
}
  0xbc   :  { %s8471_s3 = smov 384   ;;  %s8472_s20 = smov 24  }
  0xbd   :  { %93 = dma.hbm_to_vmem [thread:$0]  %s10304_s6, 24576, %s88_s16, [#allocation10], %s8471_s3, %s8471_s3, %s8472_s20  }
  0xbe   :  { %s8473_s24 = smov [#allocation14]   ;;  %s8474_s1 = smov [#allocation17]  }
  0xbf   :  { %s111_s28 = sshll.u32 %s8473_s24, 4  ;;  %s135_s30 = sshll.u32 %s8474_s1, 4  ;;  %s112_s28 = int_to_ptr.vmem [resolvable:$true] %s111_s28  ;;  %s8724_s30 = int_to_ptr.vmem [resolvable:$true] %s135_s30 }
  0xc0   :  { %s8303_s2 = scalar_lea.hbm %s10306_s8, 8192 }
  0xc1   :  { %p8304_p10 = scmp.ne.s32.totalorder %s10306_s8, %s8303_s2  ;;  %p8307_p11 = scmp.lt.u32.totalorder %s8303_s2, %s10306_s8 }
  0xc3   :  { %p8309_p12 = pnand %p8307_p11, %p8304_p10 }
  0xc5   :  { %8312 = shalt.err (!%p8309_p12)
}
  0xc6   :  { %s8313_s6 = scalar_lea.vmem %s112_s28, 8192  ;;  %p8318_p0 = scmp.lt.s32.totalorder %s112_s28, %s112_s28 }
  0xc7   :  { %p8314_p13 = scmp.ne.s32.totalorder %s112_s28, %s8313_s6  ;;  %p8319_p1 = scmp.lt.s32.totalorder %s8313_s6, %s8313_s6 }
  0xc9   :  { %p8320_p2 = por %p8319_p1, %p8318_p0 }
  0xcb   :  { %p8321_p3 = pnand %p8320_p2, %p8314_p13 }
  0xcd   :  { %8324 = shalt.err (!%p8321_p3)
}
  0xce   :  { %117 = dma.hbm_to_vmem [thread:$0]  %s10306_s8, 8192, %s112_s28, [#allocation13], %s8464_s0, %s8464_s0, %s8465_s21  }
  0xcf   :  { %s8325_s23 = scalar_lea.hbm %s10308_s10, 64 }
  0xd0   :  { %p8326_p4 = scmp.ne.s32.totalorder %s10308_s10, %s8325_s23  ;;  %p8329_p5 = scmp.lt.u32.totalorder %s8325_s23, %s10308_s10 }
  0xd2   :  { %p8331_p6 = pnand %p8329_p5, %p8326_p4 }
  0xd4   :  { %8334 = shalt.err (!%p8331_p6)
}
  0xd5   :  { %s8335_s2 = scalar_lea.vmem %s8724_s30, 64  ;;  %p8340_p8 = scmp.lt.s32.totalorder %s8724_s30, %s8724_s30 }
  0xd6   :  { %p8336_p7 = scmp.ne.s32.totalorder %s8724_s30, %s8335_s2  ;;  %p8341_p9 = scmp.lt.s32.totalorder %s8335_s2, %s8335_s2 }
  0xd8   :  { %p8342_p10 = por %p8341_p9, %p8340_p8 }
  0xda   :  { %p8343_p11 = pnand %p8342_p10, %p8336_p7 }
  0xdc   :  { %8346 = shalt.err (!%p8343_p11)
}
  0xdd   :  { %141 = dma.hbm_to_vmem [thread:$0]  %s10308_s10, 64, %s8724_s30, [#allocation16], %s10329_s5, %s10329_s5, %s10328_s26  }
  0xde   :  { %s8475_s21 = smov [#allocation20]   ;;  %s8347_s9 = scalar_lea.hbm %s10311_s13, 128 }
  0xdf   :  { %s161_s28 = sshll.u32 %s8475_s21, 4  ;;  %p8348_p12 = scmp.ne.s32.totalorder %s10311_s13, %s8347_s9  ;;  %s162_s28 = int_to_ptr.vmem [resolvable:$true] %s161_s28 }
  0xe0   :  { %p8351_p13 = scmp.lt.u32.totalorder %s8347_s9, %s10311_s13 }
  0xe2   :  { %p8353_p0 = pnand %p8351_p13, %p8348_p12 }
  0xe4   :  { %8356 = shalt.err (!%p8353_p0)
}
  0xe5   :  { %s8357_s20 = scalar_lea.vmem %s162_s28, 128  ;;  %p8362_p2 = scmp.lt.s32.totalorder %s162_s28, %s162_s28 }
  0xe6   :  { %p8358_p1 = scmp.ne.s32.totalorder %s162_s28, %s8357_s20  ;;  %p8363_p3 = scmp.lt.s32.totalorder %s8357_s20, %s8357_s20 }
  0xe8   :  { %p8364_p4 = por %p8363_p3, %p8362_p2 }
  0xea   :  { %p8365_p5 = pnand %p8364_p4, %p8358_p1 }
  0xec   :  { %8368 = shalt.err (!%p8365_p5)
}
  0xed   :  { %s8476_s10 = smov 64   ;;  %s8477_s30 = smov 4  }
  0xee   :  { %167 = dma.hbm_to_vmem [thread:$0]  %s10311_s13, 128, %s162_s28, [#allocation19], %s8476_s10, %s8476_s10, %s8477_s30  }
  0xef   :  { %s8478_s24 = smov [#allocation23]   ;;  %s8479_s25 = smov [#allocation26]  }
  0xf0   :  { %s185_s1 = sshll.u32 %s8478_s24, 4  ;;  %s208_s14 = sshll.u32 %s8479_s25, 4  ;;  %s186_s1 = int_to_ptr.vmem [resolvable:$true] %s185_s1  ;;  %s209_s14 = int_to_ptr.vmem [resolvable:$true] %s208_s14 }
  0xf1   :  { %s8369_s0 = scalar_lea.hbm %s10313_s15, 64 }
  0xf2   :  { %p8370_p6 = scmp.ne.s32.totalorder %s10313_s15, %s8369_s0  ;;  %p8373_p7 = scmp.lt.u32.totalorder %s8369_s0, %s10313_s15 }
  0xf4   :  { %p8375_p8 = pnand %p8373_p7, %p8370_p6 }
  0xf6   :  { %8378 = shalt.err (!%p8375_p8)
}
  0xf7   :  { %s8379_s13 = scalar_lea.vmem %s186_s1, 64  ;;  %p8384_p10 = scmp.lt.s32.totalorder %s186_s1, %s186_s1 }
  0xf8   :  { %p8380_p9 = scmp.ne.s32.totalorder %s186_s1, %s8379_s13  ;;  %p8385_p11 = scmp.lt.s32.totalorder %s8379_s13, %s8379_s13 }
  0xfa   :  { %p8386_p12 = por %p8385_p11, %p8384_p10 }
  0xfc   :  { %p8387_p13 = pnand %p8386_p12, %p8380_p9 }
  0xfe   :  { %8390 = shalt.err (!%p8387_p13)
}
  0xff   :  { %191 = dma.hbm_to_vmem [thread:$0]  %s10313_s15, 64, %s186_s1, [#allocation22], %s10329_s5, %s10329_s5, %s10328_s26  }
 0x100   :  { %s8391_s3 = scalar_lea.hbm %s10315_s17, 32 }
 0x101   :  { %p8392_p0 = scmp.ne.s32.totalorder %s10315_s17, %s8391_s3  ;;  %p8395_p1 = scmp.lt.u32.totalorder %s8391_s3, %s10315_s17 }
 0x103   :  { %p8397_p2 = pnand %p8395_p1, %p8392_p0 }
 0x105   :  { %8400 = shalt.err (!%p8397_p2)
}
 0x106   :  { %s8401_s23 = scalar_lea.vmem %s209_s14, 32  ;;  %p8406_p4 = scmp.lt.s32.totalorder %s209_s14, %s209_s14 }
 0x107   :  { %p8402_p3 = scmp.ne.s32.totalorder %s209_s14, %s8401_s23  ;;  %p8407_p5 = scmp.lt.s32.totalorder %s8401_s23, %s8401_s23 }
 0x109   :  { %p8408_p6 = por %p8407_p5, %p8406_p4 }
 0x10b   :  { %p8409_p7 = pnand %p8408_p6, %p8402_p3 }
 0x10d   :  { %8412 = shalt.err (!%p8409_p7)
}
 0x10e   :  { %211 = dma.hbm_to_vmem [thread:$0]  %s10315_s17, 32, %s209_s14, [#allocation25]  }
 0x10f   :  { %8435 = dma.done.wait [#allocation4], 768  }
 0x110   :  { %8436 = vsyncadd [#allocation4], 4294966528 }
 0x111   :  { %8437 = dma.done.wait [#allocation7], 1056  }
 0x112   :  { %8438 = vsyncadd [#allocation7], 4294966240 }
 0x113   :  { %8439 = dma.done.wait [#allocation10], 24640  }
 0x114   :  { %8440 = vsyncadd [#allocation10], 4294942656 }
 0x115   :  { %8441 = dma.done.wait [#allocation13], 8384  }
 0x116   :  { %8442 = vsyncadd [#allocation13], 4294958912 }
 0x117   :  { %8443 = dma.done.wait [#allocation16], 128  }
 0x118   :  { %8444 = vsyncadd [#allocation16], 4294967168 }
 0x119   :  { %8445 = dma.done.wait [#allocation19], 192  }
 0x11a   :  { %8446 = vsyncadd [#allocation19], 4294967104 }
 0x11b   :  { %8447 = dma.done.wait [#allocation22], 16448  }
 0x11c   :  { %8448 = vsyncadd [#allocation22], 4294950848 }
 0x11d   :  { %8449 = dma.done.wait [#allocation25], 64  }
 0x11e   :  { %8450 = vsyncadd [#allocation25], 4294967232  ;;  %v8480_v0 = vmov 0   ;;  %v7136_v1 = vld [vmem:[#allocation3 + $0x4] ss:$8 sps:$4 sm:$0xff]   ;;  %s10331_s24 = sld [smem:[#allocation37_spill]]  ;;  %v270_v9 = vlaneseq }
 0x11f   :  { %359 = vmatprep.mubr.bf16.mxu0 %v8480_v0  ;;  %v7138_v2 = vld [vmem:[#allocation3] ss:$8 sps:$4 sm:$0xff]   ;;  %327 = vmatprep.subr.bf16.mxu0 %v7136_v1  ;;  %v7139_v3 = vld [vmem:[#allocation3 + $0x14] ss:$8 sps:$4 sm:$0xff]   ;;  %v7141_v4 = vld [vmem:[#allocation3 + $0x10] ss:$8 sps:$4 sm:$0xff]  }
 0x120   :  { %328 = vmatpush1.bf16.msra.mxu0 %v7138_v2  ;;  %v7142_v5 = vld [vmem:[#allocation3 + $0x24] ss:$8 sps:$4 sm:$0xff]   ;;  %v7144_v6 = vld [vmem:[#allocation3 + $0x20] ss:$8 sps:$4 sm:$0xff]   ;;  %vm320_vm0 = vcmask 392192   ;;  %v8806_v10 = vshrl.u32 %v270_v9, 7 }
 0x121   :  { %329 = vmatprep.subr.bf16.mxu0 %v7139_v3  ;;  %v268_v12 = vld [vmem:[#allocation6] sm:$0x3]  ;;  %v380_v17 = vld [vmem:[#allocation8] sm:$0xff]  ;;  %v381_v20 = vld [vmem:[#allocation8 + $0x8] sm:$0xff]  ;;  %vm8482_vm1 = vmmov 0   ;;  %vm1317_vm2 = vcmask 130048  }
 0x122   :  { %v8809_v11 = vsub.s32 0, %v8806_v10  ;;  %v8812_v13 = vsub.s32 1, %v8806_v10  ;;  %v382_v25 = vld [vmem:[#allocation8 + $0x10] sm:$0xff]  ;;  %v383_v27 = vld [vmem:[#allocation8 + $0x18] sm:$0xff]  ;;  %v384_v34 = vld [vmem:[#allocation8 + $0x20] sm:$0xff] }
 0x123   :  { %v385_v37 = vld [vmem:[#allocation8 + $0x28] sm:$0xff]  ;;  %v7152_v50 = vld [vmem:[#allocation11] ss:$24 sps:$4 sm:$0xff]   ;;  %v7153_v51 = vld [vmem:[#allocation11 + $0x34] ss:$24 sps:$4 sm:$0xff]  }
 0x124   :  { %330 = vmatpush1.bf16.msra.mxu0 %v7141_v4  ;;  %v7145_v7 = vld [vmem:[%s10331_s24] sm:$0xff]   ;;  %v7146_v8 = vld [vmem:[%s10331_s24 + $0x8] sm:$0xff]   ;;  %v273_v14 = vrot.slane %v268_v12, %v8809_v11  ;;  %v277_v15 = vrot.slane %v268_v12, %v8812_v13  ;;  %v7147_v47 = vld [vmem:[#allocation11 + $0x4] ss:$24 sps:$4 sm:$0xff]  }
 0x125   :  { %331 = vmatprep.subr.bf16.mxu0 %v7142_v5  ;;  %v7149_v48 = vld [vmem:[#allocation11 + $0x8] ss:$24 sps:$4 sm:$0xff]   ;;  %v7151_v49 = vld [vmem:[#allocation11 + $0xc] ss:$24 sps:$4 sm:$0xff]   ;;  %1113 = vmatprep.subr.bf16.mxu1 %v7147_v47  ;;  %v7157_v52 = vld [vmem:[#allocation11 + $0x3c] ss:$24 sps:$4 sm:$0xff]  }
 0x126   :  { %1114 = vmatpush1.bf16.msra.mxu1 %v7152_v50  ;;  %v7155_v53 = vld [vmem:[#allocation11 + $0x38] ss:$24 sps:$4 sm:$0xff]   ;;  %v7159_v55 = vld [vmem:[#allocation11 + $0x64] ss:$24 sps:$4 sm:$0xff]   ;;  %v7161_v57 = vld [vmem:[#allocation11 + $0x68] ss:$24 sps:$4 sm:$0xff]  }
 0x127   :  { %v7158_v54 = vld [vmem:[#allocation11 + $0x30] ss:$24 sps:$4 sm:$0xff]   ;;  %1115 = vmatprep.subr.bf16.mxu1 %v7153_v51  ;;  %v7163_v56 = vld [vmem:[#allocation11 + $0x6c] ss:$24 sps:$4 sm:$0xff]   ;;  %v7164_v58 = vld [vmem:[#allocation11 + $0x60] ss:$24 sps:$4 sm:$0xff]  }
 0x128   :  { %332 = vmatpush1.bf16.msra.mxu0 %v7144_v6  ;;  %v7165_v59 = vld [vmem:[#allocation11 + $0x94] ss:$24 sps:$4 sm:$0xff]   ;;  %v7167_v61 = vld [vmem:[#allocation11 + $0x98] ss:$24 sps:$4 sm:$0xff]   ;;  %v7171_v63 = vld [vmem:[#allocation11 + $0xc4] ss:$24 sps:$4 sm:$0xff]  }
 0x129   :  { %1166 = vmatprep.subr.bf16.mxu0 %v7151_v49  ;;  %v7169_v60 = vld [vmem:[#allocation11 + $0x9c] ss:$24 sps:$4 sm:$0xff]   ;;  %v7170_v62 = vld [vmem:[#allocation11 + $0x90] ss:$24 sps:$4 sm:$0xff]   ;;  %v7176_v2 = vld [vmem:[#allocation11 + $0xc0] ss:$24 sps:$4 sm:$0xff]  }
 0x12a   :  { %1116 = vmatpush1.bf16.msra.mxu1 %v7158_v54  ;;  %v7173_v1 = vld [vmem:[#allocation11 + $0xc8] ss:$24 sps:$4 sm:$0xff]   ;;  %v7177_v3 = vld [vmem:[#allocation11 + $0xf4] ss:$24 sps:$4 sm:$0xff]   ;;  %v7179_v5 = vld [vmem:[#allocation11 + $0xf8] ss:$24 sps:$4 sm:$0xff]  }
 0x12b   :  { %6374 = vmatmul.mubr.msk.bf16.vlgmr.msra.gmra.mrb[0].mxu0 %vm320_vm0, %v7145_v7  ;;  %1117 = vmatprep.subr.bf16.mxu1 %v7159_v55  ;;  %v7181_v4 = vld [vmem:[#allocation11 + $0xfc] ss:$24 sps:$4 sm:$0xff]   ;;  %v7182_v6 = vld [vmem:[#allocation11 + $0xf0] ss:$24 sps:$4 sm:$0xff]   ;;  %v7188_v12 = vld [vmem:[#allocation11 + $0x120] ss:$24 sps:$4 sm:$0xff]  }
 0x12c   :  { %369 = vmatprep.mubr.bf16.mxu0 %v8480_v0  ;;  %1167 = vmatpush1.bf16.msra.mxu0 %v7149_v48  ;;  %v7175_v0 = vld [vmem:[#allocation11 + $0xcc] ss:$24 sps:$4 sm:$0xff]   ;;  %v7185_v9 = vld [vmem:[#allocation11 + $0x128] ss:$24 sps:$4 sm:$0xff]   ;;  %v7205_v55 = vld [vmem:[#allocation11 + $0x1bc] ss:$24 sps:$4 sm:$0xff]  }
 0x12d   :  { %1168 = vmatprep.subr.bf16.mxu0 %v7157_v52  ;;  %v7183_v7 = vld [vmem:[#allocation11 + $0x124] ss:$24 sps:$4 sm:$0xff]   ;;  %v7201_v54 = vld [vmem:[#allocation11 + $0x1b4] ss:$24 sps:$4 sm:$0xff]  }
 0x12e   :  { %1118 = vmatpush1.bf16.msra.mxu1 %v7164_v58  ;;  %v7207_v58 = vld [vmem:[#allocation11 + $0x1e4] ss:$24 sps:$4 sm:$0xff]  }
 0x12f   :  { %1119 = vmatprep.subr.bf16.mxu1 %v7165_v59  ;;  %v7211_v59 = vld [vmem:[#allocation11 + $0x1ec] ss:$24 sps:$4 sm:$0xff]  }
 0x130   :  { %1169 = vmatpush1.bf16.msra.mxu0 %v7155_v53 }
 0x131   :  { %1170 = vmatprep.subr.bf16.mxu0 %v7163_v56  ;;  %v7203_v56 = vld [vmem:[#allocation11 + $0x1b8] ss:$24 sps:$4 sm:$0xff]  }
 0x132   :  { %1120 = vmatpush1.bf16.msra.mxu1 %v7170_v62  ;;  %v7213_v62 = vld [vmem:[#allocation11 + $0x214] ss:$24 sps:$4 sm:$0xff]  }
 0x133   :  { %6375 = vmatmul.mubr.msk.bf16.gmra.mrb[4].mxu0 %vm320_vm0, %v7146_v8  ;;  %1121 = vmatprep.subr.bf16.mxu1 %v7171_v63  ;;  %v7187_v8 = vld [vmem:[#allocation11 + $0x12c] ss:$24 sps:$4 sm:$0xff]   ;;  %v7217_v63 = vld [vmem:[#allocation11 + $0x21c] ss:$24 sps:$4 sm:$0xff]  }
 0x134   :  { %1171 = vmatpush1.bf16.msra.mxu0 %v7161_v57  ;;  %v7206_v57 = vld [vmem:[#allocation11 + $0x1b0] ss:$24 sps:$4 sm:$0xff]  }
 0x135   :  { %1172 = vmatprep.subr.bf16.mxu0 %v7169_v60  ;;  %v7209_v60 = vld [vmem:[#allocation11 + $0x1e8] ss:$24 sps:$4 sm:$0xff]  }
 0x136   :  { %1122 = vmatpush1.bf16.msra.mxu1 %v7176_v2  ;;  %v7219_v2 = vld [vmem:[#allocation11 + $0x244] ss:$24 sps:$4 sm:$0xff]  }
 0x137   :  { %1123 = vmatprep.subr.bf16.mxu1 %v7177_v3  ;;  %v7223_v3 = vld [vmem:[#allocation11 + $0x24c] ss:$24 sps:$4 sm:$0xff]  }
 0x138   :  { %1173 = vmatpush1.bf16.msra.mxu0 %v7167_v61  ;;  %v7212_v61 = vld [vmem:[#allocation11 + $0x1e0] ss:$24 sps:$4 sm:$0xff]  }
 0x139   :  { %1174 = vmatprep.subr.bf16.mxu0 %v7175_v0  ;;  %v7215_v0 = vld [vmem:[#allocation11 + $0x218] ss:$24 sps:$4 sm:$0xff]  }
 0x13a   :  { %1124 = vmatpush1.bf16.msra.mxu1 %v7182_v6  ;;  %v7225_v6 = vld [vmem:[#allocation11 + $0x274] ss:$24 sps:$4 sm:$0xff]  }
 0x13b   :  { %1125 = vmatprep.subr.bf16.mxu1 %v7183_v7  ;;  %v7229_v7 = vld [vmem:[#allocation11 + $0x27c] ss:$24 sps:$4 sm:$0xff]  }
 0x13c   :  { %1175 = vmatpush1.bf16.msra.mxu0 %v7173_v1  ;;  %v7218_v1 = vld [vmem:[#allocation11 + $0x210] ss:$24 sps:$4 sm:$0xff]  }
 0x13d   :  { %1176 = vmatprep.subr.bf16.mxu0 %v7181_v4  ;;  %v7221_v4 = vld [vmem:[#allocation11 + $0x248] ss:$24 sps:$4 sm:$0xff]  }
 0x13e   :  { %1126 = vmatpush1.bf16.msra.mxu1 %v7188_v12  ;;  %v7231_v12 = vld [vmem:[#allocation11 + $0x2a4] ss:$24 sps:$4 sm:$0xff]  }
 0x140   :  { %1177 = vmatpush1.bf16.msra.mxu0 %v7179_v5  ;;  %v7224_v5 = vld [vmem:[#allocation11 + $0x240] ss:$24 sps:$4 sm:$0xff]  }
 0x141   :  { %1178 = vmatprep.subr.bf16.mxu0 %v7187_v8  ;;  %v7227_v8 = vld [vmem:[#allocation11 + $0x278] ss:$24 sps:$4 sm:$0xff]  }
 0x144   :  { %1179 = vmatpush1.bf16.msra.mxu0 %v7185_v9  ;;  %v7230_v9 = vld [vmem:[#allocation11 + $0x270] ss:$24 sps:$4 sm:$0xff]  }
 0x1fe   :  { %v361_v16 = vpop.f32.mrb[0].mxu0 }
 0x1ff   :  { %v362_v18 = vadd.f32 %v361_v16, %v273_v14  ;;  %v363_v19 = vpop.f32.mrb[1].mxu0  ;;  %v7191_v16 = vld [vmem:[#allocation11 + $0x158] ss:$24 sps:$4 sm:$0xff]  }
 0x200   :  { %v364_v21 = vadd.f32 %v363_v19, %v277_v15  ;;  %v365_v22 = vpop.f32.mrb[2].mxu0  ;;  %v7199_v19 = vld [vmem:[#allocation11 + $0x18c] ss:$24 sps:$4 sm:$0xff]  }
 0x201   :  { %v8816_v23 = vadd.f32 %v380_v17, %v362_v18  ;;  %v366_v24 = vadd.f32 %v365_v22, %v273_v14  ;;  %v367_v26 = vpop.f32.mrb[3].mxu0  ;;  %v7194_v17 = vld [vmem:[#allocation11 + $0x150] ss:$24 sps:$4 sm:$0xff]   ;;  %v7195_v18 = vld [vmem:[#allocation11 + $0x184] ss:$24 sps:$4 sm:$0xff]  }
 0x202   :  { %v8818_v28 = vadd.f32 %v381_v20, %v364_v21  ;;  %v368_v29 = vadd.f32 %v367_v26, %v277_v15  ;;  %v7197_v20 = vld [vmem:[#allocation11 + $0x188] ss:$24 sps:$4 sm:$0xff]  }
 0x203   :  { %v8820_v30 = vadd.f32 %v382_v25, %v366_v24  ;;  %v7200_v21 = vld [vmem:[#allocation11 + $0x180] ss:$24 sps:$4 sm:$0xff]  }
 0x204   :  { %v8822_v31 = vadd.f32 %v383_v27, %v368_v29  ;;  %v398_v32 = vadd.f32 %v8818_v28, %v8816_v23 }
 0x206   :  { %v371_v33 = vpop.f32.mrb[4].mxu0  ;;  %399 = vadd.xlane.f32.xlu0 %v398_v32  ;;  %v401_v39 = vadd.f32 %v8822_v31, %v8820_v30  ;;  %v386_v32 = vld [vmem:[#allocation8 + $0x30] sm:$0xff] }
 0x207   :  { %v372_v35 = vadd.f32 %v371_v33, %v273_v14  ;;  %v373_v36 = vpop.f32.mrb[5].mxu0 }
 0x208   :  { %v374_v38 = vadd.f32 %v373_v36, %v277_v15  ;;  %v375_v43 = vpop.f32.mrb[6].mxu0 }
 0x209   :  { %v8828_v40 = vadd.f32 %v384_v34, %v372_v35  ;;  %v377_v44 = vpop.f32.mrb[7].mxu0  ;;  %v8834_v45 = vadd.f32 %v375_v43, %v273_v14  ;;  %v7189_v14 = vld [vmem:[#allocation11 + $0x154] ss:$24 sps:$4 sm:$0xff]  }
 0x20a   :  { %v8830_v41 = vadd.f32 %v385_v37, %v374_v38  ;;  %402 = vadd.xlane.f32.xlu0 %v401_v39  ;;  %v8836_v46 = vadd.f32 %v377_v44, %v277_v15  ;;  %v7193_v15 = vld [vmem:[#allocation11 + $0x15c] ss:$24 sps:$4 sm:$0xff]   ;;  %1127 = vmatprep.subr.bf16.mxu1 %v7189_v14  ;;  %v7235_v14 = vld [vmem:[#allocation11 + $0x2ac] ss:$24 sps:$4 sm:$0xff]  }
 0x20b   :  { %1180 = vmatprep.subr.bf16.mxu0 %v7193_v15  ;;  %1128 = vmatpush1.bf16.msra.mxu1 %v7194_v17  ;;  %v387_v35 = vld [vmem:[#allocation8 + $0x38] sm:$0xff]  ;;  %v7233_v15 = vld [vmem:[#allocation11 + $0x2a8] ss:$24 sps:$4 sm:$0xff]  }
 0x20c   :  { %v404_v42 = vadd.f32 %v8830_v41, %v8828_v40  ;;  %1181 = vmatpush1.bf16.msra.mxu0 %v7191_v16  ;;  %1129 = vmatprep.subr.bf16.mxu1 %v7195_v18  ;;  %v8858_v44 = vadd.f32 %v387_v35, %v8836_v46  ;;  %v7236_v16 = vld [vmem:[#allocation11 + $0x2a0] ss:$24 sps:$4 sm:$0xff]   ;;  %v7237_v17 = vld [vmem:[#allocation11 + $0x2d4] ss:$24 sps:$4 sm:$0xff]  }
 0x20d   :  { %1182 = vmatprep.subr.bf16.mxu0 %v7199_v19  ;;  %v7241_v18 = vld [vmem:[#allocation11 + $0x2dc] ss:$24 sps:$4 sm:$0xff]   ;;  %v7239_v19 = vld [vmem:[#allocation11 + $0x2d8] ss:$24 sps:$4 sm:$0xff]  }
 0x20e   :  { %405 = vadd.xlane.f32.xlu0 %v404_v42  ;;  %v8855_v42 = vadd.f32 %v386_v32, %v8834_v45 }
 0x20f   :  { %1130 = vmatpush1.bf16.msra.mxu1 %v7200_v21  ;;  %v7245_v21 = vld [vmem:[#allocation11 + $0x14] ss:$24 sps:$4 sm:$0xff]  }
 0x210   :  { %1183 = vmatpush1.bf16.msra.mxu0 %v7197_v20  ;;  %v407_v45 = vadd.f32 %v8858_v44, %v8855_v42  ;;  %1131 = vmatprep.subr.bf16.mxu1 %v7201_v54  ;;  %v7242_v20 = vld [vmem:[#allocation11 + $0x2d0] ss:$24 sps:$4 sm:$0xff]  }
 0x211   :  { %1184 = vmatprep.subr.bf16.mxu0 %v7205_v55 }
 0x213   :  { %1132 = vmatpush1.bf16.msra.mxu1 %v7206_v57 }
 0x214   :  { %1185 = vmatpush1.bf16.msra.mxu0 %v7203_v56  ;;  %1133 = vmatprep.subr.bf16.mxu1 %v7207_v58 }
 0x215   :  { %1186 = vmatprep.subr.bf16.mxu0 %v7211_v59 }
 0x217   :  { %1134 = vmatpush1.bf16.msra.mxu1 %v7212_v61 }
 0x218   :  { %1187 = vmatpush1.bf16.msra.mxu0 %v7209_v60  ;;  %1135 = vmatprep.subr.bf16.mxu1 %v7213_v62 }
 0x219   :  { %1188 = vmatprep.subr.bf16.mxu0 %v7217_v63 }
 0x21b   :  { %1136 = vmatpush1.bf16.msra.mxu1 %v7218_v1 }
 0x21c   :  { %1189 = vmatpush1.bf16.msra.mxu0 %v7215_v0  ;;  %1137 = vmatprep.subr.bf16.mxu1 %v7219_v2 }
 0x21d   :  { %1190 = vmatprep.subr.bf16.mxu0 %v7223_v3 }
 0x21f   :  { %1138 = vmatpush1.bf16.msra.mxu1 %v7224_v5  ;;  %v7246_v5 = vld [vmem:[#allocation11 + $0x40] ss:$24 sps:$4 sm:$0xff]  }
 0x220   :  { %1191 = vmatpush1.bf16.msra.mxu0 %v7221_v4  ;;  %1139 = vmatprep.subr.bf16.mxu1 %v7225_v6  ;;  %v7243_v4 = vld [vmem:[#allocation11 + $0x10] ss:$24 sps:$4 sm:$0xff]   ;;  %v7251_v6 = vld [vmem:[#allocation11 + $0x74] ss:$24 sps:$4 sm:$0xff]  }
 0x221   :  { %1192 = vmatprep.subr.bf16.mxu0 %v7229_v7  ;;  %v7249_v7 = vld [vmem:[#allocation11 + $0x70] ss:$24 sps:$4 sm:$0xff]  }
 0x223   :  { %1140 = vmatpush1.bf16.msra.mxu1 %v7230_v9  ;;  %v7252_v9 = vld [vmem:[#allocation11 + $0xa0] ss:$24 sps:$4 sm:$0xff]  }
 0x224   :  { %1193 = vmatpush1.bf16.msra.mxu0 %v7227_v8  ;;  %1141 = vmatprep.subr.bf16.mxu1 %v7231_v12  ;;  %v7254_v8 = vld [vmem:[#allocation11 + $0xa4] ss:$24 sps:$4 sm:$0xff]   ;;  %v7257_v12 = vld [vmem:[#allocation11 + $0xd4] ss:$24 sps:$4 sm:$0xff]  }
 0x225   :  { %1194 = vmatprep.subr.bf16.mxu0 %v7235_v14  ;;  %v7255_v14 = vld [vmem:[#allocation11 + $0xd0] ss:$24 sps:$4 sm:$0xff]  }
 0x227   :  { %1142 = vmatpush1.bf16.msra.mxu1 %v7236_v16  ;;  %v7258_v16 = vld [vmem:[#allocation11 + $0x100] ss:$24 sps:$4 sm:$0xff]  }
 0x228   :  { %1195 = vmatpush1.bf16.msra.mxu0 %v7233_v15  ;;  %1143 = vmatprep.subr.bf16.mxu1 %v7237_v17  ;;  %v7260_v15 = vld [vmem:[#allocation11 + $0x104] ss:$24 sps:$4 sm:$0xff]   ;;  %v7263_v17 = vld [vmem:[#allocation11 + $0x134] ss:$24 sps:$4 sm:$0xff]  }
 0x229   :  { %1196 = vmatprep.subr.bf16.mxu0 %v7241_v18  ;;  %v7261_v18 = vld [vmem:[#allocation11 + $0x130] ss:$24 sps:$4 sm:$0xff]  }
 0x22b   :  { %1144 = vmatpush1.bf16.msra.mxu1 %v7242_v20  ;;  %v7264_v20 = vld [vmem:[#allocation11 + $0x160] ss:$24 sps:$4 sm:$0xff]  }
 0x22c   :  { %1197 = vmatpush1.bf16.msra.mxu0 %v7239_v19  ;;  %1219 = vmatprep.subr.bf16.mxu1 %v7245_v21  ;;  %v7266_v19 = vld [vmem:[#allocation11 + $0x164] ss:$24 sps:$4 sm:$0xff]   ;;  %v7269_v21 = vld [vmem:[#allocation11 + $0x194] ss:$24 sps:$4 sm:$0xff]  }
 0x293   :  { %v400_v22 = vpop.xlane.xlu0 %399 }
 0x294   :  { %v411_v24 = vmul.f32 0.00390625, %v400_v22 }
 0x296   :  { %v8839_v25 = vsub.f32 %v8816_v23, %v411_v24  ;;  %v8842_v26 = vsub.f32 %v8818_v28, %v411_v24 }
 0x297   :  { %v403_v27 = vpop.xlane.xlu0 %402 }
 0x298   :  { %v412_v29 = vmul.f32 0.00390625, %v403_v27  ;;  %v423_v33 = vmul.f32 %v8839_v25, %v8839_v25  ;;  %v424_v34 = vmul.f32 %v8842_v26, %v8842_v26 }
 0x29a   :  { %v8849_v36 = vsub.f32 %v8820_v30, %v412_v29  ;;  %v8852_v37 = vsub.f32 %v8822_v31, %v412_v29  ;;  %v431_v38 = vadd.f32 %v424_v34, %v423_v33 }
 0x29b   :  { %v406_v39 = vpop.xlane.xlu0 %405 }
 0x29c   :  { %v413_v43 = vmul.f32 0.00390625, %v406_v39  ;;  %432 = vadd.xlane.f32.xlu1 %v431_v38  ;;  %v425_v47 = vmul.f32 %v8849_v36, %v8849_v36  ;;  %v426_v48 = vmul.f32 %v8852_v37, %v8852_v37 }
 0x29e   :  { %v8865_v49 = vsub.f32 %v8828_v40, %v413_v43  ;;  %v8868_v50 = vsub.f32 %v8830_v41, %v413_v43  ;;  %v434_v51 = vadd.f32 %v426_v48, %v425_v47  ;;  %v396_v48 = vld [vmem:[%s10302_s4] sm:$0x3] }
 0x29f   :  { %v8895_v55 = vrot.slane %v396_v48, %v8809_v11 }
 0x2a0   :  { %435 = vadd.xlane.f32.xlu1 %v434_v51  ;;  %v427_v46 = vmul.f32 %v8865_v49, %v8865_v49  ;;  %v428_v52 = vmul.f32 %v8868_v50, %v8868_v50 }
 0x2a2   :  { %v437_v53 = vadd.f32 %v428_v52, %v427_v46  ;;  %v397_v46 = vld [vmem:[#allocation9] sm:$0x3] }
 0x2a3   :  { %v8898_v57 = vrot.slane %v397_v46, %v8812_v13  ;;  %v8901_v58 = vrot.slane %v397_v46, %v8809_v11  ;;  %v7290_v46 = vld [vmem:[#allocation11 + $0x2e4] ss:$24 sps:$4 sm:$0xff]  }
 0x2a4   :  { %408 = vadd.xlane.f32.xlu1 %v407_v45  ;;  %438 = vadd.xlane.f32.xlu0 %v437_v53  ;;  %v8891_v53 = vrot.slane %v396_v48, %v8812_v13  ;;  %v7282_v48 = vld [vmem:[#allocation11 + $0x280] ss:$24 sps:$4 sm:$0xff]  }
 0x329   :  { %v433_v22 = vpop.xlane.xlu1 %432 }
 0x32a   :  { %v443_v24 = vmul.f32 0.00390625, %v433_v22  ;;  %v7267_v22 = vld [vmem:[#allocation11 + $0x190] ss:$24 sps:$4 sm:$0xff]  }
 0x32c   :  { %v447_v27 = vadd.f32 1e-06, %v443_v24  ;;  %v7272_v24 = vld [vmem:[#allocation11 + $0x1c4] ss:$24 sps:$4 sm:$0xff]  }
 0x32d   :  { %v436_v29 = vpop.xlane.xlu1 %435 }
 0x32e   :  { %7915 = vrsqrt.f32 %v447_v27  ;;  %v444_v32 = vmul.f32 0.00390625, %v436_v29  ;;  %v7270_v27 = vld [vmem:[#allocation11 + $0x1c0] ss:$24 sps:$4 sm:$0xff]   ;;  %v7275_v29 = vld [vmem:[#allocation11 + $0x1f4] ss:$24 sps:$4 sm:$0xff]  }
 0x330   :  { %v448_v33 = vadd.f32 1e-06, %v444_v32  ;;  %v7273_v32 = vld [vmem:[#allocation11 + $0x1f0] ss:$24 sps:$4 sm:$0xff]  }
 0x331   :  { %v409_v34 = vpop.xlane.xlu1 %408 }
 0x332   :  { %7917 = vrsqrt.f32 %v448_v33  ;;  %v414_v35 = vmul.f32 0.00390625, %v409_v34  ;;  %v7278_v33 = vld [vmem:[#allocation11 + $0x224] ss:$24 sps:$4 sm:$0xff]   ;;  %v7276_v34 = vld [vmem:[#allocation11 + $0x220] ss:$24 sps:$4 sm:$0xff]  }
 0x334   :  { %v8877_v38 = vsub.f32 %v8855_v42, %v414_v35  ;;  %v8880_v39 = vsub.f32 %v8858_v44, %v414_v35  ;;  %v7281_v35 = vld [vmem:[#allocation11 + $0x254] ss:$24 sps:$4 sm:$0xff]  }
 0x336   :  { %v429_v43 = vmul.f32 %v8877_v38, %v8877_v38  ;;  %v430_v47 = vmul.f32 %v8880_v39, %v8880_v39 }
 0x338   :  { %v7916_v51 = vpop.eup %7915  ;;  %v440_v45 = vadd.f32 %v430_v47, %v429_v43  ;;  %v7279_v43 = vld [vmem:[#allocation11 + $0x250] ss:$24 sps:$4 sm:$0xff]   ;;  %v7284_v47 = vld [vmem:[#allocation11 + $0x284] ss:$24 sps:$4 sm:$0xff]  }
 0x339   :  { %v456_v52 = vmul.f32 %v7916_v51, %v8842_v26  ;;  %v455_v54 = vmul.f32 %v7916_v51, %v8839_v25  ;;  %v7287_v51 = vld [vmem:[#allocation11 + $0x2b4] ss:$24 sps:$4 sm:$0xff]  }
 0x33a   :  { %441 = vadd.xlane.f32.xlu1 %v440_v45  ;;  %v7285_v45 = vld [vmem:[#allocation11 + $0x2b0] ss:$24 sps:$4 sm:$0xff]  }
 0x33b   :  { %v475_v26 = vmul.f32 %v8891_v53, %v456_v52  ;;  %v474_v61 = vmul.f32 %v8895_v55, %v455_v54  ;;  %v7288_v52 = vld [vmem:[#allocation11 + $0x2e0] ss:$24 sps:$4 sm:$0xff]   ;;  %v8481_v54 = vmov 0.0  }
 0x33c   :  { %v7918_v56 = vpop.eup %7917  ;;  %6993 = vmatprep.subr.bf16.mxu0 %v8481_v54 }
 0x33d   :  { %v458_v59 = vmul.f32 %v7918_v56, %v8852_v37  ;;  %v457_v60 = vmul.f32 %v7918_v56, %v8849_v36  ;;  %v494_v63 = vadd.f32 %v8898_v57, %v475_v26  ;;  %v493_v1 = vadd.f32 %v8901_v58, %v474_v61  ;;  %v7248_v36 = vld [vmem:[#allocation11 + $0x44] ss:$24 sps:$4 sm:$0xff]   ;;  %v439_v56 = vpop.xlane.xlu0 %438 }
 0x33f   :  { %v477_v25 = vmul.f32 %v8891_v53, %v458_v59  ;;  %v476_v62 = vmul.f32 %v8895_v55, %v457_v60  ;;  %v445_v59 = vmul.f32 0.00390625, %v439_v56 }
 0x341   :  { %v496_v0 = vadd.f32 %v8898_v57, %v477_v25  ;;  %v495_v2 = vadd.f32 %v8901_v58, %v476_v62  ;;  %v449_v26 = vadd.f32 1e-06, %v445_v59 }
 0x343   :  { %v8913_v3 = vpack.c.bf16 %v496_v0, %v494_v63  ;;  %v8915_v37 = vpack.c.bf16 %v495_v2, %v493_v1  ;;  %7919 = vrsqrt.f32 %v449_v26 }
 0x345   :  { %1145 = vmatprep.mubr.bf16.mxu1 %v8913_v3  ;;  %1198 = vmatprep.mubr.bf16.mxu0 %v8913_v3 }
 0x346   :  { %1146 = vmatmul.mubr.bf16.vlgmr.msra.gmra.mrb[0].mxu1 %v8915_v37  ;;  %1199 = vmatmul.mubr.bf16.vlgmr.msra.gmra.mrb[8].mxu0 %v8915_v37 }
 0x347   :  { %1220 = vmatpush1.bf16.msra.mxu1 %v7243_v4 }
 0x348   :  { %1221 = vmatprep.subr.bf16.mxu1 %v7248_v36 }
 0x34b   :  { %1222 = vmatpush1.bf16.msra.mxu1 %v7246_v5 }
 0x34c   :  { %1223 = vmatprep.subr.bf16.mxu1 %v7251_v6 }
 0x34d   :  { %v7920_v62 = vpop.eup %7919 }
 0x34e   :  { %v460_v63 = vmul.f32 %v7920_v62, %v8868_v50  ;;  %v459_v0 = vmul.f32 %v7920_v62, %v8865_v49 }
 0x34f   :  { %1224 = vmatpush1.bf16.msra.mxu1 %v7249_v7 }
 0x350   :  { %1225 = vmatprep.subr.bf16.mxu1 %v7254_v8  ;;  %v479_v4 = vmul.f32 %v8891_v53, %v460_v63  ;;  %v478_v5 = vmul.f32 %v8895_v55, %v459_v0 }
 0x352   :  { %v498_v8 = vadd.f32 %v8898_v57, %v479_v4  ;;  %v497_v50 = vadd.f32 %v8901_v58, %v478_v5 }
 0x353   :  { %1226 = vmatpush1.bf16.msra.mxu1 %v7252_v9 }
 0x354   :  { %1227 = vmatprep.subr.bf16.mxu1 %v7257_v12 }
 0x357   :  { %1228 = vmatpush1.bf16.msra.mxu1 %v7255_v14 }
 0x358   :  { %1229 = vmatprep.subr.bf16.mxu1 %v7260_v15 }
 0x35b   :  { %1230 = vmatpush1.bf16.msra.mxu1 %v7258_v16 }
 0x35c   :  { %1231 = vmatprep.subr.bf16.mxu1 %v7263_v17 }
 0x35f   :  { %1232 = vmatpush1.bf16.msra.mxu1 %v7261_v18 }
 0x360   :  { %1233 = vmatprep.subr.bf16.mxu1 %v7266_v19 }
 0x363   :  { %1234 = vmatpush1.bf16.msra.mxu1 %v7264_v20 }
 0x364   :  { %1235 = vmatprep.subr.bf16.mxu1 %v7269_v21 }
 0x367   :  { %1236 = vmatpush1.bf16.msra.mxu1 %v7267_v22 }
 0x368   :  { %1237 = vmatprep.subr.bf16.mxu1 %v7272_v24 }
 0x36b   :  { %1238 = vmatpush1.bf16.msra.mxu1 %v7270_v27 }
 0x36c   :  { %1239 = vmatprep.subr.bf16.mxu1 %v7275_v29 }
 0x36f   :  { %1240 = vmatpush1.bf16.msra.mxu1 %v7273_v32 }
 0x370   :  { %1241 = vmatprep.subr.bf16.mxu1 %v7278_v33 }
 0x373   :  { %1242 = vmatpush1.bf16.msra.mxu1 %v7276_v34 }
 0x374   :  { %1243 = vmatprep.subr.bf16.mxu1 %v7281_v35 }
 0x377   :  { %1244 = vmatpush1.bf16.msra.mxu1 %v7279_v43 }
 0x378   :  { %1245 = vmatprep.subr.bf16.mxu1 %v7284_v47 }
 0x37b   :  { %1246 = vmatpush1.bf16.msra.mxu1 %v7282_v48 }
 0x37c   :  { %1247 = vmatprep.subr.bf16.mxu1 %v7287_v51 }
 0x37f   :  { %1248 = vmatpush1.bf16.msra.mxu1 %v7285_v45 }
 0x380   :  { %1249 = vmatprep.subr.bf16.mxu1 %v7290_v46 }
 0x383   :  { %1250 = vmatpush1.bf16.msra.mxu1 %v7288_v52 }
 0x3c7   :  { %v442_v60 = vpop.xlane.xlu1 %441 }
 0x3c8   :  { %v446_v61 = vmul.f32 0.00390625, %v442_v60  ;;  %v621_v60 = vsub.s32 4, %v8806_v10 }
 0x3ca   :  { %v450_v25 = vadd.f32 1e-06, %v446_v61  ;;  %v625_v61 = vsub.s32 5, %v8806_v10 }
 0x3cc   :  { %7921 = vrsqrt.f32 %v450_v25 }
 0x3d6   :  { %v7922_v1 = vpop.eup %7921 }
 0x3d7   :  { %v462_v2 = vmul.f32 %v7922_v1, %v8880_v39  ;;  %v461_v36 = vmul.f32 %v7922_v1, %v8877_v38  ;;  %v8939_v38 = vsub.s32 2, %v8806_v10 }
 0x3d9   :  { %v481_v6 = vmul.f32 %v8891_v53, %v462_v2  ;;  %v480_v7 = vmul.f32 %v8895_v55, %v461_v36  ;;  %v601_v53 = vld [vmem:[#allocation12] sm:$0x3f]  ;;  %v8942_v55 = vsub.s32 3, %v8806_v10 }
 0x3da   :  { %v610_v15 = vrot.slane %v601_v53, %v8812_v13 }
 0x3db   :  { %v500_v9 = vadd.f32 %v8898_v57, %v481_v6  ;;  %v499_v49 = vadd.f32 %v8901_v58, %v480_v7  ;;  %v606_v57 = vrot.slane %v601_v53, %v8809_v11  ;;  %v614_v58 = vrot.slane %v601_v53, %v8939_v38 }
 0x3dc   :  { %v618_v16 = vrot.slane %v601_v53, %v8942_v55 }
 0x3dd   :  { %v600_v12 = vpack.c.bf16 %v500_v9, %v498_v8  ;;  %v599_v39 = vpack.c.bf16 %v499_v49, %v497_v50  ;;  %v622_v49 = vrot.slane %v601_v53, %v621_v60 }
 0x3df   :  { %1155 = vmatprep.mubr.bf16.mxu1 %v600_v12  ;;  %1208 = vmatprep.mubr.bf16.mxu0 %v600_v12 }
 0x3e0   :  { %1156 = vmatmul.mubr.bf16.gmra.mrb[4].mxu1 %v599_v39  ;;  %1209 = vmatmul.mubr.bf16.gmra.mrb[12].mxu0 %v599_v39 }
 0x3e1   :  { %1251 = vmatprep.mubr.bf16.mxu1 %v8913_v3  ;;  %6995 = vmatprep.mubr.msk.bf16.mxu0 %vm8482_vm1, %v8481_v54 }
 0x3e8   :  { %1252 = vmatmul.mubr.bf16.vlgmr.msra.gmra.mrb[8].mxu1 %v8915_v37 }
 0x3e9   :  { %1261 = vmatprep.mubr.bf16.mxu1 %v600_v12 }
 0x3f0   :  { %1262 = vmatmul.mubr.bf16.gmra.mrb[12].mxu1 %v599_v39  ;;  %v626_v39 = vrot.slane %v601_v53, %v625_v61 }
 0x419   :  { %v1147_v3 = vpop.f32.mrb[0].mxu1  ;;  %v1200_v14 = vpop.f32.mrb[8].mxu0 }
 0x41a   :  { %v1149_v37 = vpop.f32.mrb[1].mxu1  ;;  %v1202_v17 = vpop.f32.mrb[9].mxu0  ;;  %v1148_v20 = vadd.f32 %v1147_v3, %v606_v57  ;;  %v1201_v21 = vadd.f32 %v1200_v14, %v614_v58 }
 0x41b   :  { %v1151_v18 = vpop.f32.mrb[2].mxu1  ;;  %v1204_v19 = vpop.f32.mrb[10].mxu0  ;;  %v8948_v32 = vadd.f32 %v1149_v37, %v610_v15  ;;  %v8950_v33 = vadd.f32 %v1202_v17, %v618_v16 }
 0x41c   :  { %v1152_v22 = vadd.f32 %v1151_v18, %v606_v57  ;;  %v1205_v24 = vadd.f32 %v1204_v19, %v614_v58  ;;  %v1153_v27 = vpop.f32.mrb[3].mxu1  ;;  %v1206_v29 = vpop.f32.mrb[11].mxu0 }
 0x41d   :  { %v8952_v34 = vadd.f32 %v1153_v27, %v610_v15  ;;  %v8954_v35 = vadd.f32 %v1206_v29, %v618_v16 }
 0x41e   :  { %v1272_v43 = vpack.c.bf16 %v1152_v22, %v1148_v20  ;;  %v1273_v47 = vpack.c.bf16 %v1205_v24, %v1201_v21 }
 0x41f   :  { %v1388_v48 = vpack.c.bf16 %v8952_v34, %v8948_v32  ;;  %v1389_v51 = vpack.c.bf16 %v8954_v35, %v8950_v33 }
 0x420   :  { %6994 = vmatpush3.bf16.xpose.msra.mxu0 %v1273_v47 }
 0x421   :  { %6999 = vmatprep.subr.bf16.mxu0 %v8481_v54 }
 0x427   :  { %6996 = vmatmul.mubr.bf16.vlgmr.msra.gmra.mrb[16].mxu0 %v1272_v43 }
 0x428   :  { %7001 = vmatprep.mubr.msk.bf16.mxu0 %vm8482_vm1, %v8481_v54 }
 0x4b3   :  { %v1157_v45 = vpop.f32.mrb[4].mxu1  ;;  %v1210_v46 = vpop.f32.mrb[12].mxu0 }
 0x4b4   :  { %v1159_v52 = vpop.f32.mrb[5].mxu1  ;;  %v1212_v56 = vpop.f32.mrb[13].mxu0  ;;  %v8965_v25 = vadd.f32 %v1157_v45, %v606_v57  ;;  %v8967_v62 = vadd.f32 %v1210_v46, %v614_v58 }
 0x4b5   :  { %v1161_v59 = vpop.f32.mrb[6].mxu1  ;;  %v1214_v26 = vpop.f32.mrb[14].mxu0  ;;  %v8973_v4 = vadd.f32 %v1159_v52, %v610_v15  ;;  %v8975_v36 = vadd.f32 %v1212_v56, %v618_v16 }
 0x4b6   :  { %v8969_v63 = vadd.f32 %v1161_v59, %v606_v57  ;;  %v8971_v0 = vadd.f32 %v1214_v26, %v614_v58  ;;  %v1163_v1 = vpop.f32.mrb[7].mxu1  ;;  %v1216_v2 = vpop.f32.mrb[15].mxu0 }
 0x4b7   :  { %v8977_v5 = vadd.f32 %v1163_v1, %v610_v15  ;;  %v8979_v6 = vadd.f32 %v1216_v2, %v618_v16 }
 0x4b8   :  { %v1503_v7 = vpack.c.bf16 %v8969_v63, %v8965_v25  ;;  %v1504_v8 = vpack.c.bf16 %v8971_v0, %v8967_v62 }
 0x4b9   :  { %v1618_v9 = vpack.c.bf16 %v8977_v5, %v8973_v4  ;;  %v1619_v50 = vpack.c.bf16 %v8979_v6, %v8975_v36 }
 0x4bb   :  { %v1253_v12 = vpop.f32.mrb[8].mxu1 }
 0x4bc   :  { %v1255_v57 = vpop.f32.mrb[9].mxu1  ;;  %v1254_v3 = vadd.f32 %v1253_v12, %v622_v49 }
 0x4bd   :  { %v1257_v58 = vpop.f32.mrb[10].mxu1  ;;  %v1256_v16 = vadd.f32 %v1255_v57, %v626_v39 }
 0x4be   :  { %v1258_v14 = vadd.f32 %v1257_v58, %v622_v49  ;;  %v1259_v15 = vpop.f32.mrb[11].mxu1 }
 0x4bf   :  { %v1260_v37 = vadd.f32 %v1259_v15, %v626_v39 }
 0x4c0   :  { %v1341_v17 = vpack.c.bf16 %v1258_v14, %v1254_v3 }
 0x4c1   :  { %v1456_v18 = vpack.c.bf16 %v1260_v37, %v1256_v16 }
 0x4c2   :  { %7000 = vmatpush3.bf16.msra.mxu0 %v1341_v17 }
 0x4c3   :  { %v1263_v19 = vpop.f32.mrb[12].mxu1  ;;  %7005 = vmatprep.subr.bf16.mxu0 %v8481_v54 }
 0x4c4   :  { %v8994_v20 = vadd.f32 %v1263_v19, %v622_v49  ;;  %v1265_v21 = vpop.f32.mrb[13].mxu1 }
 0x4c5   :  { %v8996_v22 = vadd.f32 %v1265_v21, %v626_v39  ;;  %v1267_v24 = vpop.f32.mrb[14].mxu1 }
 0x4c6   :  { %v8998_v53 = vadd.f32 %v1267_v24, %v622_v49  ;;  %v1269_v27 = vpop.f32.mrb[15].mxu1 }
 0x4c7   :  { %v9000_v29 = vadd.f32 %v1269_v27, %v626_v39 }
 0x4c8   :  { %v1571_v43 = vpack.c.bf16 %v8998_v53, %v8994_v20 }
 0x4c9   :  { %v1686_v47 = vpack.c.bf16 %v9000_v29, %v8996_v22 }
 0x4fa   :  { %v1308_v45 = vpop.f32.mrb[16].mxu0 }
 0x4fb   :  { %v1315_v46 = vmul.f32 0.088388346, %v1308_v45  ;;  %v6997_v52 = vpop.f32.mrb[17].mxu0 }
 0x4fc   :  { %v1311_v56 = vpop.f32.mrb[18].mxu0 }
 0x4fd   :  { %v1316_v59 = vmul.f32 0.088388346, %v1311_v56  ;;  %v6998_v26 = vpop.f32.mrb[19].mxu0  ;;  %v1318_v1 = vsel %vm1317_vm2, %v1315_v46, -inf }
 0x4fe   :  { %1319 = vmax.xlane.f32.xlu0 %v1318_v1 }
 0x4ff   :  { %v1321_v2 = vsel %vm1317_vm2, %v1316_v59, -inf }
 0x500   :  { %1322 = vmax.xlane.f32.xlu1 %v1321_v2 }
 0x58b   :  { %v1320_v49 = vpop.xlane.xlu0 %1319 }
 0x58c   :  { %v1324_v12 = vsub.f32 %v1315_v46, %v1320_v49 }
 0x58d   :  { %v1323_v39 = vpop.xlane.xlu1 %1322 }
 0x58e   :  { %v1326_v57 = vmul.f32 1.442695, %v1324_v12  ;;  %v1325_v58 = vsub.f32 %v1316_v59, %v1323_v39 }
 0x590   :  { %7923 = vpow2.f32 %v1326_v57  ;;  %v1328_v3 = vmul.f32 1.442695, %v1325_v58 }
 0x592   :  { %7925 = vpow2.f32 %v1328_v3 }
 0x59a   :  { %v7924_v14 = vpop.eup %7923 }
 0x59b   :  { %v1330_v15 = vsel %vm1317_vm2, %v7924_v14, 0.0 }
 0x59c   :  { %v7926_v16 = vpop.eup %7925  ;;  %1331 = vadd.xlane.f32.xlu0 %v1330_v15 }
 0x59d   :  { %v1333_v37 = vsel %vm1317_vm2, %v7926_v16, 0.0 }
 0x59e   :  { %1334 = vadd.xlane.f32.xlu1 %v1333_v37 }
 0x629   :  { %v1332_v17 = vpop.xlane.xlu0 %1331 }
 0x62a   :  { %7927 = vrcp.f32 %v1332_v17 }
 0x62b   :  { %v1335_v19 = vpop.xlane.xlu1 %1334 }
 0x62c   :  { %7929 = vrcp.f32 %v1335_v19 }
 0x634   :  { %v7928_v21 = vpop.eup %7927 }
 0x635   :  { %v1338_v27 = vmul.f32 %v7928_v21, %v7924_v14 }
 0x636   :  { %v7930_v24 = vpop.eup %7929 }
 0x637   :  { %v1339_v45 = vmul.f32 %v7930_v24, %v7926_v16 }
 0x639   :  { %v1340_v46 = vpack.c.bf16 %v1339_v45, %v1338_v27 }
 0x63b   :  { %7002 = vmatmul.mubr.msk.bf16.vlgmr.msra.gmra.mrb[20].mxu0 %vm1317_vm2, %v1340_v46 }
 0x63c   :  { %7006 = vmatpush3.bf16.xpose.msra.mxu0 %v1389_v51  ;;  %7007 = vmatprep.mubr.msk.bf16.mxu0 %vm8482_vm1, %v8481_v54 }
 0x63d   :  { %7011 = vmatprep.subr.bf16.mxu0 %v8481_v54 }
 0x643   :  { %7008 = vmatmul.mubr.bf16.vlgmr.msra.gmra.mrb[24].mxu0 %v1388_v48 }
 0x644   :  { %7012 = vmatpush3.bf16.msra.mxu0 %v1456_v18  ;;  %7013 = vmatprep.mubr.msk.bf16.mxu0 %vm8482_vm1, %v8481_v54 }
 0x645   :  { %7017 = vmatprep.subr.bf16.mxu0 %v8481_v54 }
 0x70e   :  { %v9023_v52 = vpop.f32.mrb[20].mxu0 }
 0x70f   :  { %v7003_v56 = vpop.f32.mrb[21].mxu0 }
 0x710   :  { %v9025_v33 = vpop.f32.mrb[22].mxu0 }
 0x711   :  { %v1773_v35 = vpack.c.bf16 %v9025_v33, %v9023_v52  ;;  %v7004_v51 = vpop.f32.mrb[23].mxu0 }
 0x716   :  { %v1424_v59 = vpop.f32.mrb[24].mxu0 }
 0x717   :  { %v1431_v26 = vmul.f32 0.088388346, %v1424_v59  ;;  %v7009_v1 = vpop.f32.mrb[25].mxu0 }
 0x718   :  { %v1427_v32 = vpop.f32.mrb[26].mxu0 }
 0x719   :  { %v1432_v34 = vmul.f32 0.088388346, %v1427_v32  ;;  %v7010_v48 = vpop.f32.mrb[27].mxu0  ;;  %v1433_v18 = vsel %vm1317_vm2, %v1431_v26, -inf }
 0x71a   :  { %1434 = vmax.xlane.f32.xlu0 %v1433_v18 }
 0x71b   :  { %v1436_v2 = vsel %vm1317_vm2, %v1432_v34, -inf }
 0x71c   :  { %1437 = vmax.xlane.f32.xlu1 %v1436_v2 }
 0x7a7   :  { %v1435_v49 = vpop.xlane.xlu0 %1434 }
 0x7a8   :  { %v1439_v12 = vsub.f32 %v1431_v26, %v1435_v49 }
 0x7a9   :  { %v1438_v39 = vpop.xlane.xlu1 %1437 }
 0x7aa   :  { %v1441_v57 = vmul.f32 1.442695, %v1439_v12  ;;  %v1440_v58 = vsub.f32 %v1432_v34, %v1438_v39 }
 0x7ac   :  { %7931 = vpow2.f32 %v1441_v57  ;;  %v1443_v3 = vmul.f32 1.442695, %v1440_v58 }
 0x7ae   :  { %7933 = vpow2.f32 %v1443_v3 }
 0x7b6   :  { %v7932_v14 = vpop.eup %7931 }
 0x7b7   :  { %v1445_v15 = vsel %vm1317_vm2, %v7932_v14, 0.0 }
 0x7b8   :  { %v7934_v16 = vpop.eup %7933  ;;  %1446 = vadd.xlane.f32.xlu0 %v1445_v15 }
 0x7b9   :  { %v1448_v37 = vsel %vm1317_vm2, %v7934_v16, 0.0 }
 0x7ba   :  { %1449 = vadd.xlane.f32.xlu1 %v1448_v37 }
 0x845   :  { %v1447_v17 = vpop.xlane.xlu0 %1446 }
 0x846   :  { %7935 = vrcp.f32 %v1447_v17 }
 0x847   :  { %v1450_v19 = vpop.xlane.xlu1 %1449 }
 0x848   :  { %7937 = vrcp.f32 %v1450_v19 }
 0x850   :  { %v7936_v21 = vpop.eup %7935 }
 0x851   :  { %v1453_v27 = vmul.f32 %v7936_v21, %v7932_v14 }
 0x852   :  { %v7938_v24 = vpop.eup %7937 }
 0x853   :  { %v1454_v45 = vmul.f32 %v7938_v24, %v7934_v16 }
 0x855   :  { %v1455_v46 = vpack.c.bf16 %v1454_v45, %v1453_v27 }
 0x857   :  { %7014 = vmatmul.mubr.msk.bf16.vlgmr.msra.gmra.mrb[28].mxu0 %vm1317_vm2, %v1455_v46 }
 0x858   :  { %7018 = vmatpush3.bf16.xpose.msra.mxu0 %v1504_v8  ;;  %7019 = vmatprep.mubr.msk.bf16.mxu0 %vm8482_vm1, %v8481_v54 }
 0x859   :  { %7023 = vmatprep.subr.bf16.mxu0 %v8481_v54 }
 0x85f   :  { %7020 = vmatmul.mubr.bf16.vlgmr.msra.gmra.mrb[32].mxu0 %v1503_v7 }
 0x860   :  { %7024 = vmatpush3.bf16.msra.mxu0 %v1571_v43  ;;  %7025 = vmatprep.mubr.msk.bf16.mxu0 %vm8482_vm1, %v8481_v54 }
 0x861   :  { %7029 = vmatprep.subr.bf16.mxu0 %v8481_v54 }
 0x92a   :  { %v9049_v62 = vpop.f32.mrb[28].mxu0 }
 0x92b   :  { %v7015_v0 = vpop.f32.mrb[29].mxu0 }
 0x92c   :  { %v9051_v8 = vpop.f32.mrb[30].mxu0 }
 0x92d   :  { %v1774_v56 = vpack.c.bf16 %v9051_v8, %v9049_v62  ;;  %v7016_v51 = vpop.f32.mrb[31].mxu0  ;;  %v7311_v62 = vld [vmem:[#allocation14 + $0x64] ss:$8 sps:$4 sm:$0xff]   ;;  %v7309_v8 = vld [vmem:[#allocation14 + $0x60] ss:$8 sps:$4 sm:$0xff]  }
 0x932   :  { %v1539_v25 = vpop.f32.mrb[32].mxu0 }
 0x933   :  { %v1546_v63 = vmul.f32 0.088388346, %v1539_v25  ;;  %v7021_v7 = vpop.f32.mrb[33].mxu0 }
 0x934   :  { %v1542_v59 = vpop.f32.mrb[34].mxu0 }
 0x935   :  { %v1547_v20 = vmul.f32 0.088388346, %v1542_v59  ;;  %v7022_v53 = vpop.f32.mrb[35].mxu0  ;;  %v1548_v43 = vsel %vm1317_vm2, %v1546_v63, -inf }
 0x936   :  { %1549 = vmax.xlane.f32.xlu0 %v1548_v43  ;;  %v7293_v43 = vld [vmem:[#allocation14 + $0x4] ss:$8 sps:$4 sm:$0xff]  }
 0x937   :  { %v1551_v26 = vsel %vm1317_vm2, %v1547_v20, -inf }
 0x938   :  { %1552 = vmax.xlane.f32.xlu1 %v1551_v26 }
 0x9c3   :  { %v1550_v1 = vpop.xlane.xlu0 %1549 }
 0x9c4   :  { %v1554_v32 = vsub.f32 %v1546_v63, %v1550_v1 }
 0x9c5   :  { %v1553_v34 = vpop.xlane.xlu1 %1552 }
 0x9c6   :  { %v1556_v48 = vmul.f32 1.442695, %v1554_v32  ;;  %v1555_v18 = vsub.f32 %v1547_v20, %v1553_v34 }
 0x9c8   :  { %7939 = vpow2.f32 %v1556_v48  ;;  %v1558_v2 = vmul.f32 1.442695, %v1555_v18 }
 0x9ca   :  { %7941 = vpow2.f32 %v1558_v2  ;;  %v7291_v2 = vld [vmem:[#allocation14] ss:$8 sps:$4 sm:$0xff]  }
 0x9d2   :  { %v7940_v49 = vpop.eup %7939 }
 0x9d3   :  { %v1560_v12 = vsel %vm1317_vm2, %v7940_v49, 0.0 }
 0x9d4   :  { %v7942_v39 = vpop.eup %7941  ;;  %1561 = vadd.xlane.f32.xlu0 %v1560_v12  ;;  %v7296_v12 = vld [vmem:[#allocation14 + $0x14] ss:$8 sps:$4 sm:$0xff]  }
 0x9d5   :  { %v1563_v57 = vsel %vm1317_vm2, %v7942_v39, 0.0 }
 0x9d6   :  { %1564 = vadd.xlane.f32.xlu1 %v1563_v57  ;;  %v7299_v57 = vld [vmem:[#allocation14 + $0x24] ss:$8 sps:$4 sm:$0xff]  }
 0xa61   :  { %v1562_v58 = vpop.xlane.xlu0 %1561 }
 0xa62   :  { %7943 = vrcp.f32 %v1562_v58  ;;  %v7297_v58 = vld [vmem:[#allocation14 + $0x20] ss:$8 sps:$4 sm:$0xff]  }
 0xa63   :  { %v1565_v3 = vpop.xlane.xlu1 %1564 }
 0xa64   :  { %7945 = vrcp.f32 %v1565_v3  ;;  %v7302_v3 = vld [vmem:[#allocation14 + $0x34] ss:$8 sps:$4 sm:$0xff]  }
 0xa6c   :  { %v7944_v14 = vpop.eup %7943 }
 0xa6d   :  { %v1568_v16 = vmul.f32 %v7944_v14, %v7940_v49  ;;  %v7300_v14 = vld [vmem:[#allocation14 + $0x30] ss:$8 sps:$4 sm:$0xff]  }
 0xa6e   :  { %v7946_v15 = vpop.eup %7945 }
 0xa6f   :  { %v1569_v37 = vmul.f32 %v7946_v15, %v7942_v39  ;;  %v7294_v39 = vld [vmem:[#allocation14 + $0x10] ss:$8 sps:$4 sm:$0xff]   ;;  %v7305_v15 = vld [vmem:[#allocation14 + $0x44] ss:$8 sps:$4 sm:$0xff]  }
 0xa71   :  { %v1570_v17 = vpack.c.bf16 %v1569_v37, %v1568_v16  ;;  %v7303_v16 = vld [vmem:[#allocation14 + $0x40] ss:$8 sps:$4 sm:$0xff]   ;;  %v7308_v37 = vld [vmem:[#allocation14 + $0x54] ss:$8 sps:$4 sm:$0xff]  }
 0xa73   :  { %7026 = vmatmul.mubr.msk.bf16.vlgmr.msra.gmra.mrb[36].mxu0 %vm1317_vm2, %v1570_v17  ;;  %v7306_v17 = vld [vmem:[#allocation14 + $0x50] ss:$8 sps:$4 sm:$0xff]  }
 0xa74   :  { %7030 = vmatpush3.bf16.xpose.msra.mxu0 %v1619_v50  ;;  %7031 = vmatprep.mubr.msk.bf16.mxu0 %vm8482_vm1, %v8481_v54 }
 0xa75   :  { %7035 = vmatprep.subr.bf16.mxu0 %v8481_v54 }
 0xa7b   :  { %7032 = vmatmul.mubr.bf16.vlgmr.msra.gmra.mrb[40].mxu0 %v1618_v9 }
 0xa7c   :  { %7036 = vmatpush3.bf16.msra.mxu0 %v1686_v47  ;;  %7037 = vmatprep.mubr.msk.bf16.mxu0 %vm8482_vm1, %v8481_v54 }
 0xa7d   :  { %1937 = vmatprep.subr.bf16.mxu0 %v7293_v43 }
 0xb46   :  { %v9074_v19 = vpop.f32.mrb[36].mxu0 }
 0xb47   :  { %v7027_v36 = vpop.f32.mrb[37].mxu0 }
 0xb48   :  { %v9076_v6 = vpop.f32.mrb[38].mxu0  ;;  %v7312_v36 = vld [vmem:[#allocation14 + $0x70] ss:$8 sps:$4 sm:$0xff]  }
 0xb49   :  { %v1775_v50 = vpack.c.bf16 %v9076_v6, %v9074_v19  ;;  %v7028_v21 = vpop.f32.mrb[39].mxu0 }
 0xb4a   :  { %v7317_v21 = vld [vmem:[#allocation14 + $0x84] ss:$8 sps:$4 sm:$0xff]  }
 0xb4e   :  { %v1654_v24 = vpop.f32.mrb[40].mxu0 }
 0xb4f   :  { %v1661_v27 = vmul.f32 0.088388346, %v1654_v24  ;;  %v7033_v4 = vpop.f32.mrb[41].mxu0  ;;  %v7315_v24 = vld [vmem:[#allocation14 + $0x80] ss:$8 sps:$4 sm:$0xff]  }
 0xb50   :  { %v1657_v5 = vpop.f32.mrb[42].mxu0  ;;  %v7318_v4 = vld [vmem:[#allocation14 + $0x90] ss:$8 sps:$4 sm:$0xff]  }
 0xb51   :  { %v1662_v9 = vmul.f32 0.088388346, %v1657_v5  ;;  %v7034_v45 = vpop.f32.mrb[43].mxu0  ;;  %v1663_v22 = vsel %vm1317_vm2, %v1661_v27, -inf  ;;  %v7323_v5 = vld [vmem:[#allocation14 + $0xa4] ss:$8 sps:$4 sm:$0xff]  }
 0xb52   :  { %1664 = vmax.xlane.f32.xlu0 %v1663_v22  ;;  %v7326_v45 = vld [vmem:[#allocation14 + $0xb4] ss:$8 sps:$4 sm:$0xff]   ;;  %v7324_v22 = vld [vmem:[#allocation14 + $0xb0] ss:$8 sps:$4 sm:$0xff]  }
 0xb53   :  { %v1666_v29 = vsel %vm1317_vm2, %v1662_v9, -inf }
 0xb54   :  { %1667 = vmax.xlane.f32.xlu1 %v1666_v29  ;;  %v7329_v29 = vld [vmem:[#allocation14 + $0xc4] ss:$8 sps:$4 sm:$0xff]  }
 0xbdf   :  { %v1665_v47 = vpop.xlane.xlu0 %1664 }
 0xbe0   :  { %v1669_v46 = vsub.f32 %v1661_v27, %v1665_v47  ;;  %v7320_v27 = vld [vmem:[#allocation14 + $0x94] ss:$8 sps:$4 sm:$0xff]   ;;  %v7327_v47 = vld [vmem:[#allocation14 + $0xc0] ss:$8 sps:$4 sm:$0xff]  }
 0xbe1   :  { %v1668_v0 = vpop.xlane.xlu1 %1667 }
 0xbe2   :  { %v1671_v51 = vmul.f32 1.442695, %v1669_v46  ;;  %v1670_v25 = vsub.f32 %v1662_v9, %v1668_v0  ;;  %v7321_v9 = vld [vmem:[#allocation14 + $0xa0] ss:$8 sps:$4 sm:$0xff]   ;;  %v7332_v46 = vld [vmem:[#allocation14 + $0xd4] ss:$8 sps:$4 sm:$0xff]  }
 0xbe3   :  { %v7330_v0 = vld [vmem:[#allocation14 + $0xd0] ss:$8 sps:$4 sm:$0xff]  }
 0xbe4   :  { %7947 = vpow2.f32 %v1671_v51  ;;  %v1673_v63 = vmul.f32 1.442695, %v1670_v25  ;;  %v7335_v51 = vld [vmem:[#allocation14 + $0xe4] ss:$8 sps:$4 sm:$0xff]   ;;  %v7333_v25 = vld [vmem:[#allocation14 + $0xe0] ss:$8 sps:$4 sm:$0xff]  }
 0xbe6   :  { %7949 = vpow2.f32 %v1673_v63  ;;  %v7338_v63 = vld [vmem:[#allocation14 + $0xf4] ss:$8 sps:$4 sm:$0xff]  }
 0xbee   :  { %v7948_v7 = vpop.eup %7947 }
 0xbef   :  { %v1675_v59 = vsel %vm1317_vm2, %v7948_v7, 0.0 }
 0xbf0   :  { %v7950_v20 = vpop.eup %7949  ;;  %1676 = vadd.xlane.f32.xlu0 %v1675_v59 }
 0xbf1   :  { %v1678_v53 = vsel %vm1317_vm2, %v7950_v20, 0.0 }
 0xbf2   :  { %1679 = vadd.xlane.f32.xlu1 %v1678_v53 }
 0xc7d   :  { %v1677_v26 = vpop.xlane.xlu0 %1676 }
 0xc7e   :  { %7951 = vrcp.f32 %v1677_v26 }
 0xc7f   :  { %v1680_v1 = vpop.xlane.xlu1 %1679 }
 0xc80   :  { %7953 = vrcp.f32 %v1680_v1  ;;  %v1998_v1 = vld [vmem:[#allocation15] sm:$0x3] }
 0xc88   :  { %v7952_v32 = vpop.eup %7951 }
 0xc89   :  { %v1683_v48 = vmul.f32 %v7952_v32, %v7948_v7  ;;  %v7336_v7 = vld [vmem:[#allocation14 + $0xf0] ss:$8 sps:$4 sm:$0xff]   ;;  %v9095_v32 = vrot.slane %v1998_v1, %v8809_v11 }
 0xc8a   :  { %v7954_v34 = vpop.eup %7953 }
 0xc8b   :  { %v1684_v18 = vmul.f32 %v7954_v34, %v7950_v20 }
 0xc8d   :  { %v1685_v49 = vpack.c.bf16 %v1684_v18, %v1683_v48  ;;  %v9098_v48 = vrot.slane %v1998_v1, %v8812_v13  ;;  %v7390_v1 = vld [vmem:[%s10310_s12 + $0x108] ss:$16 sps:$4 sm:$0xff]  }
 0xc8f   :  { %7038 = vmatmul.mubr.msk.bf16.vlgmr.msra.gmra.mrb[44].mxu0 %vm1317_vm2, %v1685_v49 }
 0xc90   :  { %1938 = vmatpush1.bf16.msra.mxu0 %v7291_v2  ;;  %1969 = vmatprep.mubr.bf16.mxu0 %v1774_v56  ;;  %v7314_v56 = vld [vmem:[#allocation14 + $0x74] ss:$8 sps:$4 sm:$0xff]  }
 0xc91   :  { %1939 = vmatprep.subr.bf16.mxu0 %v7296_v12 }
 0xc94   :  { %1940 = vmatpush1.bf16.msra.mxu0 %v7294_v39 }
 0xc95   :  { %1941 = vmatprep.subr.bf16.mxu0 %v7299_v57  ;;  %v7342_v57 = vld [vmem:[%s10310_s12 + $0x8] ss:$16 sps:$4 sm:$0xff]  }
 0xc98   :  { %1942 = vmatpush1.bf16.msra.mxu0 %v7297_v58  ;;  %v7344_v58 = vld [vmem:[%s10310_s12 + $0xc] ss:$16 sps:$4 sm:$0xff]  }
 0xc99   :  { %1943 = vmatprep.subr.bf16.mxu0 %v7302_v3  ;;  %v7347_v3 = vld [vmem:[%s10310_s12 + $0x24] ss:$16 sps:$4 sm:$0xff]  }
 0xc9c   :  { %1944 = vmatpush1.bf16.msra.mxu0 %v7300_v14  ;;  %v7350_v14 = vld [vmem:[%s10310_s12 + $0x2c] ss:$16 sps:$4 sm:$0xff]  }
 0xc9d   :  { %1945 = vmatprep.subr.bf16.mxu0 %v7305_v15  ;;  %v7345_v15 = vld [vmem:[%s10310_s12 + $0x20] ss:$16 sps:$4 sm:$0xff]  }
 0xca0   :  { %1946 = vmatpush1.bf16.msra.mxu0 %v7303_v16  ;;  %v7348_v16 = vld [vmem:[%s10310_s12 + $0x28] ss:$16 sps:$4 sm:$0xff]  }
 0xca1   :  { %1947 = vmatprep.subr.bf16.mxu0 %v7308_v37  ;;  %v7353_v37 = vld [vmem:[%s10310_s12 + $0x44] ss:$16 sps:$4 sm:$0xff]  }
 0xca4   :  { %1948 = vmatpush1.bf16.msra.mxu0 %v7306_v17  ;;  %v7356_v17 = vld [vmem:[%s10310_s12 + $0x4c] ss:$16 sps:$4 sm:$0xff]  }
 0xca5   :  { %1949 = vmatprep.subr.bf16.mxu0 %v7311_v62  ;;  %v7351_v62 = vld [vmem:[%s10310_s12 + $0x40] ss:$16 sps:$4 sm:$0xff]  }
 0xca8   :  { %1950 = vmatpush1.bf16.msra.mxu0 %v7309_v8  ;;  %v7354_v8 = vld [vmem:[%s10310_s12 + $0x48] ss:$16 sps:$4 sm:$0xff]  }
 0xca9   :  { %1951 = vmatprep.subr.bf16.mxu0 %v7314_v56  ;;  %v7359_v56 = vld [vmem:[%s10310_s12 + $0x64] ss:$16 sps:$4 sm:$0xff]  }
 0xcac   :  { %1952 = vmatpush1.bf16.msra.mxu0 %v7312_v36  ;;  %v7362_v36 = vld [vmem:[%s10310_s12 + $0x6c] ss:$16 sps:$4 sm:$0xff]  }
 0xcad   :  { %1953 = vmatprep.subr.bf16.mxu0 %v7317_v21  ;;  %v7357_v21 = vld [vmem:[%s10310_s12 + $0x60] ss:$16 sps:$4 sm:$0xff]  }
 0xcb0   :  { %1954 = vmatpush1.bf16.msra.mxu0 %v7315_v24  ;;  %v7360_v24 = vld [vmem:[%s10310_s12 + $0x68] ss:$16 sps:$4 sm:$0xff]  }
 0xcb1   :  { %1955 = vmatprep.subr.bf16.mxu0 %v7320_v27  ;;  %v7365_v27 = vld [vmem:[%s10310_s12 + $0x84] ss:$16 sps:$4 sm:$0xff]  }
 0xcb4   :  { %1956 = vmatpush1.bf16.msra.mxu0 %v7318_v4  ;;  %v7368_v4 = vld [vmem:[%s10310_s12 + $0x8c] ss:$16 sps:$4 sm:$0xff]  }
 0xcb5   :  { %1957 = vmatprep.subr.bf16.mxu0 %v7323_v5  ;;  %v7363_v5 = vld [vmem:[%s10310_s12 + $0x80] ss:$16 sps:$4 sm:$0xff]  }
 0xcb8   :  { %1958 = vmatpush1.bf16.msra.mxu0 %v7321_v9  ;;  %v7366_v9 = vld [vmem:[%s10310_s12 + $0x88] ss:$16 sps:$4 sm:$0xff]  }
 0xcb9   :  { %1959 = vmatprep.subr.bf16.mxu0 %v7326_v45  ;;  %v7371_v45 = vld [vmem:[%s10310_s12 + $0xa4] ss:$16 sps:$4 sm:$0xff]  }
 0xcbc   :  { %1960 = vmatpush1.bf16.msra.mxu0 %v7324_v22  ;;  %v7374_v22 = vld [vmem:[%s10310_s12 + $0xac] ss:$16 sps:$4 sm:$0xff]  }
 0xcbd   :  { %1961 = vmatprep.subr.bf16.mxu0 %v7329_v29  ;;  %v7369_v29 = vld [vmem:[%s10310_s12 + $0xa0] ss:$16 sps:$4 sm:$0xff]  }
 0xcc0   :  { %1962 = vmatpush1.bf16.msra.mxu0 %v7327_v47  ;;  %v7372_v47 = vld [vmem:[%s10310_s12 + $0xa8] ss:$16 sps:$4 sm:$0xff]  }
 0xcc1   :  { %1963 = vmatprep.subr.bf16.mxu0 %v7332_v46  ;;  %v7377_v46 = vld [vmem:[%s10310_s12 + $0xc4] ss:$16 sps:$4 sm:$0xff]  }
 0xcc4   :  { %1964 = vmatpush1.bf16.msra.mxu0 %v7330_v0  ;;  %v7380_v0 = vld [vmem:[%s10310_s12 + $0xcc] ss:$16 sps:$4 sm:$0xff]  }
 0xcc5   :  { %1965 = vmatprep.subr.bf16.mxu0 %v7335_v51  ;;  %v7375_v51 = vld [vmem:[%s10310_s12 + $0xc0] ss:$16 sps:$4 sm:$0xff]  }
 0xcc8   :  { %1966 = vmatpush1.bf16.msra.mxu0 %v7333_v25  ;;  %v7378_v25 = vld [vmem:[%s10310_s12 + $0xc8] ss:$16 sps:$4 sm:$0xff]  }
 0xcc9   :  { %1967 = vmatprep.subr.bf16.mxu0 %v7338_v63  ;;  %v7383_v63 = vld [vmem:[%s10310_s12 + $0xe4] ss:$16 sps:$4 sm:$0xff]  }
 0xccc   :  { %1968 = vmatpush1.bf16.msra.mxu0 %v7336_v7  ;;  %v7386_v7 = vld [vmem:[%s10310_s12 + $0xec] ss:$16 sps:$4 sm:$0xff]  }
 0xccd   :  { %2585 = vmatprep.subr.bf16.mxu0 %v7344_v58 }
 0xccf   :  { %1970 = vmatmul.mubr.bf16.vlgmr.msra.gmra.mrb[48].mxu0 %v1773_v35 }
 0xcd0   :  { %2586 = vmatpush1.bf16.msra.mxu0 %v7342_v57 }
 0xcd1   :  { %2587 = vmatprep.subr.bf16.mxu0 %v7350_v14 }
 0xcd4   :  { %2588 = vmatpush1.bf16.msra.mxu0 %v7348_v16 }
 0xcd5   :  { %2589 = vmatprep.subr.bf16.mxu0 %v7356_v17 }
 0xcd8   :  { %2590 = vmatpush1.bf16.msra.mxu0 %v7354_v8 }
 0xcd9   :  { %2591 = vmatprep.subr.bf16.mxu0 %v7362_v36  ;;  %v7398_v36 = vld [vmem:[%s10310_s12 + $0x12c] ss:$16 sps:$4 sm:$0xff]  }
 0xcdc   :  { %2592 = vmatpush1.bf16.msra.mxu0 %v7360_v24  ;;  %v7396_v24 = vld [vmem:[%s10310_s12 + $0x128] ss:$16 sps:$4 sm:$0xff]  }
 0xcdd   :  { %2593 = vmatprep.subr.bf16.mxu0 %v7368_v4  ;;  %v7404_v4 = vld [vmem:[%s10310_s12 + $0x14c] ss:$16 sps:$4 sm:$0xff]  }
 0xce0   :  { %2594 = vmatpush1.bf16.msra.mxu0 %v7366_v9  ;;  %v7402_v9 = vld [vmem:[%s10310_s12 + $0x148] ss:$16 sps:$4 sm:$0xff]  }
 0xce1   :  { %2595 = vmatprep.subr.bf16.mxu0 %v7374_v22  ;;  %v7410_v22 = vld [vmem:[%s10310_s12 + $0x16c] ss:$16 sps:$4 sm:$0xff]  }
 0xce4   :  { %2596 = vmatpush1.bf16.msra.mxu0 %v7372_v47  ;;  %v7408_v47 = vld [vmem:[%s10310_s12 + $0x168] ss:$16 sps:$4 sm:$0xff]  }
 0xce5   :  { %2597 = vmatprep.subr.bf16.mxu0 %v7380_v0  ;;  %v7416_v0 = vld [vmem:[%s10310_s12 + $0x18c] ss:$16 sps:$4 sm:$0xff]  }
 0xce8   :  { %2598 = vmatpush1.bf16.msra.mxu0 %v7378_v25  ;;  %v7414_v25 = vld [vmem:[%s10310_s12 + $0x188] ss:$16 sps:$4 sm:$0xff]  }
 0xce9   :  { %2599 = vmatprep.subr.bf16.mxu0 %v7386_v7  ;;  %v7422_v7 = vld [vmem:[%s10310_s12 + $0x1ac] ss:$16 sps:$4 sm:$0xff]  }
 0xd62   :  { %v1724_v59 = vpop.f32.mrb[44].mxu0 }
 0xd63   :  { %v7039_v20 = vpop.f32.mrb[45].mxu0 }
 0xd64   :  { %v1727_v53 = vpop.f32.mrb[46].mxu0  ;;  %v7384_v20 = vld [vmem:[%s10310_s12 + $0xe8] ss:$16 sps:$4 sm:$0xff]  }
 0xd65   :  { %v1776_v43 = vpack.c.bf16 %v1727_v53, %v1724_v59  ;;  %v7040_v26 = vpop.f32.mrb[47].mxu0  ;;  %v7381_v59 = vld [vmem:[%s10310_s12 + $0xe0] ss:$16 sps:$4 sm:$0xff]   ;;  %v7389_v53 = vld [vmem:[%s10310_s12 + $0x104] ss:$16 sps:$4 sm:$0xff]   ;;  %2600 = vmatpush1.bf16.msra.mxu0 %v7384_v20 }
 0xd66   :  { %v7387_v26 = vld [vmem:[%s10310_s12 + $0x100] ss:$16 sps:$4 sm:$0xff]   ;;  %v7420_v20 = vld [vmem:[%s10310_s12 + $0x1a8] ss:$16 sps:$4 sm:$0xff]  }
 0xd67   :  { %1979 = vmatprep.mubr.bf16.mxu0 %v1776_v43  ;;  %v7392_v43 = vld [vmem:[%s10310_s12 + $0x10c] ss:$16 sps:$4 sm:$0xff]  }
 0xd68   :  { %1980 = vmatmul.mubr.bf16.gmra.mrb[52].mxu0 %v1775_v50  ;;  %2601 = vmatprep.subr.bf16.mxu0 %v7392_v43  ;;  %v7428_v43 = vld [vmem:[%s10310_s12 + $0x1cc] ss:$16 sps:$4 sm:$0xff]  }
 0xd69   :  { %2602 = vmatpush1.bf16.msra.mxu0 %v7390_v1  ;;  %v7426_v1 = vld [vmem:[%s10310_s12 + $0x1c8] ss:$16 sps:$4 sm:$0xff]  }
 0xd6a   :  { %2603 = vmatprep.subr.bf16.mxu0 %v7398_v36 }
 0xd6d   :  { %2604 = vmatpush1.bf16.msra.mxu0 %v7396_v24 }
 0xd6e   :  { %2605 = vmatprep.subr.bf16.mxu0 %v7404_v4 }
 0xd71   :  { %2606 = vmatpush1.bf16.msra.mxu0 %v7402_v9 }
 0xd72   :  { %2607 = vmatprep.subr.bf16.mxu0 %v7410_v22 }
 0xd75   :  { %2608 = vmatpush1.bf16.msra.mxu0 %v7408_v47 }
 0xd76   :  { %2609 = vmatprep.subr.bf16.mxu0 %v7416_v0 }
 0xd79   :  { %2610 = vmatpush1.bf16.msra.mxu0 %v7414_v25 }
 0xd7a   :  { %2611 = vmatprep.subr.bf16.mxu0 %v7422_v7 }
 0xd7d   :  { %2612 = vmatpush1.bf16.msra.mxu0 %v7420_v20 }
 0xd7e   :  { %2613 = vmatprep.subr.bf16.mxu0 %v7428_v43 }
 0xd81   :  { %2614 = vmatpush1.bf16.msra.mxu0 %v7426_v1 }
 0xda2   :  { %v1971_v34 = vpop.f32.mrb[48].mxu0 }
 0xda3   :  { %v1990_v52 = vadd.f32 %v1971_v34, %v8816_v23  ;;  %v1973_v33 = vpop.f32.mrb[49].mxu0 }
 0xda4   :  { %v1991_v35 = vadd.f32 %v1973_v33, %v8818_v28  ;;  %v1975_v18 = vpop.f32.mrb[50].mxu0 }
 0xda5   :  { %v9103_v2 = vadd.f32 %v9095_v32, %v1990_v52  ;;  %v1992_v19 = vadd.f32 %v1975_v18, %v8820_v30  ;;  %v1977_v6 = vpop.f32.mrb[51].mxu0  ;;  %v7339_v30 = vld [vmem:[%s10310_s12] ss:$16 sps:$4 sm:$0xff]  }
 0xda6   :  { %v9107_v50 = vadd.f32 %v9098_v48, %v1991_v35  ;;  %v1993_v49 = vadd.f32 %v1977_v6, %v8822_v31  ;;  %v7341_v31 = vld [vmem:[%s10310_s12 + $0x4] ss:$16 sps:$4 sm:$0xff]  }
 0xda7   :  { %v9111_v12 = vadd.f32 %v9095_v32, %v1992_v19  ;;  %2532 = vmatprep.subr.bf16.mxu1 %v7341_v31 }
 0xda8   :  { %v9114_v23 = vadd.f32 %v9098_v48, %v1993_v49  ;;  %v2020_v28 = vadd.f32 %v9107_v50, %v9103_v2  ;;  %2533 = vmatpush1.bf16.msra.mxu1 %v7339_v30 }
 0xda9   :  { %2534 = vmatprep.subr.bf16.mxu1 %v7347_v3 }
 0xdaa   :  { %2021 = vadd.xlane.f32.xlu0 %v2020_v28  ;;  %v2023_v39 = vadd.f32 %v9114_v23, %v9111_v12 }
 0xdac   :  { %2024 = vadd.xlane.f32.xlu1 %v2023_v39  ;;  %2535 = vmatpush1.bf16.msra.mxu1 %v7345_v15 }
 0xdad   :  { %2536 = vmatprep.subr.bf16.mxu1 %v7353_v37 }
 0xdb0   :  { %2537 = vmatpush1.bf16.msra.mxu1 %v7351_v62 }
 0xdb1   :  { %2538 = vmatprep.subr.bf16.mxu1 %v7359_v56  ;;  %v7395_v56 = vld [vmem:[%s10310_s12 + $0x124] ss:$16 sps:$4 sm:$0xff]  }
 0xdb4   :  { %2539 = vmatpush1.bf16.msra.mxu1 %v7357_v21  ;;  %v7393_v21 = vld [vmem:[%s10310_s12 + $0x120] ss:$16 sps:$4 sm:$0xff]  }
 0xdb5   :  { %2540 = vmatprep.subr.bf16.mxu1 %v7365_v27  ;;  %v7401_v27 = vld [vmem:[%s10310_s12 + $0x144] ss:$16 sps:$4 sm:$0xff]  }
 0xdb8   :  { %2541 = vmatpush1.bf16.msra.mxu1 %v7363_v5  ;;  %v7399_v5 = vld [vmem:[%s10310_s12 + $0x140] ss:$16 sps:$4 sm:$0xff]  }
 0xdb9   :  { %2542 = vmatprep.subr.bf16.mxu1 %v7371_v45  ;;  %v7407_v45 = vld [vmem:[%s10310_s12 + $0x164] ss:$16 sps:$4 sm:$0xff]  }
 0xdbc   :  { %2543 = vmatpush1.bf16.msra.mxu1 %v7369_v29  ;;  %v7405_v29 = vld [vmem:[%s10310_s12 + $0x160] ss:$16 sps:$4 sm:$0xff]  }
 0xdbd   :  { %2544 = vmatprep.subr.bf16.mxu1 %v7377_v46  ;;  %v7413_v46 = vld [vmem:[%s10310_s12 + $0x184] ss:$16 sps:$4 sm:$0xff]  }
 0xdc0   :  { %2545 = vmatpush1.bf16.msra.mxu1 %v7375_v51  ;;  %v7411_v51 = vld [vmem:[%s10310_s12 + $0x180] ss:$16 sps:$4 sm:$0xff]  }
 0xdc1   :  { %2546 = vmatprep.subr.bf16.mxu1 %v7383_v63  ;;  %v7419_v63 = vld [vmem:[%s10310_s12 + $0x1a4] ss:$16 sps:$4 sm:$0xff]  }
 0xdc4   :  { %2547 = vmatpush1.bf16.msra.mxu1 %v7381_v59  ;;  %v7417_v59 = vld [vmem:[%s10310_s12 + $0x1a0] ss:$16 sps:$4 sm:$0xff]  }
 0xdc5   :  { %2548 = vmatprep.subr.bf16.mxu1 %v7389_v53  ;;  %v7425_v53 = vld [vmem:[%s10310_s12 + $0x1c4] ss:$16 sps:$4 sm:$0xff]  }
 0xdc8   :  { %2549 = vmatpush1.bf16.msra.mxu1 %v7387_v26  ;;  %v7423_v26 = vld [vmem:[%s10310_s12 + $0x1c0] ss:$16 sps:$4 sm:$0xff]  }
 0xdc9   :  { %2550 = vmatprep.subr.bf16.mxu1 %v7395_v56 }
 0xdcc   :  { %2551 = vmatpush1.bf16.msra.mxu1 %v7393_v21 }
 0xdcd   :  { %2552 = vmatprep.subr.bf16.mxu1 %v7401_v27  ;;  %v2018_v27 = vld [vmem:[#allocation17] sm:$0x3] }
 0xdce   :  { %v9373_v4 = vrot.slane %v2018_v27, %v8809_v11  ;;  %v9376_v9 = vrot.slane %v2018_v27, %v8812_v13  ;;  %v7470_v27 = vld [vmem:[#allocation21 + $0xb4] ss:$8 sps:$4 sm:$0xff]  }
 0xdd0   :  { %2553 = vmatpush1.bf16.msra.mxu1 %v7399_v5  ;;  %v2019_v5 = vld [vmem:[#allocation18] sm:$0x3] }
 0xdd1   :  { %2554 = vmatprep.subr.bf16.mxu1 %v7407_v45  ;;  %v9384_v0 = vrot.slane %v2019_v5, %v8812_v13 }
 0xdd4   :  { %2555 = vmatpush1.bf16.msra.mxu1 %v7405_v29 }
 0xdd5   :  { %2556 = vmatprep.subr.bf16.mxu1 %v7413_v46  ;;  %v9381_v46 = vrot.slane %v2019_v5, %v8809_v11  ;;  %v7468_v5 = vld [vmem:[#allocation21 + $0xb0] ss:$8 sps:$4 sm:$0xff]  }
 0xdd8   :  { %2557 = vmatpush1.bf16.msra.mxu1 %v7411_v51 }
 0xdd9   :  { %2558 = vmatprep.subr.bf16.mxu1 %v7419_v63 }
 0xddc   :  { %2559 = vmatpush1.bf16.msra.mxu1 %v7417_v59 }
 0xddd   :  { %2560 = vmatprep.subr.bf16.mxu1 %v7425_v53 }
 0xde0   :  { %2561 = vmatpush1.bf16.msra.mxu1 %v7423_v26 }
 0xe37   :  { %v2022_v34 = vpop.xlane.xlu0 %2021 }
 0xe38   :  { %v2032_v52 = vmul.f32 0.00390625, %v2022_v34  ;;  %v7431_v34 = vld [vmem:[%s10310_s12 + $0x1e4] ss:$16 sps:$4 sm:$0xff]  }
 0xe39   :  { %v2025_v33 = vpop.xlane.xlu1 %2024  ;;  %2562 = vmatprep.subr.bf16.mxu1 %v7431_v34  ;;  %v7440_v34 = vld [vmem:[#allocation21 + $0x14] ss:$8 sps:$4 sm:$0xff]  }
 0xe3a   :  { %v2033_v35 = vmul.f32 0.00390625, %v2025_v33  ;;  %v9230_v49 = vsub.f32 %v9103_v2, %v2032_v52  ;;  %v9233_v28 = vsub.f32 %v9107_v50, %v2032_v52  ;;  %v7434_v52 = vld [vmem:[%s10310_s12 + $0x1ec] ss:$16 sps:$4 sm:$0xff]   ;;  %v7429_v33 = vld [vmem:[%s10310_s12 + $0x1e0] ss:$16 sps:$4 sm:$0xff]  }
 0xe3b   :  { %v1981_v18 = vpop.f32.mrb[52].mxu0  ;;  %2615 = vmatprep.subr.bf16.mxu0 %v7434_v52  ;;  %2563 = vmatpush1.bf16.msra.mxu1 %v7429_v33  ;;  %v7438_v52 = vld [vmem:[#allocation21 + $0x10] ss:$8 sps:$4 sm:$0xff]   ;;  %v7443_v33 = vld [vmem:[#allocation21 + $0x24] ss:$8 sps:$4 sm:$0xff]  }
 0xe3c   :  { %v1994_v19 = vadd.f32 %v1981_v18, %v8828_v40  ;;  %v1983_v6 = vpop.f32.mrb[53].mxu0  ;;  %v9241_v3 = vsub.f32 %v9111_v12, %v2033_v35  ;;  %v9244_v40 = vsub.f32 %v9114_v23, %v2033_v35  ;;  %v2044_v37 = vmul.f32 %v9230_v49, %v9230_v49  ;;  %v7432_v35 = vld [vmem:[%s10310_s12 + $0x1e8] ss:$16 sps:$4 sm:$0xff]  }
 0xe3d   :  { %v1995_v39 = vadd.f32 %v1983_v6, %v8830_v41  ;;  %v1985_v30 = vpop.f32.mrb[54].mxu0  ;;  %v2045_v17 = vmul.f32 %v9233_v28, %v9233_v28  ;;  %2616 = vmatpush1.bf16.msra.mxu0 %v7432_v35  ;;  %v7441_v35 = vld [vmem:[#allocation21 + $0x20] ss:$8 sps:$4 sm:$0xff]  }
 0xe3e   :  { %v9237_v31 = vadd.f32 %v9095_v32, %v1994_v19  ;;  %v1996_v57 = vadd.f32 %v1985_v30, %v8855_v42  ;;  %v1987_v58 = vpop.f32.mrb[55].mxu0 }
 0xe3f   :  { %v9247_v14 = vadd.f32 %v9098_v48, %v1995_v39  ;;  %v1997_v15 = vadd.f32 %v1987_v58, %v8858_v44  ;;  %v2046_v44 = vmul.f32 %v9241_v3, %v9241_v3 }
 0xe40   :  { %v9251_v41 = vadd.f32 %v9095_v32, %v1996_v57  ;;  %v2047_v32 = vmul.f32 %v9244_v40, %v9244_v40 }
 0xe41   :  { %v9254_v16 = vadd.f32 %v9098_v48, %v1997_v15  ;;  %v2026_v42 = vadd.f32 %v9247_v14, %v9237_v31  ;;  %v2052_v48 = vadd.f32 %v2045_v17, %v2044_v37 }
 0xe42   :  { %v2055_v8 = vadd.f32 %v2047_v32, %v2046_v44 }
 0xe43   :  { %2027 = vadd.xlane.f32.xlu0 %v2026_v42  ;;  %v2029_v62 = vadd.f32 %v9254_v16, %v9251_v41 }
 0xe45   :  { %2030 = vadd.xlane.f32.xlu1 %v2029_v62 }
 0xe47   :  { %2053 = vadd.xlane.f32.xlu0 %v2052_v48 }
 0xe49   :  { %2056 = vadd.xlane.f32.xlu1 %v2055_v8 }
 0xed0   :  { %v2028_v18 = vpop.xlane.xlu0 %2027 }
 0xed1   :  { %v2034_v19 = vmul.f32 0.00390625, %v2028_v18  ;;  %v7446_v18 = vld [vmem:[#allocation21 + $0x34] ss:$8 sps:$4 sm:$0xff]  }
 0xed2   :  { %v2031_v6 = vpop.xlane.xlu1 %2030 }
 0xed3   :  { %v9353_v39 = vsub.f32 %v9237_v31, %v2034_v19  ;;  %v9356_v30 = vsub.f32 %v9247_v14, %v2034_v19  ;;  %v2035_v57 = vmul.f32 0.00390625, %v2031_v6  ;;  %v7444_v19 = vld [vmem:[#allocation21 + $0x30] ss:$8 sps:$4 sm:$0xff]   ;;  %v7449_v6 = vld [vmem:[#allocation21 + $0x44] ss:$8 sps:$4 sm:$0xff]  }
 0xed4   :  { %v2054_v58 = vpop.xlane.xlu0 %2053 }
 0xed5   :  { %v9359_v15 = vsub.f32 %v9251_v41, %v2035_v57  ;;  %v9362_v42 = vsub.f32 %v9254_v16, %v2035_v57  ;;  %v2064_v37 = vmul.f32 0.00390625, %v2054_v58  ;;  %v2048_v17 = vmul.f32 %v9353_v39, %v9353_v39  ;;  %v7447_v57 = vld [vmem:[#allocation21 + $0x40] ss:$8 sps:$4 sm:$0xff]   ;;  %v7452_v58 = vld [vmem:[#allocation21 + $0x54] ss:$8 sps:$4 sm:$0xff]  }
 0xed6   :  { %v2057_v62 = vpop.xlane.xlu1 %2056  ;;  %v2049_v44 = vmul.f32 %v9356_v30, %v9356_v30 }
 0xed7   :  { %v2068_v32 = vadd.f32 1e-06, %v2064_v37  ;;  %v2065_v48 = vmul.f32 0.00390625, %v2057_v62  ;;  %v2050_v8 = vmul.f32 %v9359_v15, %v9359_v15  ;;  %v2051_v56 = vmul.f32 %v9362_v42, %v9362_v42  ;;  %v7450_v37 = vld [vmem:[#allocation21 + $0x50] ss:$8 sps:$4 sm:$0xff]  }
 0xed8   :  { %v2058_v36 = vadd.f32 %v2049_v44, %v2048_v17  ;;  %v7455_v17 = vld [vmem:[#allocation21 + $0x64] ss:$8 sps:$4 sm:$0xff]   ;;  %v7453_v62 = vld [vmem:[#allocation21 + $0x60] ss:$8 sps:$4 sm:$0xff]   ;;  %v7458_v44 = vld [vmem:[#allocation21 + $0x74] ss:$8 sps:$4 sm:$0xff]  }
 0xed9   :  { %7955 = vrsqrt.f32 %v2068_v32  ;;  %v2069_v21 = vadd.f32 1e-06, %v2065_v48  ;;  %v2061_v24 = vadd.f32 %v2051_v56, %v2050_v8  ;;  %v7456_v32 = vld [vmem:[#allocation21 + $0x70] ss:$8 sps:$4 sm:$0xff]   ;;  %v7461_v48 = vld [vmem:[#allocation21 + $0x84] ss:$8 sps:$4 sm:$0xff]  }
 0xeda   :  { %2059 = vadd.xlane.f32.xlu0 %v2058_v36  ;;  %v7459_v8 = vld [vmem:[#allocation21 + $0x80] ss:$8 sps:$4 sm:$0xff]   ;;  %v7464_v56 = vld [vmem:[#allocation21 + $0x94] ss:$8 sps:$4 sm:$0xff]   ;;  %v7462_v36 = vld [vmem:[#allocation21 + $0x90] ss:$8 sps:$4 sm:$0xff]  }
 0xedb   :  { %7957 = vrsqrt.f32 %v2069_v21  ;;  %2062 = vadd.xlane.f32.xlu1 %v2061_v24  ;;  %v7467_v21 = vld [vmem:[#allocation21 + $0xa4] ss:$8 sps:$4 sm:$0xff]   ;;  %v7465_v24 = vld [vmem:[#allocation21 + $0xa0] ss:$8 sps:$4 sm:$0xff]  }
 0xee3   :  { %v7956_v45 = vpop.eup %7955 }
 0xee4   :  { %v2076_v22 = vmul.f32 %v7956_v45, %v9230_v49  ;;  %v2077_v29 = vmul.f32 %v7956_v45, %v9233_v28  ;;  %v7473_v45 = vld [vmem:[#allocation21 + $0xc4] ss:$8 sps:$4 sm:$0xff]  }
 0xee5   :  { %v7958_v47 = vpop.eup %7957 }
 0xee6   :  { %v2095_v51 = vmul.f32 %v9373_v4, %v2076_v22  ;;  %v2078_v25 = vmul.f32 %v7958_v47, %v9241_v3  ;;  %v2079_v63 = vmul.f32 %v7958_v47, %v9244_v40  ;;  %v2096_v7 = vmul.f32 %v9376_v9, %v2077_v29  ;;  %v7435_v3 = vld [vmem:[#allocation21] ss:$8 sps:$4 sm:$0xff]   ;;  %v7437_v40 = vld [vmem:[#allocation21 + $0x4] ss:$8 sps:$4 sm:$0xff]   ;;  %v7476_v29 = vld [vmem:[#allocation21 + $0xd4] ss:$8 sps:$4 sm:$0xff]  }
 0xee7   :  { %3174 = vmatprep.subr.bf16.mxu1 %v7437_v40  ;;  %v7471_v22 = vld [vmem:[#allocation21 + $0xc0] ss:$8 sps:$4 sm:$0xff]   ;;  %v7474_v47 = vld [vmem:[#allocation21 + $0xd0] ss:$8 sps:$4 sm:$0xff]  }
 0xee8   :  { %v2097_v59 = vmul.f32 %v9373_v4, %v2078_v25  ;;  %v2098_v49 = vmul.f32 %v9376_v9, %v2079_v63  ;;  %v2115_v28 = vadd.f32 %v9384_v0, %v2096_v7  ;;  %v2114_v53 = vadd.f32 %v9381_v46, %v2095_v51  ;;  %v7479_v51 = vld [vmem:[#allocation21 + $0xe4] ss:$8 sps:$4 sm:$0xff]   ;;  %v7477_v25 = vld [vmem:[#allocation21 + $0xe0] ss:$8 sps:$4 sm:$0xff]   ;;  %v7482_v63 = vld [vmem:[#allocation21 + $0xf4] ss:$8 sps:$4 sm:$0xff]  }
 0xee9   :  { %v7480_v7 = vld [vmem:[#allocation21 + $0xf0] ss:$8 sps:$4 sm:$0xff]  }
 0xeea   :  { %v2117_v20 = vadd.f32 %v9384_v0, %v2098_v49  ;;  %v2116_v43 = vadd.f32 %v9381_v46, %v2097_v59 }
 0xeec   :  { %v2187_v26 = vpack.c.bf16 %v2117_v20, %v2115_v28  ;;  %v2186_v1 = vpack.c.bf16 %v2116_v43, %v2114_v53  ;;  %v7485_v53 = vld [vmem:[#allocation21 + $0x104] ss:$8 sps:$4 sm:$0xff]  }
 0xeee   :  { %2564 = vmatprep.mubr.bf16.mxu1 %v2187_v26  ;;  %2617 = vmatprep.mubr.bf16.mxu0 %v2187_v26 }
 0xeef   :  { %2565 = vmatmul.mubr.bf16.vlgmr.msra.gmra.mrb[16].mxu1 %v2186_v1  ;;  %2618 = vmatmul.mubr.bf16.vlgmr.msra.gmra.mrb[56].mxu0 %v2186_v1 }
 0xef0   :  { %3175 = vmatpush1.bf16.msra.mxu1 %v7435_v3 }
 0xef1   :  { %3176 = vmatprep.subr.bf16.mxu1 %v7440_v34 }
 0xef4   :  { %3177 = vmatpush1.bf16.msra.mxu1 %v7438_v52 }
 0xef5   :  { %3178 = vmatprep.subr.bf16.mxu1 %v7443_v33 }
 0xef8   :  { %3179 = vmatpush1.bf16.msra.mxu1 %v7441_v35 }
 0xef9   :  { %3180 = vmatprep.subr.bf16.mxu1 %v7446_v18 }
 0xefc   :  { %3181 = vmatpush1.bf16.msra.mxu1 %v7444_v19 }
 0xefd   :  { %3182 = vmatprep.subr.bf16.mxu1 %v7449_v6 }
 0xf00   :  { %3183 = vmatpush1.bf16.msra.mxu1 %v7447_v57 }
 0xf01   :  { %3184 = vmatprep.subr.bf16.mxu1 %v7452_v58 }
 0xf04   :  { %3185 = vmatpush1.bf16.msra.mxu1 %v7450_v37 }
 0xf05   :  { %3186 = vmatprep.subr.bf16.mxu1 %v7455_v17 }
 0xf08   :  { %3187 = vmatpush1.bf16.msra.mxu1 %v7453_v62 }
 0xf09   :  { %3188 = vmatprep.subr.bf16.mxu1 %v7458_v44 }
 0xf0c   :  { %3189 = vmatpush1.bf16.msra.mxu1 %v7456_v32 }
 0xf0d   :  { %3190 = vmatprep.subr.bf16.mxu1 %v7461_v48 }
 0xf10   :  { %3191 = vmatpush1.bf16.msra.mxu1 %v7459_v8 }
 0xf11   :  { %3192 = vmatprep.subr.bf16.mxu1 %v7464_v56 }
 0xf14   :  { %3193 = vmatpush1.bf16.msra.mxu1 %v7462_v36 }
 0xf15   :  { %3194 = vmatprep.subr.bf16.mxu1 %v7467_v21 }
 0xf18   :  { %3195 = vmatpush1.bf16.msra.mxu1 %v7465_v24 }
 0xf19   :  { %3196 = vmatprep.subr.bf16.mxu1 %v7470_v27 }
 0xf1c   :  { %3197 = vmatpush1.bf16.msra.mxu1 %v7468_v5 }
 0xf1d   :  { %3198 = vmatprep.subr.bf16.mxu1 %v7473_v45 }
 0xf20   :  { %3199 = vmatpush1.bf16.msra.mxu1 %v7471_v22 }
 0xf21   :  { %3200 = vmatprep.subr.bf16.mxu1 %v7476_v29 }
 0xf24   :  { %3201 = vmatpush1.bf16.msra.mxu1 %v7474_v47 }
 0xf25   :  { %3202 = vmatprep.subr.bf16.mxu1 %v7479_v51 }
 0xf28   :  { %3203 = vmatpush1.bf16.msra.mxu1 %v7477_v25 }
 0xf29   :  { %3204 = vmatprep.subr.bf16.mxu1 %v7482_v63 }
 0xf2c   :  { %3205 = vmatpush1.bf16.msra.mxu1 %v7480_v7 }
 0xf2d   :  { %3227 = vmatprep.subr.bf16.mxu1 %v7485_v53 }
 0xf67   :  { %v2060_v59 = vpop.xlane.xlu0 %2059 }
 0xf68   :  { %v2066_v49 = vmul.f32 0.00390625, %v2060_v59  ;;  %v2063_v28 = vpop.xlane.xlu1 %2062 }
 0xf69   :  { %v2067_v20 = vmul.f32 0.00390625, %v2063_v28 }
 0xf6a   :  { %v2070_v43 = vadd.f32 1e-06, %v2066_v49 }
 0xf6b   :  { %v2071_v26 = vadd.f32 1e-06, %v2067_v20 }
 0xf6c   :  { %7959 = vrsqrt.f32 %v2070_v43 }
 0xf6d   :  { %7961 = vrsqrt.f32 %v2071_v26 }
 0xf76   :  { %v7960_v1 = vpop.eup %7959 }
 0xf77   :  { %v7962_v3 = vpop.eup %7961  ;;  %v2081_v40 = vmul.f32 %v7960_v1, %v9356_v30  ;;  %v2080_v34 = vmul.f32 %v7960_v1, %v9353_v39 }
 0xf78   :  { %v2083_v52 = vmul.f32 %v7962_v3, %v9362_v42  ;;  %v2082_v33 = vmul.f32 %v7962_v3, %v9359_v15  ;;  %v2190_v15 = vld [vmem:[#allocation20] sm:$0xf] }
 0xf79   :  { %v2100_v35 = vmul.f32 %v9376_v9, %v2081_v40  ;;  %v2099_v18 = vmul.f32 %v9373_v4, %v2080_v34  ;;  %v9409_v17 = vrot.slane %v2190_v15, %v8809_v11 }
 0xf7a   :  { %v2102_v19 = vmul.f32 %v9376_v9, %v2083_v52  ;;  %v2101_v6 = vmul.f32 %v9373_v4, %v2082_v33  ;;  %v9412_v4 = vrot.slane %v2190_v15, %v8939_v38  ;;  %v9415_v9 = vrot.slane %v2190_v15, %v8812_v13 }
 0xf7b   :  { %v2119_v57 = vadd.f32 %v9384_v0, %v2100_v35  ;;  %v2118_v30 = vadd.f32 %v9381_v46, %v2099_v18 }
 0xf7c   :  { %v2121_v58 = vadd.f32 %v9384_v0, %v2102_v19  ;;  %v2120_v39 = vadd.f32 %v9381_v46, %v2101_v6  ;;  %v9418_v0 = vrot.slane %v2190_v15, %v8942_v55 }
 0xf7e   :  { %v2189_v37 = vpack.c.bf16 %v2121_v58, %v2119_v57  ;;  %v2188_v42 = vpack.c.bf16 %v2120_v39, %v2118_v30 }
 0xf80   :  { %2574 = vmatprep.mubr.bf16.mxu1 %v2189_v37  ;;  %2627 = vmatprep.mubr.bf16.mxu0 %v2189_v37 }
 0xf81   :  { %2575 = vmatmul.mubr.bf16.gmra.mrb[20].mxu1 %v2188_v42  ;;  %2628 = vmatmul.mubr.bf16.gmra.mrb[60].mxu0 %v2188_v42 }
 0xfc2   :  { %v2566_v46 = vpop.f32.mrb[16].mxu1  ;;  %v2619_v62 = vpop.f32.mrb[56].mxu0 }
 0xfc3   :  { %v9421_v44 = vadd.f32 %v2566_v46, %v9409_v17  ;;  %v9424_v32 = vadd.f32 %v2619_v62, %v9412_v4  ;;  %v2568_v48 = vpop.f32.mrb[17].mxu1  ;;  %v2621_v8 = vpop.f32.mrb[57].mxu0 }
 0xfc4   :  { %v9427_v56 = vadd.f32 %v2568_v48, %v9415_v9  ;;  %v9430_v36 = vadd.f32 %v2621_v8, %v9418_v0  ;;  %v2570_v21 = vpop.f32.mrb[18].mxu1  ;;  %v2623_v24 = vpop.f32.mrb[58].mxu0 }
 0xfc5   :  { %v2638_v27 = vmul.f32 %v9421_v44, %v9421_v44  ;;  %v2640_v5 = vmul.f32 %v9424_v32, %v9424_v32  ;;  %v9437_v45 = vadd.f32 %v2570_v21, %v9409_v17  ;;  %v9440_v22 = vadd.f32 %v2623_v24, %v9412_v4  ;;  %v2572_v29 = vpop.f32.mrb[19].mxu1  ;;  %v2625_v47 = vpop.f32.mrb[59].mxu0 }
 0xfc6   :  { %v2639_v51 = vmul.f32 %v9427_v56, %v9427_v56  ;;  %v2641_v25 = vmul.f32 %v9430_v36, %v9430_v36  ;;  %v9447_v63 = vadd.f32 %v2572_v29, %v9415_v9  ;;  %v9450_v7 = vadd.f32 %v2625_v47, %v9418_v0 }
 0xfc7   :  { %v2654_v59 = vmul.f32 %v2638_v27, %v9421_v44  ;;  %v2656_v49 = vmul.f32 %v2640_v5, %v9424_v32  ;;  %v2642_v28 = vmul.f32 %v9437_v45, %v9437_v45  ;;  %v2644_v20 = vmul.f32 %v9440_v22, %v9440_v22 }
 0xfc8   :  { %v2655_v53 = vmul.f32 %v2639_v51, %v9427_v56  ;;  %v2657_v43 = vmul.f32 %v2641_v25, %v9430_v36  ;;  %v2643_v26 = vmul.f32 %v9447_v63, %v9447_v63  ;;  %v2645_v1 = vmul.f32 %v9450_v7, %v9450_v7 }
 0xfc9   :  { %v2670_v3 = vmul.f32 0.044715, %v2654_v59  ;;  %v2672_v40 = vmul.f32 0.044715, %v2656_v49  ;;  %v2658_v34 = vmul.f32 %v2642_v28, %v9437_v45  ;;  %v2660_v52 = vmul.f32 %v2644_v20, %v9440_v22 }
 0xfca   :  { %v2671_v33 = vmul.f32 0.044715, %v2655_v53  ;;  %v2673_v35 = vmul.f32 0.044715, %v2657_v43  ;;  %v2659_v18 = vmul.f32 %v2643_v26, %v9447_v63  ;;  %v2661_v19 = vmul.f32 %v2645_v1, %v9450_v7 }
 0xfcb   :  { %v2686_v6 = vadd.f32 %v2670_v3, %v9421_v44  ;;  %v2688_v57 = vadd.f32 %v2672_v40, %v9424_v32  ;;  %v2674_v58 = vmul.f32 0.044715, %v2658_v34  ;;  %v2676_v30 = vmul.f32 0.044715, %v2660_v52 }
 0xfcc   :  { %v2687_v39 = vadd.f32 %v2671_v33, %v9427_v56  ;;  %v2689_v37 = vadd.f32 %v2673_v35, %v9430_v36  ;;  %v2675_v42 = vmul.f32 0.044715, %v2659_v18  ;;  %v2677_v15 = vmul.f32 0.044715, %v2661_v19 }
 0xfcd   :  { %v2702_v46 = vmul.f32 0.7978846, %v2686_v6  ;;  %v2704_v62 = vmul.f32 0.7978846, %v2688_v57  ;;  %v2690_v48 = vadd.f32 %v2674_v58, %v9437_v45  ;;  %v2692_v8 = vadd.f32 %v2676_v30, %v9440_v22 }
 0xfce   :  { %v2703_v21 = vmul.f32 0.7978846, %v2687_v39  ;;  %v2705_v24 = vmul.f32 0.7978846, %v2689_v37  ;;  %v2691_v27 = vadd.f32 %v2675_v42, %v9447_v63  ;;  %v2693_v5 = vadd.f32 %v2677_v15, %v9450_v7 }
 0xfcf   :  { %7963 = vtanh.f32 %v2702_v46  ;;  %v2706_v29 = vmul.f32 0.7978846, %v2690_v48  ;;  %v2708_v47 = vmul.f32 0.7978846, %v2692_v8 }
 0xfd0   :  { %7965 = vtanh.f32 %v2704_v62  ;;  %v2707_v51 = vmul.f32 0.7978846, %v2691_v27  ;;  %v2709_v25 = vmul.f32 0.7978846, %v2693_v5 }
 0xfd1   :  { %7967 = vtanh.f32 %v2703_v21 }
 0xfd2   :  { %7969 = vtanh.f32 %v2705_v24 }
 0xfd3   :  { %7971 = vtanh.f32 %v2706_v29  ;;  %v7483_v29 = vld [vmem:[#allocation21 + $0x100] ss:$8 sps:$4 sm:$0xff]  }
 0xfd4   :  { %7973 = vtanh.f32 %v2708_v47  ;;  %v7488_v47 = vld [vmem:[#allocation21 + $0x114] ss:$8 sps:$4 sm:$0xff]  }
 0xfd5   :  { %7975 = vtanh.f32 %v2707_v51  ;;  %v7489_v51 = vld [vmem:[#allocation21 + $0x120] ss:$8 sps:$4 sm:$0xff]  }
 0xfd6   :  { %7977 = vtanh.f32 %v2709_v25  ;;  %v7492_v25 = vld [vmem:[#allocation21 + $0x130] ss:$8 sps:$4 sm:$0xff]  }
 0xfd9   :  { %v7964_v59 = vpop.eup %7963 }
 0xfda   :  { %v7966_v49 = vpop.eup %7965  ;;  %v2734_v28 = vadd.f32 1.0, %v7964_v59  ;;  %v7495_v59 = vld [vmem:[#allocation21 + $0x140] ss:$8 sps:$4 sm:$0xff]  }
 0xfdb   :  { %v7968_v20 = vpop.eup %7967  ;;  %v2736_v53 = vadd.f32 1.0, %v7966_v49  ;;  %v7500_v49 = vld [vmem:[#allocation21 + $0x154] ss:$8 sps:$4 sm:$0xff]  }
 0xfdc   :  { %v7970_v43 = vpop.eup %7969  ;;  %v2735_v26 = vadd.f32 1.0, %v7968_v20  ;;  %v2750_v34 = vmul.f32 0.5, %v2734_v28  ;;  %v7498_v28 = vld [vmem:[#allocation21 + $0x150] ss:$8 sps:$4 sm:$0xff]   ;;  %v7503_v20 = vld [vmem:[#allocation21 + $0x164] ss:$8 sps:$4 sm:$0xff]  }
 0xfdd   :  { %v7972_v1 = vpop.eup %7971  ;;  %v2737_v3 = vadd.f32 1.0, %v7970_v43  ;;  %v2752_v35 = vmul.f32 0.5, %v2736_v53  ;;  %v7501_v53 = vld [vmem:[#allocation21 + $0x160] ss:$8 sps:$4 sm:$0xff]   ;;  %v7506_v43 = vld [vmem:[#allocation21 + $0x174] ss:$8 sps:$4 sm:$0xff]  }
 0xfde   :  { %v7974_v40 = vpop.eup %7973  ;;  %v2738_v52 = vadd.f32 1.0, %v7972_v1  ;;  %v2751_v58 = vmul.f32 0.5, %v2735_v26  ;;  %v2766_v42 = vmul.f32 %v2750_v34, %v9421_v44  ;;  %v7504_v26 = vld [vmem:[#allocation21 + $0x170] ss:$8 sps:$4 sm:$0xff]   ;;  %v7509_v1 = vld [vmem:[#allocation21 + $0x184] ss:$8 sps:$4 sm:$0xff]  }
 0xfdf   :  { %v7976_v33 = vpop.eup %7975  ;;  %v2740_v18 = vadd.f32 1.0, %v7974_v40  ;;  %v2753_v37 = vmul.f32 0.5, %v2737_v3  ;;  %v9479_v62 = vmul.f32 %v2752_v35, %v9424_v32  ;;  %v7507_v3 = vld [vmem:[#allocation21 + $0x180] ss:$8 sps:$4 sm:$0xff]   ;;  %v7512_v40 = vld [vmem:[#allocation21 + $0x194] ss:$8 sps:$4 sm:$0xff]  }
 0xfe0   :  { %v7978_v19 = vpop.eup %7977  ;;  %v2754_v6 = vmul.f32 0.5, %v2738_v52  ;;  %v2739_v57 = vadd.f32 1.0, %v7976_v33  ;;  %v2767_v24 = vmul.f32 %v2751_v58, %v9427_v56  ;;  %v7486_v56 = vld [vmem:[#allocation21 + $0x110] ss:$8 sps:$4 sm:$0xff]   ;;  %v7515_v52 = vld [vmem:[#allocation21 + $0x1a4] ss:$8 sps:$4 sm:$0xff]  }
 0xfe1   :  { %v2756_v30 = vmul.f32 0.5, %v2740_v18  ;;  %v2741_v39 = vadd.f32 1.0, %v7978_v19  ;;  %v9489_v44 = vmul.f32 %v2753_v37, %v9430_v36  ;;  %v7494_v36 = vld [vmem:[#allocation21 + $0x134] ss:$8 sps:$4 sm:$0xff]   ;;  %v7510_v34 = vld [vmem:[#allocation21 + $0x190] ss:$8 sps:$4 sm:$0xff]  }
 0xfe2   :  { %v2770_v15 = vmul.f32 %v2754_v6, %v9437_v45  ;;  %v2755_v46 = vmul.f32 0.5, %v2739_v57  ;;  %v7513_v33 = vld [vmem:[#allocation21 + $0x1a0] ss:$8 sps:$4 sm:$0xff]   ;;  %v7518_v35 = vld [vmem:[#allocation21 + $0x1b4] ss:$8 sps:$4 sm:$0xff]  }
 0xfe3   :  { %v9482_v48 = vmul.f32 %v2756_v30, %v9440_v22  ;;  %v2757_v8 = vmul.f32 0.5, %v2741_v39  ;;  %v7516_v18 = vld [vmem:[#allocation21 + $0x1b0] ss:$8 sps:$4 sm:$0xff]   ;;  %v7521_v19 = vld [vmem:[#allocation21 + $0x1c4] ss:$8 sps:$4 sm:$0xff]  }
 0xfe4   :  { %v2846_v21 = vpack.c.bf16 %v2770_v15, %v2766_v42  ;;  %v2771_v27 = vmul.f32 %v2755_v46, %v9447_v63  ;;  %v7491_v63 = vld [vmem:[#allocation21 + $0x124] ss:$8 sps:$4 sm:$0xff]   ;;  %v7519_v6 = vld [vmem:[#allocation21 + $0x1c0] ss:$8 sps:$4 sm:$0xff]   ;;  %v7524_v57 = vld [vmem:[#allocation21 + $0x1d4] ss:$8 sps:$4 sm:$0xff]  }
 0xfe5   :  { %v2848_v5 = vpack.c.bf16 %v9482_v48, %v9479_v62  ;;  %v9492_v45 = vmul.f32 %v2757_v8, %v9450_v7  ;;  %v7497_v7 = vld [vmem:[#allocation21 + $0x144] ss:$8 sps:$4 sm:$0xff]   ;;  %v7522_v58 = vld [vmem:[#allocation21 + $0x1d0] ss:$8 sps:$4 sm:$0xff]   ;;  %v7525_v39 = vld [vmem:[#allocation21 + $0x1e0] ss:$8 sps:$4 sm:$0xff]  }
 0xfe6   :  { %v2847_v32 = vpack.c.bf16 %v2771_v27, %v2767_v24  ;;  %v7527_v30 = vld [vmem:[#allocation21 + $0x1e4] ss:$8 sps:$4 sm:$0xff]   ;;  %v7530_v37 = vld [vmem:[#allocation21 + $0x1f4] ss:$8 sps:$4 sm:$0xff]   ;;  %v7528_v42 = vld [vmem:[#allocation21 + $0x1f0] ss:$8 sps:$4 sm:$0xff]  }
 0xfe7   :  { %v2849_v22 = vpack.c.bf16 %v9492_v45, %v9489_v44 }
 0xfe8   :  { %3206 = vmatprep.mubr.bf16.mxu1 %v2847_v32 }
 0xfe9   :  { %3207 = vmatmul.mubr.bf16.vlgmr.msra.gmra.mrb[24].mxu1 %v2846_v21 }
 0xfea   :  { %3228 = vmatpush1.bf16.msra.mxu1 %v7483_v29 }
 0xfeb   :  { %3229 = vmatprep.subr.bf16.mxu1 %v7488_v47 }
 0xfee   :  { %3230 = vmatpush1.bf16.msra.mxu1 %v7486_v56 }
 0xfef   :  { %3231 = vmatprep.subr.bf16.mxu1 %v7491_v63 }
 0xff2   :  { %3232 = vmatpush1.bf16.msra.mxu1 %v7489_v51 }
 0xff3   :  { %3233 = vmatprep.subr.bf16.mxu1 %v7494_v36 }
 0xff6   :  { %3234 = vmatpush1.bf16.msra.mxu1 %v7492_v25 }
 0xff7   :  { %3235 = vmatprep.subr.bf16.mxu1 %v7497_v7 }
 0xffa   :  { %3236 = vmatpush1.bf16.msra.mxu1 %v7495_v59 }
 0xffb   :  { %3237 = vmatprep.subr.bf16.mxu1 %v7500_v49 }
 0xffe   :  { %3238 = vmatpush1.bf16.msra.mxu1 %v7498_v28 }
 0xfff   :  { %3239 = vmatprep.subr.bf16.mxu1 %v7503_v20 }
0x1002   :  { %3240 = vmatpush1.bf16.msra.mxu1 %v7501_v53 }
0x1003   :  { %3241 = vmatprep.subr.bf16.mxu1 %v7506_v43 }
0x1006   :  { %3242 = vmatpush1.bf16.msra.mxu1 %v7504_v26 }
0x1007   :  { %3243 = vmatprep.subr.bf16.mxu1 %v7509_v1 }
0x100a   :  { %3244 = vmatpush1.bf16.msra.mxu1 %v7507_v3 }
0x100b   :  { %3245 = vmatprep.subr.bf16.mxu1 %v7512_v40 }
0x100e   :  { %3246 = vmatpush1.bf16.msra.mxu1 %v7510_v34 }
0x100f   :  { %3247 = vmatprep.subr.bf16.mxu1 %v7515_v52 }
0x1012   :  { %3248 = vmatpush1.bf16.msra.mxu1 %v7513_v33 }
0x1013   :  { %3249 = vmatprep.subr.bf16.mxu1 %v7518_v35 }
0x1016   :  { %3250 = vmatpush1.bf16.msra.mxu1 %v7516_v18 }
0x1017   :  { %3251 = vmatprep.subr.bf16.mxu1 %v7521_v19 }
0x101a   :  { %3252 = vmatpush1.bf16.msra.mxu1 %v7519_v6 }
0x101b   :  { %3253 = vmatprep.subr.bf16.mxu1 %v7524_v57 }
0x101e   :  { %3254 = vmatpush1.bf16.msra.mxu1 %v7522_v58 }
0x101f   :  { %3255 = vmatprep.subr.bf16.mxu1 %v7527_v30 }
0x1022   :  { %3256 = vmatpush1.bf16.msra.mxu1 %v7525_v39 }
0x1023   :  { %3257 = vmatprep.subr.bf16.mxu1 %v7530_v37 }
0x1026   :  { %3258 = vmatpush1.bf16.msra.mxu1 %v7528_v42 }
0x1054   :  { %v2576_v15 = vpop.f32.mrb[20].mxu1  ;;  %v2629_v46 = vpop.f32.mrb[60].mxu0 }
0x1055   :  { %v9497_v8 = vadd.f32 %v2576_v15, %v9409_v17  ;;  %v9500_v21 = vadd.f32 %v2629_v46, %v9412_v4  ;;  %v2578_v24 = vpop.f32.mrb[21].mxu1  ;;  %v2631_v27 = vpop.f32.mrb[61].mxu0 }
0x1056   :  { %v9503_v32 = vadd.f32 %v2578_v24, %v9415_v9  ;;  %v9506_v29 = vadd.f32 %v2631_v27, %v9418_v0  ;;  %v2580_v47 = vpop.f32.mrb[22].mxu1  ;;  %v2633_v56 = vpop.f32.mrb[62].mxu0 }
0x1057   :  { %v2646_v63 = vmul.f32 %v9497_v8, %v9497_v8  ;;  %v2648_v51 = vmul.f32 %v9500_v21, %v9500_v21  ;;  %v9513_v36 = vadd.f32 %v2580_v47, %v9409_v17  ;;  %v9516_v25 = vadd.f32 %v2633_v56, %v9412_v4  ;;  %v2582_v7 = vpop.f32.mrb[23].mxu1  ;;  %v2635_v59 = vpop.f32.mrb[63].mxu0 }
0x1058   :  { %v2647_v49 = vmul.f32 %v9503_v32, %v9503_v32  ;;  %v2649_v28 = vmul.f32 %v9506_v29, %v9506_v29  ;;  %v9523_v20 = vadd.f32 %v2582_v7, %v9415_v9  ;;  %v9526_v53 = vadd.f32 %v2635_v59, %v9418_v0 }
0x1059   :  { %v2662_v17 = vmul.f32 %v2646_v63, %v9497_v8  ;;  %v2664_v43 = vmul.f32 %v2648_v51, %v9500_v21  ;;  %v2650_v4 = vmul.f32 %v9513_v36, %v9513_v36  ;;  %v2652_v26 = vmul.f32 %v9516_v25, %v9516_v25 }
0x105a   :  { %v2663_v1 = vmul.f32 %v2647_v49, %v9503_v32  ;;  %v2665_v3 = vmul.f32 %v2649_v28, %v9506_v29  ;;  %v2651_v9 = vmul.f32 %v9523_v20, %v9523_v20  ;;  %v2653_v0 = vmul.f32 %v9526_v53, %v9526_v53 }
0x105b   :  { %v2678_v40 = vmul.f32 0.044715, %v2662_v17  ;;  %v2680_v34 = vmul.f32 0.044715, %v2664_v43  ;;  %v2666_v52 = vmul.f32 %v2650_v4, %v9513_v36  ;;  %v2668_v33 = vmul.f32 %v2652_v26, %v9516_v25 }
0x105c   :  { %v2679_v35 = vmul.f32 0.044715, %v2663_v1  ;;  %v2681_v18 = vmul.f32 0.044715, %v2665_v3  ;;  %v2667_v19 = vmul.f32 %v2651_v9, %v9523_v20  ;;  %v2669_v6 = vmul.f32 %v2653_v0, %v9526_v53 }
0x105d   :  { %v2694_v57 = vadd.f32 %v2678_v40, %v9497_v8  ;;  %v2696_v58 = vadd.f32 %v2680_v34, %v9500_v21  ;;  %v2682_v30 = vmul.f32 0.044715, %v2666_v52  ;;  %v2684_v39 = vmul.f32 0.044715, %v2668_v33 }
0x105e   :  { %v2695_v37 = vadd.f32 %v2679_v35, %v9503_v32  ;;  %v2697_v42 = vadd.f32 %v2681_v18, %v9506_v29  ;;  %v2683_v15 = vmul.f32 0.044715, %v2667_v19  ;;  %v2685_v46 = vmul.f32 0.044715, %v2669_v6 }
0x105f   :  { %v2710_v24 = vmul.f32 0.7978846, %v2694_v57  ;;  %v2712_v27 = vmul.f32 0.7978846, %v2696_v58  ;;  %v2698_v47 = vadd.f32 %v2682_v30, %v9513_v36  ;;  %v2700_v56 = vadd.f32 %v2684_v39, %v9516_v25 }
0x1060   :  { %v2711_v63 = vmul.f32 0.7978846, %v2695_v37  ;;  %v2713_v51 = vmul.f32 0.7978846, %v2697_v42  ;;  %v2699_v7 = vadd.f32 %v2683_v15, %v9523_v20  ;;  %v2701_v59 = vadd.f32 %v2685_v46, %v9526_v53 }
0x1061   :  { %7979 = vtanh.f32 %v2710_v24  ;;  %v2714_v49 = vmul.f32 0.7978846, %v2698_v47  ;;  %v2716_v28 = vmul.f32 0.7978846, %v2700_v56 }
0x1062   :  { %7981 = vtanh.f32 %v2712_v27  ;;  %v2715_v17 = vmul.f32 0.7978846, %v2699_v7  ;;  %v2717_v43 = vmul.f32 0.7978846, %v2701_v59 }
0x1063   :  { %7983 = vtanh.f32 %v2711_v63 }
0x1064   :  { %7985 = vtanh.f32 %v2713_v51 }
0x1065   :  { %7987 = vtanh.f32 %v2714_v49 }
0x1066   :  { %7989 = vtanh.f32 %v2716_v28 }
0x1067   :  { %7991 = vtanh.f32 %v2715_v17 }
0x1068   :  { %7993 = vtanh.f32 %v2717_v43 }
0x106b   :  { %v7980_v4 = vpop.eup %7979 }
0x106c   :  { %v7982_v26 = vpop.eup %7981  ;;  %v2742_v1 = vadd.f32 1.0, %v7980_v4 }
0x106d   :  { %v7984_v3 = vpop.eup %7983  ;;  %v2744_v9 = vadd.f32 1.0, %v7982_v26 }
0x106e   :  { %v7986_v0 = vpop.eup %7985  ;;  %v2743_v40 = vadd.f32 1.0, %v7984_v3  ;;  %v2758_v18 = vmul.f32 0.5, %v2742_v1 }
0x106f   :  { %v7988_v34 = vpop.eup %7987  ;;  %v2745_v52 = vadd.f32 1.0, %v7986_v0  ;;  %v2760_v57 = vmul.f32 0.5, %v2744_v9 }
0x1070   :  { %v7990_v33 = vpop.eup %7989  ;;  %v2746_v35 = vadd.f32 1.0, %v7988_v34  ;;  %v2759_v39 = vmul.f32 0.5, %v2743_v40  ;;  %v2774_v27 = vmul.f32 %v2758_v18, %v9497_v8  ;;  %v3288_v8 = vld [vmem:[#allocation23] sm:$0x3] }
0x1071   :  { %v7992_v19 = vpop.eup %7991  ;;  %v2748_v6 = vadd.f32 1.0, %v7990_v33  ;;  %v2761_v15 = vmul.f32 0.5, %v2745_v52  ;;  %v2776_v63 = vmul.f32 %v2760_v57, %v9500_v21  ;;  %v3293_v21 = vrot.slane %v3288_v8, %v8809_v11  ;;  %v7533_v57 = vld [vmem:[#allocation11 + $0x304] ss:$24 sps:$4 sm:$0xff]  }
0x1072   :  { %v7994_v58 = vpop.eup %7993  ;;  %v2747_v30 = vadd.f32 1.0, %v7992_v19  ;;  %v2762_v37 = vmul.f32 0.5, %v2746_v35  ;;  %v2775_v7 = vmul.f32 %v2759_v39, %v9503_v32  ;;  %4028 = vmatprep.subr.bf16.mxu0 %v7533_v57  ;;  %v7542_v39 = vld [vmem:[#allocation11 + $0x344] ss:$24 sps:$4 sm:$0xff]  }
0x1073   :  { %v2749_v42 = vadd.f32 1.0, %v7994_v58  ;;  %v2764_v46 = vmul.f32 0.5, %v2748_v6  ;;  %v2777_v28 = vmul.f32 %v2761_v15, %v9506_v29  ;;  %v3297_v29 = vrot.slane %v3288_v8, %v8812_v13  ;;  %v7531_v6 = vld [vmem:[#allocation11 + $0x300] ss:$24 sps:$4 sm:$0xff]   ;;  %v7536_v58 = vld [vmem:[#allocation11 + $0x314] ss:$24 sps:$4 sm:$0xff]  }
0x1074   :  { %v2763_v24 = vmul.f32 0.5, %v2747_v30  ;;  %v2778_v47 = vmul.f32 %v2762_v37, %v9513_v36  ;;  %v7539_v30 = vld [vmem:[#allocation11 + $0x334] ss:$24 sps:$4 sm:$0xff]   ;;  %4029 = vmatpush1.bf16.msra.mxu0 %v7531_v6  ;;  %4134 = vmatprep.subr.bf16.mxu1 %v7536_v58  ;;  %v7540_v37 = vld [vmem:[#allocation11 + $0x340] ss:$24 sps:$4 sm:$0xff]  }
0x1075   :  { %v2765_v56 = vmul.f32 0.5, %v2749_v42  ;;  %v2780_v51 = vmul.f32 %v2764_v46, %v9516_v25  ;;  %4030 = vmatprep.subr.bf16.mxu0 %v7539_v30  ;;  %v7545_v42 = vld [vmem:[#allocation11 + $0x364] ss:$24 sps:$4 sm:$0xff]   ;;  %v7548_v15 = vld [vmem:[#allocation11 + $0x374] ss:$24 sps:$4 sm:$0xff]  }
0x1076   :  { %v2779_v59 = vmul.f32 %v2763_v24, %v9523_v20  ;;  %v2850_v49 = vpack.c.bf16 %v2778_v47, %v2774_v27  ;;  %v7543_v46 = vld [vmem:[#allocation11 + $0x360] ss:$24 sps:$4 sm:$0xff]   ;;  %v7546_v24 = vld [vmem:[#allocation11 + $0x370] ss:$24 sps:$4 sm:$0xff]   ;;  %v7551_v27 = vld [vmem:[#allocation11 + $0x394] ss:$24 sps:$4 sm:$0xff]  }
0x1077   :  { %v2781_v17 = vmul.f32 %v2765_v56, %v9526_v53  ;;  %v2852_v43 = vpack.c.bf16 %v2780_v51, %v2776_v63  ;;  %v7554_v47 = vld [vmem:[#allocation11 + $0x3a4] ss:$24 sps:$4 sm:$0xff]   ;;  %v7549_v56 = vld [vmem:[#allocation11 + $0x390] ss:$24 sps:$4 sm:$0xff]   ;;  %v7552_v63 = vld [vmem:[#allocation11 + $0x3a0] ss:$24 sps:$4 sm:$0xff]  }
0x1078   :  { %v2851_v4 = vpack.c.bf16 %v2779_v59, %v2775_v7  ;;  %v7557_v51 = vld [vmem:[#allocation11 + $0x3c4] ss:$24 sps:$4 sm:$0xff]   ;;  %v7560_v7 = vld [vmem:[#allocation11 + $0x3d4] ss:$24 sps:$4 sm:$0xff]   ;;  %v7555_v59 = vld [vmem:[#allocation11 + $0x3c0] ss:$24 sps:$4 sm:$0xff]  }
0x1079   :  { %v2853_v26 = vpack.c.bf16 %v2781_v17, %v2777_v28  ;;  %v7563_v28 = vld [vmem:[#allocation11 + $0x3f4] ss:$24 sps:$4 sm:$0xff]   ;;  %v7566_v17 = vld [vmem:[#allocation11 + $0x404] ss:$24 sps:$4 sm:$0xff]  }
0x107a   :  { %3216 = vmatprep.mubr.bf16.mxu1 %v2851_v4  ;;  %v7564_v4 = vld [vmem:[#allocation11 + $0x400] ss:$24 sps:$4 sm:$0xff]   ;;  %v7572_v8 = vld [vmem:[#allocation11 + $0x434] ss:$24 sps:$4 sm:$0xff]  }
0x107b   :  { %3217 = vmatmul.mubr.bf16.gmra.mrb[28].mxu1 %v2850_v49  ;;  %v7558_v49 = vld [vmem:[#allocation11 + $0x3d0] ss:$24 sps:$4 sm:$0xff]  }
0x107c   :  { %3259 = vmatprep.mubr.bf16.mxu1 %v2849_v22 }
0x1083   :  { %3260 = vmatmul.mubr.bf16.vlgmr.msra.gmra.mrb[24].mxu1 %v2848_v5 }
0x1084   :  { %3269 = vmatprep.mubr.bf16.mxu1 %v2853_v26  ;;  %v7569_v26 = vld [vmem:[#allocation11 + $0x424] ss:$24 sps:$4 sm:$0xff]  }
0x108b   :  { %3270 = vmatmul.mubr.bf16.gmra.mrb[28].mxu1 %v2852_v43  ;;  %v7561_v43 = vld [vmem:[#allocation11 + $0x3f0] ss:$24 sps:$4 sm:$0xff]  }
0x1156   :  { %v3261_v32 = vpop.f32.mrb[24].mxu1 }
0x1157   :  { %v3280_v36 = vadd.f32 %v3261_v32, %v9103_v2  ;;  %v3263_v25 = vpop.f32.mrb[25].mxu1  ;;  %v7570_v32 = vld [vmem:[#allocation11 + $0x430] ss:$24 sps:$4 sm:$0xff]  }
0x1158   :  { %v3281_v20 = vadd.f32 %v3263_v25, %v9107_v50  ;;  %v3265_v53 = vpop.f32.mrb[26].mxu1  ;;  %v7573_v25 = vld [vmem:[#allocation11 + $0x450] ss:$24 sps:$4 sm:$0xff]  }
0x1159   :  { %v9570_v44 = vadd.f32 %v3293_v21, %v3280_v36  ;;  %v3282_v45 = vadd.f32 %v3265_v53, %v9111_v12  ;;  %v3267_v62 = vpop.f32.mrb[27].mxu1  ;;  %v7578_v36 = vld [vmem:[#allocation11 + $0x464] ss:$24 sps:$4 sm:$0xff]  }
0x115a   :  { %v9573_v48 = vadd.f32 %v3297_v29, %v3281_v20  ;;  %v3283_v5 = vadd.f32 %v3267_v62, %v9114_v23  ;;  %v7576_v20 = vld [vmem:[#allocation11 + $0x460] ss:$24 sps:$4 sm:$0xff]   ;;  %v7581_v53 = vld [vmem:[#allocation11 + $0x484] ss:$24 sps:$4 sm:$0xff]  }
0x115b   :  { %v9576_v22 = vadd.f32 %v3293_v21, %v3282_v45  ;;  %v7584_v45 = vld [vmem:[#allocation11 + $0x494] ss:$24 sps:$4 sm:$0xff]   ;;  %v7579_v62 = vld [vmem:[#allocation11 + $0x480] ss:$24 sps:$4 sm:$0xff]  }
0x115c   :  { %v9578_v1 = vadd.f32 %v3297_v29, %v3283_v5  ;;  %v3312_v2 = vadd.f32 %v9573_v48, %v9570_v44  ;;  %v7582_v5 = vld [vmem:[#allocation11 + $0x490] ss:$24 sps:$4 sm:$0xff]  }
0x115e   :  { %3313 = vadd.xlane.f32.xlu0 %v3312_v2  ;;  %v3271_v3 = vpop.f32.mrb[28].mxu1  ;;  %v3315_v50 = vadd.f32 %v9578_v1, %v9576_v22  ;;  %v7587_v2 = vld [vmem:[#allocation11 + $0x4b4] ss:$24 sps:$4 sm:$0xff]  }
0x115f   :  { %v3284_v9 = vadd.f32 %v3271_v3, %v9237_v31  ;;  %v3273_v12 = vpop.f32.mrb[29].mxu1  ;;  %v7590_v3 = vld [vmem:[#allocation11 + $0x4c4] ss:$24 sps:$4 sm:$0xff]  }
0x1160   :  { %v3285_v0 = vadd.f32 %v3273_v12, %v9247_v14  ;;  %3316 = vadd.xlane.f32.xlu1 %v3315_v50  ;;  %v3275_v40 = vpop.f32.mrb[30].mxu1  ;;  %v7585_v50 = vld [vmem:[#allocation11 + $0x4b0] ss:$24 sps:$4 sm:$0xff]  }
0x1161   :  { %v9586_v23 = vadd.f32 %v3293_v21, %v3284_v9  ;;  %v3286_v34 = vadd.f32 %v3275_v40, %v9251_v41  ;;  %v3277_v52 = vpop.f32.mrb[31].mxu1  ;;  %v7534_v41 = vld [vmem:[#allocation11 + $0x310] ss:$24 sps:$4 sm:$0xff]   ;;  %v7588_v9 = vld [vmem:[#allocation11 + $0x4c0] ss:$24 sps:$4 sm:$0xff]  }
0x1162   :  { %v9589_v33 = vadd.f32 %v3297_v29, %v3285_v0  ;;  %v3287_v35 = vadd.f32 %v3277_v52, %v9254_v16  ;;  %v7537_v16 = vld [vmem:[#allocation11 + $0x330] ss:$24 sps:$4 sm:$0xff]   ;;  %4135 = vmatpush1.bf16.msra.mxu1 %v7534_v41 }
0x1163   :  { %v9592_v18 = vadd.f32 %v3293_v21, %v3286_v34  ;;  %4136 = vmatprep.subr.bf16.mxu1 %v7542_v39  ;;  %4031 = vmatpush1.bf16.msra.mxu0 %v7537_v16  ;;  %v7567_v21 = vld [vmem:[#allocation11 + $0x420] ss:$24 sps:$4 sm:$0xff]  }
0x1164   :  { %v9594_v19 = vadd.f32 %v3297_v29, %v3287_v35  ;;  %v3318_v31 = vadd.f32 %v9589_v33, %v9586_v23  ;;  %4032 = vmatprep.subr.bf16.mxu0 %v7545_v42  ;;  %v7575_v29 = vld [vmem:[#allocation11 + $0x454] ss:$24 sps:$4 sm:$0xff]  }
0x1166   :  { %3319 = vadd.xlane.f32.xlu0 %v3318_v31  ;;  %v3321_v14 = vadd.f32 %v9594_v19, %v9592_v18  ;;  %4137 = vmatpush1.bf16.msra.mxu1 %v7540_v37 }
0x1167   :  { %4138 = vmatprep.subr.bf16.mxu1 %v7548_v15  ;;  %4033 = vmatpush1.bf16.msra.mxu0 %v7543_v46 }
0x1168   :  { %3322 = vadd.xlane.f32.xlu1 %v3321_v14  ;;  %4034 = vmatprep.subr.bf16.mxu0 %v7551_v27 }
0x116a   :  { %4139 = vmatpush1.bf16.msra.mxu1 %v7546_v24 }
0x116b   :  { %4140 = vmatprep.subr.bf16.mxu1 %v7554_v47  ;;  %4035 = vmatpush1.bf16.msra.mxu0 %v7549_v56 }
0x116c   :  { %4036 = vmatprep.subr.bf16.mxu0 %v7557_v51 }
0x116e   :  { %4141 = vmatpush1.bf16.msra.mxu1 %v7552_v63 }
0x116f   :  { %4142 = vmatprep.subr.bf16.mxu1 %v7560_v7  ;;  %4037 = vmatpush1.bf16.msra.mxu0 %v7555_v59 }
0x1170   :  { %4038 = vmatprep.subr.bf16.mxu0 %v7563_v28  ;;  %v7593_v28 = vld [vmem:[#allocation11 + $0x4e4] ss:$24 sps:$4 sm:$0xff]  }
0x1172   :  { %4143 = vmatpush1.bf16.msra.mxu1 %v7558_v49 }
0x1173   :  { %4144 = vmatprep.subr.bf16.mxu1 %v7566_v17  ;;  %4039 = vmatpush1.bf16.msra.mxu0 %v7561_v43  ;;  %v7591_v17 = vld [vmem:[#allocation11 + $0x4e0] ss:$24 sps:$4 sm:$0xff]   ;;  %v7596_v43 = vld [vmem:[#allocation11 + $0x4f4] ss:$24 sps:$4 sm:$0xff]  }
0x1174   :  { %4040 = vmatprep.subr.bf16.mxu0 %v7569_v26  ;;  %v7599_v26 = vld [vmem:[#allocation11 + $0x514] ss:$24 sps:$4 sm:$0xff]  }
0x1176   :  { %4145 = vmatpush1.bf16.msra.mxu1 %v7564_v4  ;;  %v7594_v4 = vld [vmem:[#allocation11 + $0x4f0] ss:$24 sps:$4 sm:$0xff]  }
0x1177   :  { %4146 = vmatprep.subr.bf16.mxu1 %v7572_v8  ;;  %4041 = vmatpush1.bf16.msra.mxu0 %v7567_v21  ;;  %v7597_v8 = vld [vmem:[#allocation11 + $0x510] ss:$24 sps:$4 sm:$0xff]   ;;  %v7602_v21 = vld [vmem:[#allocation11 + $0x524] ss:$24 sps:$4 sm:$0xff]  }
0x1178   :  { %4042 = vmatprep.subr.bf16.mxu0 %v7575_v29  ;;  %v7605_v29 = vld [vmem:[#allocation11 + $0x544] ss:$24 sps:$4 sm:$0xff]  }
0x117a   :  { %4147 = vmatpush1.bf16.msra.mxu1 %v7570_v32  ;;  %v7600_v32 = vld [vmem:[#allocation11 + $0x520] ss:$24 sps:$4 sm:$0xff]  }
0x117b   :  { %4148 = vmatprep.subr.bf16.mxu1 %v7578_v36  ;;  %4043 = vmatpush1.bf16.msra.mxu0 %v7573_v25  ;;  %v7603_v36 = vld [vmem:[#allocation11 + $0x540] ss:$24 sps:$4 sm:$0xff]   ;;  %v7608_v25 = vld [vmem:[#allocation11 + $0x554] ss:$24 sps:$4 sm:$0xff]  }
0x117c   :  { %4044 = vmatprep.subr.bf16.mxu0 %v7581_v53  ;;  %v7611_v53 = vld [vmem:[#allocation11 + $0x574] ss:$24 sps:$4 sm:$0xff]  }
0x117e   :  { %4149 = vmatpush1.bf16.msra.mxu1 %v7576_v20  ;;  %v7606_v20 = vld [vmem:[#allocation11 + $0x550] ss:$24 sps:$4 sm:$0xff]  }
0x117f   :  { %4150 = vmatprep.subr.bf16.mxu1 %v7584_v45  ;;  %4045 = vmatpush1.bf16.msra.mxu0 %v7579_v62  ;;  %v7609_v45 = vld [vmem:[#allocation11 + $0x570] ss:$24 sps:$4 sm:$0xff]   ;;  %v7614_v62 = vld [vmem:[#allocation11 + $0x584] ss:$24 sps:$4 sm:$0xff]  }
0x1180   :  { %4046 = vmatprep.subr.bf16.mxu0 %v7587_v2  ;;  %v7617_v2 = vld [vmem:[#allocation11 + $0x5a4] ss:$24 sps:$4 sm:$0xff]  }
0x1182   :  { %4151 = vmatpush1.bf16.msra.mxu1 %v7582_v5  ;;  %v7612_v5 = vld [vmem:[#allocation11 + $0x580] ss:$24 sps:$4 sm:$0xff]  }
0x1183   :  { %4152 = vmatprep.subr.bf16.mxu1 %v7590_v3  ;;  %4047 = vmatpush1.bf16.msra.mxu0 %v7585_v50  ;;  %v7615_v3 = vld [vmem:[#allocation11 + $0x5a0] ss:$24 sps:$4 sm:$0xff]   ;;  %v7620_v50 = vld [vmem:[#allocation11 + $0x5b4] ss:$24 sps:$4 sm:$0xff]  }
0x1184   :  { %4048 = vmatprep.subr.bf16.mxu0 %v7593_v28 }
0x1186   :  { %4153 = vmatpush1.bf16.msra.mxu1 %v7588_v9  ;;  %v7618_v9 = vld [vmem:[#allocation11 + $0x5b0] ss:$24 sps:$4 sm:$0xff]  }
0x1187   :  { %4049 = vmatpush1.bf16.msra.mxu0 %v7591_v17  ;;  %4154 = vmatprep.subr.bf16.mxu1 %v7596_v43 }
0x1188   :  { %4050 = vmatprep.subr.bf16.mxu0 %v7599_v26 }
0x118a   :  { %4155 = vmatpush1.bf16.msra.mxu1 %v7594_v4 }
0x118b   :  { %4051 = vmatpush1.bf16.msra.mxu0 %v7597_v8  ;;  %4156 = vmatprep.subr.bf16.mxu1 %v7602_v21 }
0x118c   :  { %4052 = vmatprep.subr.bf16.mxu0 %v7605_v29 }
0x118e   :  { %4157 = vmatpush1.bf16.msra.mxu1 %v7600_v32 }
0x118f   :  { %4053 = vmatpush1.bf16.msra.mxu0 %v7603_v36  ;;  %4158 = vmatprep.subr.bf16.mxu1 %v7608_v25 }
0x1190   :  { %4054 = vmatprep.subr.bf16.mxu0 %v7611_v53 }
0x1192   :  { %4159 = vmatpush1.bf16.msra.mxu1 %v7606_v20 }
0x1193   :  { %4055 = vmatpush1.bf16.msra.mxu0 %v7609_v45  ;;  %4160 = vmatprep.subr.bf16.mxu1 %v7614_v62 }
0x1194   :  { %4056 = vmatprep.subr.bf16.mxu0 %v7617_v2 }
0x1196   :  { %4161 = vmatpush1.bf16.msra.mxu1 %v7612_v5 }
0x1197   :  { %4057 = vmatpush1.bf16.msra.mxu0 %v7615_v3  ;;  %4162 = vmatprep.subr.bf16.mxu1 %v7620_v50 }
0x119a   :  { %4163 = vmatpush1.bf16.msra.mxu1 %v7618_v9 }
0x11eb   :  { %v3314_v12 = vpop.xlane.xlu0 %3313 }
0x11ec   :  { %v3324_v0 = vmul.f32 0.00390625, %v3314_v12  ;;  %v7621_v12 = vld [vmem:[#allocation11 + $0x5d0] ss:$24 sps:$4 sm:$0xff]  }
0x11ed   :  { %v3317_v40 = vpop.xlane.xlu1 %3316 }
0x11ee   :  { %v9601_v34 = vsub.f32 %v9570_v44, %v3324_v0  ;;  %v9604_v52 = vsub.f32 %v9573_v48, %v3324_v0  ;;  %v3325_v35 = vmul.f32 0.00390625, %v3317_v40  ;;  %v7623_v0 = vld [vmem:[#allocation11 + $0x5d4] ss:$24 sps:$4 sm:$0xff]   ;;  %v7624_v40 = vld [vmem:[#allocation11 + $0x5e0] ss:$24 sps:$4 sm:$0xff]  }
0x11ef   :  { %4058 = vmatprep.subr.bf16.mxu0 %v7623_v0 }
0x11f0   :  { %v9607_v31 = vsub.f32 %v9576_v22, %v3325_v35  ;;  %v9610_v14 = vsub.f32 %v9578_v1, %v3325_v35  ;;  %v3336_v6 = vmul.f32 %v9601_v34, %v9601_v34  ;;  %v3337_v57 = vmul.f32 %v9604_v52, %v9604_v52  ;;  %v7626_v35 = vld [vmem:[#allocation11 + $0x5e4] ss:$24 sps:$4 sm:$0xff]   ;;  %4059 = vmatpush1.bf16.msra.mxu0 %v7621_v12 }
0x11f1   :  { %4164 = vmatprep.subr.bf16.mxu1 %v7626_v35 }
0x11f2   :  { %v3344_v41 = vadd.f32 %v3337_v57, %v3336_v6  ;;  %v3338_v58 = vmul.f32 %v9607_v31, %v9607_v31  ;;  %v3339_v30 = vmul.f32 %v9610_v14, %v9610_v14  ;;  %4165 = vmatpush1.bf16.msra.mxu1 %v7624_v40  ;;  %v7629_v6 = vld [vmem:[#allocation11 + $0x30c] ss:$24 sps:$4 sm:$0xff]  }
0x11f3   :  { %v3320_v39 = vpop.xlane.xlu0 %3319  ;;  %7083 = vmatprep.subr.bf16.mxu1 %v8481_v54  ;;  %4081 = vmatprep.subr.bf16.mxu0 %v7629_v6 }
0x11f4   :  { %v3326_v16 = vmul.f32 0.00390625, %v3320_v39  ;;  %3345 = vadd.xlane.f32.xlu0 %v3344_v41  ;;  %v3347_v37 = vadd.f32 %v3339_v30, %v3338_v58 }
0x11f5   :  { %v3323_v42 = vpop.xlane.xlu1 %3322 }
0x11f6   :  { %v9621_v15 = vsub.f32 %v9586_v23, %v3326_v16  ;;  %v9624_v46 = vsub.f32 %v9589_v33, %v3326_v16  ;;  %v3327_v24 = vmul.f32 0.00390625, %v3323_v42  ;;  %3348 = vadd.xlane.f32.xlu1 %v3347_v37 }
0x11f8   :  { %v9627_v27 = vsub.f32 %v9592_v18, %v3327_v24  ;;  %v9630_v47 = vsub.f32 %v9594_v19, %v3327_v24  ;;  %v3340_v56 = vmul.f32 %v9621_v15, %v9621_v15  ;;  %v3341_v63 = vmul.f32 %v9624_v46, %v9624_v46 }
0x11fa   :  { %v3350_v51 = vadd.f32 %v3341_v63, %v3340_v56  ;;  %v3342_v7 = vmul.f32 %v9627_v27, %v9627_v27  ;;  %v3343_v59 = vmul.f32 %v9630_v47, %v9630_v47  ;;  %v6636_v56 = vld [vmem:[%s10302_s4 + $0x2] sm:$0x3] }
0x11fb   :  { %v3384_v28 = vrot.slane %v6636_v56, %v8812_v13 }
0x11fc   :  { %3351 = vadd.xlane.f32.xlu0 %v3350_v51  ;;  %v3353_v49 = vadd.f32 %v3343_v59, %v3342_v7  ;;  %v3380_v59 = vrot.slane %v6636_v56, %v8809_v11  ;;  %v7641_v56 = vld [vmem:[#allocation11 + $0x3cc] ss:$24 sps:$4 sm:$0xff]  }
0x11fe   :  { %3354 = vadd.xlane.f32.xlu1 %v3353_v49  ;;  %v3311_v49 = vld [vmem:[#allocation9 + $0x2] sm:$0x3] }
0x11ff   :  { %v3399_v8 = vrot.slane %v3311_v49, %v8809_v11  ;;  %v3403_v21 = vrot.slane %v3311_v49, %v8812_v13  ;;  %v7645_v49 = vld [vmem:[#allocation11 + $0x428] ss:$24 sps:$4 sm:$0xff]  }
0x1281   :  { %v3346_v57 = vpop.xlane.xlu0 %3345 }
0x1282   :  { %v3356_v41 = vmul.f32 0.00390625, %v3346_v57  ;;  %v7630_v57 = vld [vmem:[#allocation11 + $0x338] ss:$24 sps:$4 sm:$0xff]  }
0x1283   :  { %v3349_v58 = vpop.xlane.xlu1 %3348 }
0x1284   :  { %v3360_v30 = vadd.f32 1e-06, %v3356_v41  ;;  %v3357_v39 = vmul.f32 0.00390625, %v3349_v58 }
0x1286   :  { %7995 = vrsqrt.f32 %v3360_v30  ;;  %v3361_v16 = vadd.f32 1e-06, %v3357_v39 }
0x1288   :  { %7997 = vrsqrt.f32 %v3361_v16 }
0x1289   :  { %v3352_v37 = vpop.xlane.xlu0 %3351 }
0x128a   :  { %v3358_v42 = vmul.f32 0.00390625, %v3352_v37  ;;  %v7633_v37 = vld [vmem:[#allocation11 + $0x368] ss:$24 sps:$4 sm:$0xff]  }
0x128b   :  { %v3355_v24 = vpop.xlane.xlu1 %3354 }
0x128c   :  { %v3362_v63 = vadd.f32 1e-06, %v3358_v42  ;;  %v3359_v51 = vmul.f32 0.00390625, %v3355_v24  ;;  %v7638_v42 = vld [vmem:[#allocation11 + $0x39c] ss:$24 sps:$4 sm:$0xff]  }
0x128d   :  { %v7636_v24 = vld [vmem:[#allocation11 + $0x398] ss:$24 sps:$4 sm:$0xff]  }
0x128e   :  { %7999 = vrsqrt.f32 %v3362_v63  ;;  %v3363_v7 = vadd.f32 1e-06, %v3359_v51  ;;  %v7639_v63 = vld [vmem:[#allocation11 + $0x3c8] ss:$24 sps:$4 sm:$0xff]   ;;  %v7644_v51 = vld [vmem:[#allocation11 + $0x3fc] ss:$24 sps:$4 sm:$0xff]  }
0x1290   :  { %v7996_v17 = vpop.eup %7995  ;;  %8001 = vrsqrt.f32 %v3363_v7  ;;  %v7642_v7 = vld [vmem:[#allocation11 + $0x3f8] ss:$24 sps:$4 sm:$0xff]  }
0x1291   :  { %v3368_v43 = vmul.f32 %v7996_v17, %v9601_v34  ;;  %v3369_v4 = vmul.f32 %v7996_v17, %v9604_v52  ;;  %v7627_v52 = vld [vmem:[#allocation11 + $0x308] ss:$24 sps:$4 sm:$0xff]   ;;  %v7648_v17 = vld [vmem:[#allocation11 + $0x458] ss:$24 sps:$4 sm:$0xff]  }
0x1292   :  { %v7998_v26 = vpop.eup %7997 }
0x1293   :  { %v3387_v32 = vmul.f32 %v3380_v59, %v3368_v43  ;;  %v3370_v29 = vmul.f32 %v7998_v26, %v9607_v31  ;;  %v3371_v36 = vmul.f32 %v7998_v26, %v9610_v14  ;;  %v3388_v25 = vmul.f32 %v3384_v28, %v3369_v4  ;;  %v7632_v31 = vld [vmem:[#allocation11 + $0x33c] ss:$24 sps:$4 sm:$0xff]   ;;  %v7653_v43 = vld [vmem:[#allocation11 + $0x48c] ss:$24 sps:$4 sm:$0xff]   ;;  %v7651_v4 = vld [vmem:[#allocation11 + $0x488] ss:$24 sps:$4 sm:$0xff]  }
0x1294   :  { %v7656_v26 = vld [vmem:[#allocation11 + $0x4bc] ss:$24 sps:$4 sm:$0xff]  }
0x1295   :  { %v3389_v20 = vmul.f32 %v3380_v59, %v3370_v29  ;;  %v3390_v53 = vmul.f32 %v3384_v28, %v3371_v36  ;;  %v3407_v45 = vadd.f32 %v3403_v21, %v3388_v25  ;;  %v3406_v5 = vadd.f32 %v3399_v8, %v3387_v32  ;;  %v7657_v32 = vld [vmem:[#allocation11 + $0x4e8] ss:$24 sps:$4 sm:$0xff]   ;;  %v7662_v29 = vld [vmem:[#allocation11 + $0x51c] ss:$24 sps:$4 sm:$0xff]   ;;  %v7660_v36 = vld [vmem:[#allocation11 + $0x518] ss:$24 sps:$4 sm:$0xff]  }
0x1296   :  { %v7665_v25 = vld [vmem:[#allocation11 + $0x54c] ss:$24 sps:$4 sm:$0xff]  }
0x1297   :  { %v3409_v62 = vadd.f32 %v3403_v21, %v3390_v53  ;;  %v3408_v2 = vadd.f32 %v3399_v8, %v3389_v20  ;;  %v7663_v20 = vld [vmem:[#allocation11 + $0x548] ss:$24 sps:$4 sm:$0xff]   ;;  %v7668_v53 = vld [vmem:[#allocation11 + $0x57c] ss:$24 sps:$4 sm:$0xff]  }
0x1298   :  { %v8000_v34 = vpop.eup %7999 }
0x1299   :  { %v3512_v3 = vpack.c.bf16 %v3409_v62, %v3407_v45  ;;  %v9652_v50 = vpack.c.bf16 %v3408_v2, %v3406_v5  ;;  %v3373_v9 = vmul.f32 %v8000_v34, %v9624_v46  ;;  %v3372_v12 = vmul.f32 %v8000_v34, %v9621_v15  ;;  %v7635_v15 = vld [vmem:[#allocation11 + $0x36c] ss:$24 sps:$4 sm:$0xff]   ;;  %v7666_v45 = vld [vmem:[#allocation11 + $0x578] ss:$24 sps:$4 sm:$0xff]   ;;  %v7669_v5 = vld [vmem:[#allocation11 + $0x5a8] ss:$24 sps:$4 sm:$0xff]  }
0x129a   :  { %v8002_v0 = vpop.eup %8001  ;;  %v7671_v62 = vld [vmem:[#allocation11 + $0x5ac] ss:$24 sps:$4 sm:$0xff]   ;;  %v7674_v2 = vld [vmem:[#allocation11 + $0x5dc] ss:$24 sps:$4 sm:$0xff]   ;;  %v7672_v34 = vld [vmem:[#allocation11 + $0x5d8] ss:$24 sps:$4 sm:$0xff]  }
0x129b   :  { %4060 = vmatprep.mubr.bf16.mxu0 %v3512_v3  ;;  %4166 = vmatprep.mubr.bf16.mxu1 %v3512_v3  ;;  %v3375_v14 = vmul.f32 %v8002_v0, %v9630_v47  ;;  %v3392_v40 = vmul.f32 %v3384_v28, %v3373_v9  ;;  %v3374_v35 = vmul.f32 %v8002_v0, %v9627_v27 }
0x129c   :  { %4061 = vmatmul.mubr.bf16.vlgmr.msra.gmra.mrb[64].mxu0 %v9652_v50  ;;  %4167 = vmatmul.mubr.bf16.vlgmr.msra.gmra.mrb[32].mxu1 %v9652_v50  ;;  %v3391_v6 = vmul.f32 %v3380_v59, %v3372_v12 }
0x129d   :  { %4082 = vmatpush1.bf16.msra.mxu0 %v7627_v52  ;;  %v3394_v41 = vmul.f32 %v3384_v28, %v3375_v14  ;;  %v3393_v46 = vmul.f32 %v3380_v59, %v3374_v35  ;;  %v3411_v58 = vadd.f32 %v3403_v21, %v3392_v40  ;;  %v7647_v59 = vld [vmem:[#allocation11 + $0x42c] ss:$24 sps:$4 sm:$0xff]   ;;  %v7650_v28 = vld [vmem:[#allocation11 + $0x45c] ss:$24 sps:$4 sm:$0xff]  }
0x129e   :  { %4083 = vmatprep.subr.bf16.mxu0 %v7632_v31  ;;  %v3410_v39 = vadd.f32 %v3399_v8, %v3391_v6 }
0x129f   :  { %v3413_v30 = vadd.f32 %v3403_v21, %v3394_v41  ;;  %v3412_v16 = vadd.f32 %v3399_v8, %v3393_v46  ;;  %v7654_v8 = vld [vmem:[#allocation11 + $0x4b8] ss:$24 sps:$4 sm:$0xff]   ;;  %v7659_v21 = vld [vmem:[#allocation11 + $0x4ec] ss:$24 sps:$4 sm:$0xff]  }
0x12a1   :  { %4084 = vmatpush1.bf16.msra.mxu0 %v7630_v57  ;;  %v9660_v47 = vpack.c.bf16 %v3413_v30, %v3411_v58  ;;  %v9662_v27 = vpack.c.bf16 %v3412_v16, %v3410_v39 }
0x12a2   :  { %4085 = vmatprep.subr.bf16.mxu0 %v7635_v15 }
0x12a3   :  { %4070 = vmatprep.mubr.bf16.mxu0 %v9660_v47  ;;  %4176 = vmatprep.mubr.bf16.mxu1 %v9660_v47 }
0x12a4   :  { %4071 = vmatmul.mubr.bf16.gmra.mrb[68].mxu0 %v9662_v27  ;;  %4177 = vmatmul.mubr.bf16.gmra.mrb[36].mxu1 %v9662_v27 }
0x12a5   :  { %4086 = vmatpush1.bf16.msra.mxu0 %v7633_v37  ;;  %4113 = vmatprep.mubr.bf16.mxu0 %v3512_v3  ;;  %v3516_v3 = vld [vmem:[#allocation12 + $0x6] sm:$0x3f] }
0x12a6   :  { %4087 = vmatprep.subr.bf16.mxu0 %v7638_v42  ;;  %7085 = vmatprep.mubr.msk.bf16.mxu1 %vm8482_vm1, %v8481_v54  ;;  %v3541_v52 = vrot.slane %v3516_v3, %v625_v61  ;;  %v3521_v9 = vrot.slane %v3516_v3, %v8809_v11  ;;  %v3537_v12 = vrot.slane %v3516_v3, %v621_v60 }
0x12a9   :  { %4088 = vmatpush1.bf16.msra.mxu0 %v7636_v24 }
0x12aa   :  { %4089 = vmatprep.subr.bf16.mxu0 %v7641_v56 }
0x12ad   :  { %4090 = vmatpush1.bf16.msra.mxu0 %v7639_v63 }
0x12ae   :  { %4091 = vmatprep.subr.bf16.mxu0 %v7644_v51 }
0x12b1   :  { %4092 = vmatpush1.bf16.msra.mxu0 %v7642_v7 }
0x12b2   :  { %4093 = vmatprep.subr.bf16.mxu0 %v7647_v59 }
0x12b5   :  { %4094 = vmatpush1.bf16.msra.mxu0 %v7645_v49 }
0x12b6   :  { %4095 = vmatprep.subr.bf16.mxu0 %v7650_v28 }
0x12b9   :  { %4096 = vmatpush1.bf16.msra.mxu0 %v7648_v17 }
0x12ba   :  { %4097 = vmatprep.subr.bf16.mxu0 %v7653_v43 }
0x12bd   :  { %4098 = vmatpush1.bf16.msra.mxu0 %v7651_v4 }
0x12be   :  { %4099 = vmatprep.subr.bf16.mxu0 %v7656_v26 }
0x12c1   :  { %4100 = vmatpush1.bf16.msra.mxu0 %v7654_v8 }
0x12c2   :  { %4101 = vmatprep.subr.bf16.mxu0 %v7659_v21 }
0x12c5   :  { %4102 = vmatpush1.bf16.msra.mxu0 %v7657_v32 }
0x12c6   :  { %4103 = vmatprep.subr.bf16.mxu0 %v7662_v29 }
0x12c9   :  { %4104 = vmatpush1.bf16.msra.mxu0 %v7660_v36 }
0x12ca   :  { %4105 = vmatprep.subr.bf16.mxu0 %v7665_v25 }
0x12cd   :  { %4106 = vmatpush1.bf16.msra.mxu0 %v7663_v20 }
0x12ce   :  { %4107 = vmatprep.subr.bf16.mxu0 %v7668_v53  ;;  %v3529_v53 = vrot.slane %v3516_v3, %v8939_v38 }
0x12d1   :  { %4108 = vmatpush1.bf16.msra.mxu0 %v7666_v45 }
0x12d2   :  { %4109 = vmatprep.subr.bf16.mxu0 %v7671_v62  ;;  %v3533_v62 = vrot.slane %v3516_v3, %v8942_v55 }
0x12d5   :  { %4110 = vmatpush1.bf16.msra.mxu0 %v7669_v5 }
0x12d6   :  { %4111 = vmatprep.subr.bf16.mxu0 %v7674_v2 }
0x12d9   :  { %4112 = vmatpush1.bf16.msra.mxu0 %v7672_v34 }
0x12da   :  { %7041 = vmatprep.subr.bf16.mxu0 %v8481_v54 }
0x12dc   :  { %4114 = vmatmul.mubr.bf16.vlgmr.msra.gmra.mrb[72].mxu0 %v9652_v50  ;;  %v3525_v50 = vrot.slane %v3516_v3, %v8812_v13 }
0x12dd   :  { %4123 = vmatprep.mubr.bf16.mxu0 %v9660_v47 }
0x12e4   :  { %4124 = vmatmul.mubr.bf16.gmra.mrb[76].mxu0 %v9662_v27 }
0x12e5   :  { %7043 = vmatprep.mubr.msk.bf16.mxu0 %vm8482_vm1, %v8481_v54 }
0x136f   :  { %v4062_v0 = vpop.f32.mrb[64].mxu0  ;;  %v4168_v31 = vpop.f32.mrb[32].mxu1 }
0x1370   :  { %v4064_v14 = vpop.f32.mrb[65].mxu0  ;;  %v4170_v40 = vpop.f32.mrb[33].mxu1  ;;  %v4063_v41 = vadd.f32 %v4062_v0, %v3521_v9  ;;  %v4169_v46 = vadd.f32 %v4168_v31, %v3537_v12 }
0x1371   :  { %v9682_v35 = vadd.f32 %v4170_v40, %v3541_v52  ;;  %v4066_v6 = vpop.f32.mrb[66].mxu0  ;;  %v4172_v57 = vpop.f32.mrb[34].mxu1  ;;  %v9684_v39 = vadd.f32 %v4064_v14, %v3525_v50 }
0x1372   :  { %v4067_v15 = vadd.f32 %v4066_v6, %v3521_v9  ;;  %v4173_v58 = vadd.f32 %v4172_v57, %v3537_v12  ;;  %v4068_v61 = vpop.f32.mrb[67].mxu0  ;;  %v4174_v30 = vpop.f32.mrb[35].mxu1 }
0x1373   :  { %v9686_v10 = vadd.f32 %v4068_v61, %v3525_v50  ;;  %v9688_v60 = vadd.f32 %v4174_v30, %v3541_v52 }
0x1374   :  { %v4187_v16 = vpack.c.bf16 %v4067_v15, %v4063_v41  ;;  %v4255_v47 = vpack.c.bf16 %v4173_v58, %v4169_v46 }
0x1375   :  { %v4302_v37 = vpack.c.bf16 %v9686_v10, %v9684_v39  ;;  %v4370_v27 = vpack.c.bf16 %v9688_v60, %v9682_v35 }
0x1377   :  { %v4072_v42 = vpop.f32.mrb[68].mxu0  ;;  %v4178_v24 = vpop.f32.mrb[36].mxu1 }
0x1378   :  { %v9694_v56 = vadd.f32 %v4072_v42, %v3521_v9  ;;  %v9696_v63 = vadd.f32 %v4178_v24, %v3537_v12  ;;  %v4074_v51 = vpop.f32.mrb[69].mxu0  ;;  %v4180_v7 = vpop.f32.mrb[37].mxu1 }
0x1379   :  { %v9698_v59 = vadd.f32 %v4074_v51, %v3525_v50  ;;  %v4076_v49 = vpop.f32.mrb[70].mxu0  ;;  %v4182_v28 = vpop.f32.mrb[38].mxu1  ;;  %v4181_v8 = vadd.f32 %v4180_v7, %v3541_v52 }
0x137a   :  { %v9700_v17 = vadd.f32 %v4076_v49, %v3521_v9  ;;  %v9702_v43 = vadd.f32 %v4182_v28, %v3537_v12  ;;  %v4078_v4 = vpop.f32.mrb[71].mxu0  ;;  %v4184_v26 = vpop.f32.mrb[39].mxu1 }
0x137b   :  { %v9704_v21 = vadd.f32 %v4078_v4, %v3525_v50  ;;  %v4185_v32 = vadd.f32 %v4184_v26, %v3541_v52 }
0x137c   :  { %v4417_v29 = vpack.c.bf16 %v9700_v17, %v9694_v56  ;;  %v4485_v36 = vpack.c.bf16 %v9702_v43, %v9696_v63 }
0x137d   :  { %v4532_v25 = vpack.c.bf16 %v9704_v21, %v9698_v59  ;;  %v4600_v20 = vpack.c.bf16 %v4185_v32, %v4181_v8  ;;  %v7690_v59 = vld [vmem:[#allocation14 + $0x150] ss:$8 sps:$4 sm:$0xff]   ;;  %v7695_v21 = vld [vmem:[#allocation14 + $0x164] ss:$8 sps:$4 sm:$0xff]  }
0x137f   :  { %7084 = vmatpush3.bf16.msra.mxu1 %v4600_v20 }
0x13af   :  { %v4115_v45 = vpop.f32.mrb[72].mxu0 }
0x13b0   :  { %v4117_v5 = vpop.f32.mrb[73].mxu0  ;;  %v4116_v34 = vadd.f32 %v4115_v45, %v3529_v53 }
0x13b1   :  { %v4119_v2 = vpop.f32.mrb[74].mxu0  ;;  %v4118_v12 = vadd.f32 %v4117_v5, %v3533_v62 }
0x13b2   :  { %v4120_v52 = vadd.f32 %v4119_v2, %v3529_v53  ;;  %v4121_v9 = vpop.f32.mrb[75].mxu0 }
0x13b3   :  { %v4122_v0 = vadd.f32 %v4121_v9, %v3533_v62 }
0x13b4   :  { %v4188_v31 = vpack.c.bf16 %v4120_v52, %v4116_v34 }
0x13b5   :  { %v4303_v50 = vpack.c.bf16 %v4122_v0, %v4118_v12 }
0x13b6   :  { %7042 = vmatpush3.bf16.xpose.msra.mxu0 %v4188_v31 }
0x13b7   :  { %v4125_v14 = vpop.f32.mrb[76].mxu0  ;;  %7047 = vmatprep.subr.bf16.mxu0 %v8481_v54 }
0x13b8   :  { %v9715_v40 = vadd.f32 %v4125_v14, %v3529_v53  ;;  %v4127_v6 = vpop.f32.mrb[77].mxu0 }
0x13b9   :  { %v9717_v57 = vadd.f32 %v4127_v6, %v3533_v62  ;;  %v4129_v41 = vpop.f32.mrb[78].mxu0 }
0x13ba   :  { %v9719_v3 = vadd.f32 %v4129_v41, %v3529_v53  ;;  %v4131_v46 = vpop.f32.mrb[79].mxu0 }
0x13bb   :  { %v9721_v15 = vadd.f32 %v4131_v46, %v3533_v62 }
0x13bc   :  { %v4418_v58 = vpack.c.bf16 %v9719_v3, %v9715_v40 }
0x13bd   :  { %v4533_v61 = vpack.c.bf16 %v9721_v15, %v9717_v57  ;;  %7044 = vmatmul.mubr.bf16.vlgmr.msra.gmra.mrb[80].mxu0 %v4187_v16  ;;  %v7686_v57 = vld [vmem:[#allocation14 + $0x134] ss:$8 sps:$4 sm:$0xff]   ;;  %v7684_v15 = vld [vmem:[#allocation14 + $0x130] ss:$8 sps:$4 sm:$0xff]  }
0x13be   :  { %7048 = vmatpush3.bf16.msra.mxu0 %v4255_v47  ;;  %7049 = vmatprep.mubr.msk.bf16.mxu0 %vm8482_vm1, %v8481_v54 }
0x13bf   :  { %7053 = vmatprep.subr.bf16.mxu0 %v8481_v54 }
0x1490   :  { %v4223_v30 = vpop.f32.mrb[80].mxu0 }
0x1491   :  { %v4230_v42 = vmul.f32 0.088388346, %v4223_v30  ;;  %v7045_v24 = vpop.f32.mrb[81].mxu0 }
0x1492   :  { %v4226_v51 = vpop.f32.mrb[82].mxu0 }
0x1493   :  { %v4231_v7 = vmul.f32 0.088388346, %v4226_v51  ;;  %v7046_v49 = vpop.f32.mrb[83].mxu0  ;;  %v4232_v28 = vsel %vm1317_vm2, %v4230_v42, -inf }
0x1494   :  { %4233 = vmax.xlane.f32.xlu0 %v4232_v28 }
0x1495   :  { %v4235_v4 = vsel %vm1317_vm2, %v4231_v7, -inf }
0x1496   :  { %4236 = vmax.xlane.f32.xlu1 %v4235_v4 }
0x1521   :  { %v4234_v26 = vpop.xlane.xlu0 %4233 }
0x1522   :  { %v4238_v16 = vsub.f32 %v4230_v42, %v4234_v26 }
0x1523   :  { %v4237_v47 = vpop.xlane.xlu1 %4236 }
0x1524   :  { %v4240_v8 = vmul.f32 1.442695, %v4238_v16  ;;  %v4239_v32 = vsub.f32 %v4231_v7, %v4237_v47 }
0x1526   :  { %8003 = vpow2.f32 %v4240_v8  ;;  %v4242_v20 = vmul.f32 1.442695, %v4239_v32 }
0x1528   :  { %8005 = vpow2.f32 %v4242_v20 }
0x1530   :  { %v8004_v53 = vpop.eup %8003 }
0x1531   :  { %v4244_v45 = vsel %vm1317_vm2, %v8004_v53, 0.0 }
0x1532   :  { %v8006_v62 = vpop.eup %8005  ;;  %4245 = vadd.xlane.f32.xlu0 %v4244_v45 }
0x1533   :  { %v4247_v5 = vsel %vm1317_vm2, %v8006_v62, 0.0 }
0x1534   :  { %4248 = vadd.xlane.f32.xlu1 %v4247_v5 }
0x15bf   :  { %v4246_v2 = vpop.xlane.xlu0 %4245 }
0x15c0   :  { %8007 = vrcp.f32 %v4246_v2 }
0x15c1   :  { %v4249_v34 = vpop.xlane.xlu1 %4248 }
0x15c2   :  { %8009 = vrcp.f32 %v4249_v34 }
0x15ca   :  { %v8008_v52 = vpop.eup %8007 }
0x15cb   :  { %v4252_v12 = vmul.f32 %v8008_v52, %v8004_v53 }
0x15cc   :  { %v8010_v9 = vpop.eup %8009 }
0x15cd   :  { %v4253_v0 = vmul.f32 %v8010_v9, %v8006_v62 }
0x15cf   :  { %v4254_v31 = vpack.c.bf16 %v4253_v0, %v4252_v12 }
0x15d1   :  { %7050 = vmatmul.mubr.msk.bf16.vlgmr.msra.gmra.mrb[84].mxu0 %vm1317_vm2, %v4254_v31 }
0x15d2   :  { %7054 = vmatpush3.bf16.xpose.msra.mxu0 %v4303_v50  ;;  %7055 = vmatprep.mubr.msk.bf16.mxu0 %vm8482_vm1, %v8481_v54 }
0x15d3   :  { %7059 = vmatprep.subr.bf16.mxu0 %v8481_v54 }
0x15d9   :  { %7056 = vmatmul.mubr.bf16.vlgmr.msra.gmra.mrb[88].mxu0 %v4302_v37 }
0x15da   :  { %7060 = vmatpush3.bf16.msra.mxu0 %v4370_v27  ;;  %7061 = vmatprep.mubr.msk.bf16.mxu0 %vm8482_vm1, %v8481_v54 }
0x15db   :  { %7065 = vmatprep.subr.bf16.mxu0 %v8481_v54 }
0x16a4   :  { %v9747_v14 = vpop.f32.mrb[84].mxu0 }
0x16a5   :  { %v7051_v50 = vpop.f32.mrb[85].mxu0 }
0x16a6   :  { %v9749_v6 = vpop.f32.mrb[86].mxu0 }
0x16a7   :  { %v4688_v41 = vpack.c.bf16 %v9749_v6, %v9747_v14  ;;  %v7052_v46 = vpop.f32.mrb[87].mxu0 }
0x16ac   :  { %v4338_v39 = vpop.f32.mrb[88].mxu0 }
0x16ad   :  { %v4345_v10 = vmul.f32 0.088388346, %v4338_v39  ;;  %v7057_v37 = vpop.f32.mrb[89].mxu0 }
0x16ae   :  { %v4341_v30 = vpop.f32.mrb[90].mxu0 }
0x16af   :  { %v4346_v35 = vmul.f32 0.088388346, %v4341_v30  ;;  %v7058_v60 = vpop.f32.mrb[91].mxu0  ;;  %v4347_v27 = vsel %vm1317_vm2, %v4345_v10, -inf }
0x16b0   :  { %4348 = vmax.xlane.f32.xlu0 %v4347_v27 }
0x16b1   :  { %v4350_v42 = vsel %vm1317_vm2, %v4346_v35, -inf }
0x16b2   :  { %4351 = vmax.xlane.f32.xlu1 %v4350_v42 }
0x173d   :  { %v4349_v24 = vpop.xlane.xlu0 %4348 }
0x173e   :  { %v4353_v51 = vsub.f32 %v4345_v10, %v4349_v24 }
0x173f   :  { %v4352_v7 = vpop.xlane.xlu1 %4351 }
0x1740   :  { %v4355_v49 = vmul.f32 1.442695, %v4353_v51  ;;  %v4354_v28 = vsub.f32 %v4346_v35, %v4352_v7 }
0x1742   :  { %8011 = vpow2.f32 %v4355_v49  ;;  %v4357_v4 = vmul.f32 1.442695, %v4354_v28 }
0x1744   :  { %8013 = vpow2.f32 %v4357_v4  ;;  %v7677_v4 = vld [vmem:[#allocation14 + $0x104] ss:$8 sps:$4 sm:$0xff]  }
0x174c   :  { %v8012_v26 = vpop.eup %8011 }
0x174d   :  { %v4359_v16 = vsel %vm1317_vm2, %v8012_v26, 0.0 }
0x174e   :  { %v8014_v47 = vpop.eup %8013  ;;  %4360 = vadd.xlane.f32.xlu0 %v4359_v16  ;;  %v7680_v16 = vld [vmem:[#allocation14 + $0x114] ss:$8 sps:$4 sm:$0xff]  }
0x174f   :  { %v4362_v8 = vsel %vm1317_vm2, %v8014_v47, 0.0 }
0x1750   :  { %4363 = vadd.xlane.f32.xlu1 %v4362_v8  ;;  %v7683_v8 = vld [vmem:[#allocation14 + $0x124] ss:$8 sps:$4 sm:$0xff]  }
0x17db   :  { %v4361_v32 = vpop.xlane.xlu0 %4360 }
0x17dc   :  { %8015 = vrcp.f32 %v4361_v32  ;;  %v7681_v32 = vld [vmem:[#allocation14 + $0x120] ss:$8 sps:$4 sm:$0xff]  }
0x17dd   :  { %v4364_v20 = vpop.xlane.xlu1 %4363 }
0x17de   :  { %8017 = vrcp.f32 %v4364_v20  ;;  %v7692_v20 = vld [vmem:[#allocation14 + $0x154] ss:$8 sps:$4 sm:$0xff]  }
0x17e6   :  { %v8016_v53 = vpop.eup %8015 }
0x17e7   :  { %v4367_v62 = vmul.f32 %v8016_v53, %v8012_v26  ;;  %v7675_v26 = vld [vmem:[#allocation14 + $0x100] ss:$8 sps:$4 sm:$0xff]   ;;  %v7698_v53 = vld [vmem:[#allocation14 + $0x174] ss:$8 sps:$4 sm:$0xff]  }
0x17e8   :  { %v8018_v45 = vpop.eup %8017 }
0x17e9   :  { %v4368_v5 = vmul.f32 %v8018_v45, %v8014_v47  ;;  %v7678_v47 = vld [vmem:[#allocation14 + $0x110] ss:$8 sps:$4 sm:$0xff]  }
0x17ea   :  { %v7696_v45 = vld [vmem:[#allocation14 + $0x170] ss:$8 sps:$4 sm:$0xff]  }
0x17eb   :  { %v4369_v2 = vpack.c.bf16 %v4368_v5, %v4367_v62  ;;  %v7701_v62 = vld [vmem:[#allocation14 + $0x184] ss:$8 sps:$4 sm:$0xff]   ;;  %v7699_v5 = vld [vmem:[#allocation14 + $0x180] ss:$8 sps:$4 sm:$0xff]  }
0x17ed   :  { %7062 = vmatmul.mubr.msk.bf16.vlgmr.msra.gmra.mrb[92].mxu0 %vm1317_vm2, %v4369_v2  ;;  %v7704_v2 = vld [vmem:[#allocation14 + $0x194] ss:$8 sps:$4 sm:$0xff]  }
0x17ee   :  { %7066 = vmatpush3.bf16.xpose.msra.mxu0 %v4418_v58  ;;  %7067 = vmatprep.mubr.msk.bf16.mxu0 %vm8482_vm1, %v8481_v54 }
0x17ef   :  { %7071 = vmatprep.subr.bf16.mxu0 %v8481_v54 }
0x17f5   :  { %7068 = vmatmul.mubr.bf16.vlgmr.msra.gmra.mrb[96].mxu0 %v4417_v29 }
0x17f6   :  { %7072 = vmatpush3.bf16.msra.mxu0 %v4485_v36  ;;  %7073 = vmatprep.mubr.msk.bf16.mxu0 %vm8482_vm1, %v8481_v54 }
0x17f7   :  { %7077 = vmatprep.subr.bf16.mxu0 %v8481_v54 }
0x18c0   :  { %v4408_v40 = vpop.f32.mrb[92].mxu0 }
0x18c1   :  { %v7063_v3 = vpop.f32.mrb[93].mxu0 }
0x18c2   :  { %v4411_v58 = vpop.f32.mrb[94].mxu0  ;;  %v7707_v3 = vld [vmem:[#allocation14 + $0x1a4] ss:$8 sps:$4 sm:$0xff]  }
0x18c3   :  { %v4689_v34 = vpack.c.bf16 %v4411_v58, %v4408_v40  ;;  %v7064_v52 = vpop.f32.mrb[95].mxu0  ;;  %v7702_v40 = vld [vmem:[#allocation14 + $0x190] ss:$8 sps:$4 sm:$0xff]   ;;  %v7705_v58 = vld [vmem:[#allocation14 + $0x1a0] ss:$8 sps:$4 sm:$0xff]  }
0x18c4   :  { %v7708_v52 = vld [vmem:[#allocation14 + $0x1b0] ss:$8 sps:$4 sm:$0xff]  }
0x18c8   :  { %v4453_v9 = vpop.f32.mrb[96].mxu0 }
0x18c9   :  { %v4460_v12 = vmul.f32 0.088388346, %v4453_v9  ;;  %v7069_v0 = vpop.f32.mrb[97].mxu0  ;;  %v7713_v9 = vld [vmem:[#allocation14 + $0x1c4] ss:$8 sps:$4 sm:$0xff]  }
0x18ca   :  { %v4456_v31 = vpop.f32.mrb[98].mxu0  ;;  %v7716_v0 = vld [vmem:[#allocation14 + $0x1d4] ss:$8 sps:$4 sm:$0xff]  }
0x18cb   :  { %v4461_v56 = vmul.f32 0.088388346, %v4456_v31  ;;  %v7070_v17 = vpop.f32.mrb[99].mxu0  ;;  %v4462_v29 = vsel %vm1317_vm2, %v4460_v12, -inf  ;;  %v7714_v31 = vld [vmem:[#allocation14 + $0x1d0] ss:$8 sps:$4 sm:$0xff]  }
0x18cc   :  { %4463 = vmax.xlane.f32.xlu0 %v4462_v29  ;;  %v7717_v17 = vld [vmem:[#allocation14 + $0x1e0] ss:$8 sps:$4 sm:$0xff]   ;;  %v7722_v29 = vld [vmem:[#allocation14 + $0x1f4] ss:$8 sps:$4 sm:$0xff]  }
0x18cd   :  { %v4465_v63 = vsel %vm1317_vm2, %v4461_v56, -inf }
0x18ce   :  { %4466 = vmax.xlane.f32.xlu1 %v4465_v63  ;;  %v7720_v63 = vld [vmem:[#allocation14 + $0x1f0] ss:$8 sps:$4 sm:$0xff]  }
0x1959   :  { %v4464_v43 = vpop.xlane.xlu0 %4463 }
0x195a   :  { %v4468_v36 = vsub.f32 %v4460_v12, %v4464_v43  ;;  %v7711_v12 = vld [vmem:[#allocation14 + $0x1c0] ss:$8 sps:$4 sm:$0xff]  }
0x195b   :  { %v4467_v50 = vpop.xlane.xlu1 %4466 }
0x195c   :  { %v4470_v46 = vmul.f32 1.442695, %v4468_v36  ;;  %v4469_v39 = vsub.f32 %v4461_v56, %v4467_v50  ;;  %v7719_v56 = vld [vmem:[#allocation14 + $0x1e4] ss:$8 sps:$4 sm:$0xff]  }
0x195e   :  { %8019 = vpow2.f32 %v4470_v46  ;;  %v4472_v10 = vmul.f32 1.442695, %v4469_v39 }
0x1960   :  { %8021 = vpow2.f32 %v4472_v10 }
0x1968   :  { %v8020_v37 = vpop.eup %8019 }
0x1969   :  { %v4474_v30 = vsel %vm1317_vm2, %v8020_v37, 0.0 }
0x196a   :  { %v8022_v35 = vpop.eup %8021  ;;  %4475 = vadd.xlane.f32.xlu0 %v4474_v30 }
0x196b   :  { %v4477_v60 = vsel %vm1317_vm2, %v8022_v35, 0.0 }
0x196c   :  { %4478 = vadd.xlane.f32.xlu1 %v4477_v60 }
0x19f7   :  { %v4476_v27 = vpop.xlane.xlu0 %4475 }
0x19f8   :  { %8023 = vrcp.f32 %v4476_v27 }
0x19f9   :  { %v4479_v42 = vpop.xlane.xlu1 %4478 }
0x19fa   :  { %8025 = vrcp.f32 %v4479_v42 }
0x1a02   :  { %v8024_v24 = vpop.eup %8023 }
0x1a03   :  { %v4482_v7 = vmul.f32 %v8024_v24, %v8020_v37 }
0x1a04   :  { %v8026_v51 = vpop.eup %8025 }
0x1a05   :  { %v4483_v49 = vmul.f32 %v8026_v51, %v8022_v35 }
0x1a07   :  { %v4484_v28 = vpack.c.bf16 %v4483_v49, %v4482_v7 }
0x1a09   :  { %7074 = vmatmul.mubr.msk.bf16.vlgmr.msra.gmra.mrb[100].mxu0 %vm1317_vm2, %v4484_v28 }
0x1a0a   :  { %7078 = vmatpush3.bf16.xpose.msra.mxu0 %v4533_v61  ;;  %7079 = vmatprep.mubr.msk.bf16.mxu0 %vm8482_vm1, %v8481_v54  ;;  %v7689_v54 = vld [vmem:[#allocation14 + $0x144] ss:$8 sps:$4 sm:$0xff]   ;;  %v7687_v61 = vld [vmem:[#allocation14 + $0x140] ss:$8 sps:$4 sm:$0xff]  }
0x1a0b   :  { %4852 = vmatprep.subr.bf16.mxu0 %v7677_v4 }
0x1a11   :  { %7080 = vmatmul.mubr.bf16.vlgmr.msra.gmra.mrb[104].mxu0 %v4532_v25  ;;  %v7693_v25 = vld [vmem:[#allocation14 + $0x160] ss:$8 sps:$4 sm:$0xff]  }
0x1a12   :  { %4853 = vmatpush1.bf16.msra.mxu0 %v7675_v26  ;;  %4884 = vmatprep.mubr.bf16.mxu0 %v4689_v34  ;;  %v7710_v34 = vld [vmem:[#allocation14 + $0x1b4] ss:$8 sps:$4 sm:$0xff]  }
0x1a13   :  { %4854 = vmatprep.subr.bf16.mxu0 %v7680_v16 }
0x1a16   :  { %4855 = vmatpush1.bf16.msra.mxu0 %v7678_v47  ;;  %v4914_v47 = vld [vmem:[#allocation15 + $0x2] sm:$0x3] }
0x1a17   :  { %4856 = vmatprep.subr.bf16.mxu0 %v7683_v8 }
0x1a1a   :  { %4857 = vmatpush1.bf16.msra.mxu0 %v7681_v32  ;;  %v9796_v32 = vrot.slane %v4914_v47, %v8809_v11 }
0x1a1b   :  { %4858 = vmatprep.subr.bf16.mxu0 %v7686_v57 }
0x1a1e   :  { %4859 = vmatpush1.bf16.msra.mxu0 %v7684_v15  ;;  %v9800_v15 = vrot.slane %v4914_v47, %v8812_v13  ;;  %v7762_v47 = vld [vmem:[%s10310_s12 + $0x2c8] ss:$16 sps:$4 sm:$0xff]  }
0x1a1f   :  { %4860 = vmatprep.subr.bf16.mxu0 %v7689_v54 }
0x1a22   :  { %4861 = vmatpush1.bf16.msra.mxu0 %v7687_v61 }
0x1a23   :  { %4862 = vmatprep.subr.bf16.mxu0 %v7692_v20 }
0x1a26   :  { %4863 = vmatpush1.bf16.msra.mxu0 %v7690_v59 }
0x1a27   :  { %4864 = vmatprep.subr.bf16.mxu0 %v7695_v21 }
0x1a2a   :  { %4865 = vmatpush1.bf16.msra.mxu0 %v7693_v25 }
0x1a2b   :  { %4866 = vmatprep.subr.bf16.mxu0 %v7698_v53 }
0x1a2e   :  { %4867 = vmatpush1.bf16.msra.mxu0 %v7696_v45 }
0x1a2f   :  { %4868 = vmatprep.subr.bf16.mxu0 %v7701_v62 }
0x1a32   :  { %4869 = vmatpush1.bf16.msra.mxu0 %v7699_v5 }
0x1a33   :  { %4870 = vmatprep.subr.bf16.mxu0 %v7704_v2 }
0x1a36   :  { %4871 = vmatpush1.bf16.msra.mxu0 %v7702_v40 }
0x1a37   :  { %4872 = vmatprep.subr.bf16.mxu0 %v7707_v3 }
0x1a3a   :  { %4873 = vmatpush1.bf16.msra.mxu0 %v7705_v58 }
0x1a3b   :  { %4874 = vmatprep.subr.bf16.mxu0 %v7710_v34 }
0x1a3e   :  { %4875 = vmatpush1.bf16.msra.mxu0 %v7708_v52 }
0x1a3f   :  { %4876 = vmatprep.subr.bf16.mxu0 %v7713_v9 }
0x1a42   :  { %4877 = vmatpush1.bf16.msra.mxu0 %v7711_v12 }
0x1a43   :  { %4878 = vmatprep.subr.bf16.mxu0 %v7716_v0 }
0x1a46   :  { %4879 = vmatpush1.bf16.msra.mxu0 %v7714_v31 }
0x1a47   :  { %4880 = vmatprep.subr.bf16.mxu0 %v7719_v56  ;;  %v7723_v56 = vld [vmem:[%s10310_s12 + $0x200] ss:$16 sps:$4 sm:$0xff]  }
0x1a4a   :  { %4881 = vmatpush1.bf16.msra.mxu0 %v7717_v17  ;;  %v7725_v17 = vld [vmem:[%s10310_s12 + $0x204] ss:$16 sps:$4 sm:$0xff]  }
0x1a4b   :  { %4882 = vmatprep.subr.bf16.mxu0 %v7722_v29  ;;  %v7726_v29 = vld [vmem:[%s10310_s12 + $0x208] ss:$16 sps:$4 sm:$0xff]   ;;  %5452 = vmatprep.subr.bf16.mxu1 %v7725_v17 }
0x1a4e   :  { %4883 = vmatpush1.bf16.msra.mxu0 %v7720_v63  ;;  %v7728_v63 = vld [vmem:[%s10310_s12 + $0x20c] ss:$16 sps:$4 sm:$0xff]  }
0x1a4f   :  { %5505 = vmatprep.subr.bf16.mxu0 %v7728_v63 }
0x1a51   :  { %4885 = vmatmul.mubr.bf16.vlgmr.msra.gmra.mrb[108].mxu0 %v4688_v41 }
0x1a52   :  { %5506 = vmatpush1.bf16.msra.mxu0 %v7726_v29 }
0x1adc   :  { %v9789_v43 = vpop.f32.mrb[100].mxu0 }
0x1add   :  { %v7075_v36 = vpop.f32.mrb[101].mxu0 }
0x1ade   :  { %v4526_v50 = vpop.f32.mrb[102].mxu0  ;;  %v7734_v36 = vld [vmem:[%s10310_s12 + $0x22c] ss:$16 sps:$4 sm:$0xff]  }
0x1adf   :  { %v4690_v46 = vpack.c.bf16 %v4526_v50, %v9789_v43  ;;  %v7076_v39 = vpop.f32.mrb[103].mxu0  ;;  %v7731_v43 = vld [vmem:[%s10310_s12 + $0x224] ss:$16 sps:$4 sm:$0xff]   ;;  %v7729_v50 = vld [vmem:[%s10310_s12 + $0x220] ss:$16 sps:$4 sm:$0xff]   ;;  %5507 = vmatprep.subr.bf16.mxu0 %v7734_v36 }
0x1ae0   :  { %v7737_v39 = vld [vmem:[%s10310_s12 + $0x244] ss:$16 sps:$4 sm:$0xff]  }
0x1ae4   :  { %v4568_v10 = vpop.f32.mrb[104].mxu0 }
0x1ae5   :  { %v4575_v37 = vmul.f32 0.088388346, %v4568_v10  ;;  %v7081_v30 = vpop.f32.mrb[105].mxu0  ;;  %v7740_v10 = vld [vmem:[%s10310_s12 + $0x24c] ss:$16 sps:$4 sm:$0xff]  }
0x1ae6   :  { %v4571_v35 = vpop.f32.mrb[106].mxu0  ;;  %v7738_v30 = vld [vmem:[%s10310_s12 + $0x248] ss:$16 sps:$4 sm:$0xff]  }
0x1ae7   :  { %v4576_v60 = vmul.f32 0.088388346, %v4571_v35  ;;  %v7082_v27 = vpop.f32.mrb[107].mxu0  ;;  %v4577_v42 = vsel %vm1317_vm2, %v4575_v37, -inf  ;;  %v7743_v35 = vld [vmem:[%s10310_s12 + $0x264] ss:$16 sps:$4 sm:$0xff]  }
0x1ae8   :  { %4578 = vmax.xlane.f32.xlu0 %v4577_v42  ;;  %v7741_v27 = vld [vmem:[%s10310_s12 + $0x260] ss:$16 sps:$4 sm:$0xff]   ;;  %v7744_v42 = vld [vmem:[%s10310_s12 + $0x268] ss:$16 sps:$4 sm:$0xff]  }
0x1ae9   :  { %v4580_v24 = vsel %vm1317_vm2, %v4576_v60, -inf }
0x1aea   :  { %4581 = vmax.xlane.f32.xlu1 %v4580_v24  ;;  %v7749_v24 = vld [vmem:[%s10310_s12 + $0x284] ss:$16 sps:$4 sm:$0xff]  }
0x1b24   :  { %v4886_v14 = vpop.f32.mrb[108].mxu0 }
0x1b25   :  { %v4888_v6 = vpop.f32.mrb[109].mxu0  ;;  %v4905_v8 = vadd.f32 %v4886_v14, %v9570_v44  ;;  %v7752_v14 = vld [vmem:[%s10310_s12 + $0x28c] ss:$16 sps:$4 sm:$0xff]  }
0x1b26   :  { %v4890_v41 = vpop.f32.mrb[110].mxu0  ;;  %v4906_v57 = vadd.f32 %v4888_v6, %v9573_v48  ;;  %v7747_v6 = vld [vmem:[%s10310_s12 + $0x280] ss:$16 sps:$4 sm:$0xff]  }
0x1b27   :  { %v4892_v51 = vpop.f32.mrb[111].mxu0  ;;  %v4907_v54 = vadd.f32 %v4890_v41, %v9576_v22  ;;  %v9805_v59 = vadd.f32 %v9796_v32, %v4905_v8  ;;  %v7750_v41 = vld [vmem:[%s10310_s12 + $0x288] ss:$16 sps:$4 sm:$0xff]   ;;  %v7767_v8 = vld [vmem:[%s10310_s12 + $0x2e4] ss:$16 sps:$4 sm:$0xff]  }
0x1b28   :  { %v4908_v61 = vadd.f32 %v4892_v51, %v9578_v1  ;;  %v9808_v21 = vadd.f32 %v9800_v15, %v4906_v57  ;;  %v7755_v51 = vld [vmem:[%s10310_s12 + $0x2a4] ss:$16 sps:$4 sm:$0xff]   ;;  %v7770_v57 = vld [vmem:[%s10310_s12 + $0x2ec] ss:$16 sps:$4 sm:$0xff]  }
0x1b29   :  { %v9812_v53 = vadd.f32 %v9796_v32, %v4907_v54  ;;  %v7765_v54 = vld [vmem:[%s10310_s12 + $0x2e0] ss:$16 sps:$4 sm:$0xff]  }
0x1b2a   :  { %v9815_v48 = vadd.f32 %v9800_v15, %v4908_v61  ;;  %v4938_v1 = vadd.f32 %v9808_v21, %v9805_v59  ;;  %v7768_v61 = vld [vmem:[%s10310_s12 + $0x2e8] ss:$16 sps:$4 sm:$0xff]  }
0x1b2c   :  { %v4941_v45 = vadd.f32 %v9815_v48, %v9812_v53 }
0x1b75   :  { %v4579_v7 = vpop.xlane.xlu0 %4578 }
0x1b76   :  { %v4583_v49 = vsub.f32 %v4575_v37, %v4579_v7  ;;  %v7735_v37 = vld [vmem:[%s10310_s12 + $0x240] ss:$16 sps:$4 sm:$0xff]   ;;  %v7758_v7 = vld [vmem:[%s10310_s12 + $0x2ac] ss:$16 sps:$4 sm:$0xff]  }
0x1b77   :  { %v4582_v28 = vpop.xlane.xlu1 %4581 }
0x1b78   :  { %v4585_v4 = vmul.f32 1.442695, %v4583_v49  ;;  %v4584_v26 = vsub.f32 %v4576_v60, %v4582_v28  ;;  %v7746_v60 = vld [vmem:[%s10310_s12 + $0x26c] ss:$16 sps:$4 sm:$0xff]   ;;  %v7753_v49 = vld [vmem:[%s10310_s12 + $0x2a0] ss:$16 sps:$4 sm:$0xff]  }
0x1b79   :  { %v7756_v28 = vld [vmem:[%s10310_s12 + $0x2a8] ss:$16 sps:$4 sm:$0xff]  }
0x1b7a   :  { %8027 = vpow2.f32 %v4585_v4  ;;  %v4587_v16 = vmul.f32 1.442695, %v4584_v26  ;;  %v7761_v4 = vld [vmem:[%s10310_s12 + $0x2c4] ss:$16 sps:$4 sm:$0xff]   ;;  %v7764_v26 = vld [vmem:[%s10310_s12 + $0x2cc] ss:$16 sps:$4 sm:$0xff]  }
0x1b7c   :  { %8029 = vpow2.f32 %v4587_v16  ;;  %v7759_v16 = vld [vmem:[%s10310_s12 + $0x2c0] ss:$16 sps:$4 sm:$0xff]  }
0x1b84   :  { %v8028_v20 = vpop.eup %8027 }
0x1b85   :  { %v4589_v44 = vsel %vm1317_vm2, %v8028_v20, 0.0 }
0x1b86   :  { %v8030_v25 = vpop.eup %8029  ;;  %4590 = vadd.xlane.f32.xlu0 %v4589_v44  ;;  %v7776_v44 = vld [vmem:[%s10310_s12 + $0x30c] ss:$16 sps:$4 sm:$0xff]  }
0x1b87   :  { %v4592_v22 = vsel %vm1317_vm2, %v8030_v25, 0.0 }
0x1b88   :  { %4593 = vadd.xlane.f32.xlu1 %v4592_v22  ;;  %v7774_v22 = vld [vmem:[%s10310_s12 + $0x308] ss:$16 sps:$4 sm:$0xff]  }
0x1b8a   :  { %4939 = vadd.xlane.f32.xlu0 %v4938_v1 }
0x1b8c   :  { %4942 = vadd.xlane.f32.xlu1 %v4941_v45 }
0x1c13   :  { %v4591_v62 = vpop.xlane.xlu0 %4590 }
0x1c14   :  { %8031 = vrcp.f32 %v4591_v62 }
0x1c15   :  { %v4594_v5 = vpop.xlane.xlu1 %4593 }
0x1c16   :  { %8033 = vrcp.f32 %v4594_v5 }
0x1c17   :  { %v4940_v1 = vpop.xlane.xlu0 %4939 }
0x1c18   :  { %v4950_v62 = vmul.f32 0.00390625, %v4940_v1 }
0x1c19   :  { %v4943_v45 = vpop.xlane.xlu1 %4942 }
0x1c1a   :  { %v4951_v5 = vmul.f32 0.00390625, %v4943_v45 }
0x1c1e   :  { %v8032_v2 = vpop.eup %8031 }
0x1c1f   :  { %v4597_v3 = vmul.f32 %v8032_v2, %v8028_v20  ;;  %v7773_v20 = vld [vmem:[%s10310_s12 + $0x304] ss:$16 sps:$4 sm:$0xff]  }
0x1c20   :  { %v8034_v40 = vpop.eup %8033 }
0x1c21   :  { %v4598_v58 = vmul.f32 %v8034_v40, %v8030_v25  ;;  %v7771_v25 = vld [vmem:[%s10310_s12 + $0x300] ss:$16 sps:$4 sm:$0xff]  }
0x1c23   :  { %v4599_v34 = vpack.c.bf16 %v4598_v58, %v4597_v3  ;;  %v9933_v58 = vsub.f32 %v9805_v59, %v4950_v62 }
0x1c25   :  { %7086 = vmatmul.mubr.msk.bf16.vlgmr.msra.gmra.mrb[40].mxu1 %vm1317_vm2, %v4599_v34  ;;  %v9936_v34 = vsub.f32 %v9808_v21, %v4950_v62 }
0x1c26   :  { %5453 = vmatpush1.bf16.msra.mxu1 %v7723_v56  ;;  %v9944_v56 = vsub.f32 %v9812_v53, %v4951_v5 }
0x1c27   :  { %5454 = vmatprep.subr.bf16.mxu1 %v7731_v43  ;;  %v4962_v43 = vmul.f32 %v9933_v58, %v9933_v58  ;;  %v4963_v36 = vmul.f32 %v9936_v34, %v9936_v34 }
0x1c2a   :  { %5455 = vmatpush1.bf16.msra.mxu1 %v7729_v50 }
0x1c2b   :  { %5456 = vmatprep.subr.bf16.mxu1 %v7737_v39  ;;  %v7779_v39 = vld [vmem:[%s10310_s12 + $0x324] ss:$16 sps:$4 sm:$0xff]  }
0x1c2e   :  { %5457 = vmatpush1.bf16.msra.mxu1 %v7735_v37  ;;  %v7777_v37 = vld [vmem:[%s10310_s12 + $0x320] ss:$16 sps:$4 sm:$0xff]  }
0x1c2f   :  { %5458 = vmatprep.subr.bf16.mxu1 %v7743_v35  ;;  %v7785_v35 = vld [vmem:[%s10310_s12 + $0x344] ss:$16 sps:$4 sm:$0xff]  }
0x1c32   :  { %5459 = vmatpush1.bf16.msra.mxu1 %v7741_v27  ;;  %v7783_v27 = vld [vmem:[%s10310_s12 + $0x340] ss:$16 sps:$4 sm:$0xff]  }
0x1c33   :  { %5460 = vmatprep.subr.bf16.mxu1 %v7749_v24  ;;  %v7791_v24 = vld [vmem:[%s10310_s12 + $0x364] ss:$16 sps:$4 sm:$0xff]  }
0x1c36   :  { %5461 = vmatpush1.bf16.msra.mxu1 %v7747_v6  ;;  %v7789_v6 = vld [vmem:[%s10310_s12 + $0x360] ss:$16 sps:$4 sm:$0xff]  }
0x1c37   :  { %5462 = vmatprep.subr.bf16.mxu1 %v7755_v51  ;;  %v7797_v51 = vld [vmem:[%s10310_s12 + $0x384] ss:$16 sps:$4 sm:$0xff]  }
0x1c3a   :  { %5463 = vmatpush1.bf16.msra.mxu1 %v7753_v49  ;;  %v7795_v49 = vld [vmem:[%s10310_s12 + $0x380] ss:$16 sps:$4 sm:$0xff]  }
0x1c3b   :  { %5464 = vmatprep.subr.bf16.mxu1 %v7761_v4  ;;  %v7803_v4 = vld [vmem:[%s10310_s12 + $0x3a4] ss:$16 sps:$4 sm:$0xff]  }
0x1c3e   :  { %5465 = vmatpush1.bf16.msra.mxu1 %v7759_v16  ;;  %v7801_v16 = vld [vmem:[%s10310_s12 + $0x3a0] ss:$16 sps:$4 sm:$0xff]  }
0x1c3f   :  { %5466 = vmatprep.subr.bf16.mxu1 %v7767_v8  ;;  %v7807_v8 = vld [vmem:[%s10310_s12 + $0x3c0] ss:$16 sps:$4 sm:$0xff]  }
0x1c42   :  { %5467 = vmatpush1.bf16.msra.mxu1 %v7765_v54  ;;  %v7810_v54 = vld [vmem:[%s10310_s12 + $0x3c8] ss:$16 sps:$4 sm:$0xff]  }
0x1c43   :  { %5468 = vmatprep.subr.bf16.mxu1 %v7773_v20  ;;  %v7815_v20 = vld [vmem:[%s10310_s12 + $0x3e4] ss:$16 sps:$4 sm:$0xff]  }
0x1c46   :  { %5469 = vmatpush1.bf16.msra.mxu1 %v7771_v25  ;;  %v7813_v25 = vld [vmem:[%s10310_s12 + $0x3e0] ss:$16 sps:$4 sm:$0xff]  }
0x1c47   :  { %5470 = vmatprep.subr.bf16.mxu1 %v7779_v39  ;;  %v4935_v39 = vld [vmem:[#allocation17 + $0x2] sm:$0x3] }
0x1c4a   :  { %5471 = vmatpush1.bf16.msra.mxu1 %v7777_v37  ;;  %v10076_v37 = vrot.slane %v4935_v39, %v8809_v11 }
0x1c4b   :  { %5472 = vmatprep.subr.bf16.mxu1 %v7785_v35 }
0x1c4e   :  { %5473 = vmatpush1.bf16.msra.mxu1 %v7783_v27 }
0x1c4f   :  { %5474 = vmatprep.subr.bf16.mxu1 %v7791_v24 }
0x1c52   :  { %5475 = vmatpush1.bf16.msra.mxu1 %v7789_v6 }
0x1c53   :  { %5476 = vmatprep.subr.bf16.mxu1 %v7797_v51 }
0x1c56   :  { %5477 = vmatpush1.bf16.msra.mxu1 %v7795_v49 }
0x1c57   :  { %5478 = vmatprep.subr.bf16.mxu1 %v7803_v4 }
0x1c5a   :  { %5479 = vmatpush1.bf16.msra.mxu1 %v7801_v16 }
0x1cf8   :  { %v4638_v52 = vpop.f32.mrb[40].mxu1 }
0x1cf9   :  { %v7087_v9 = vpop.f32.mrb[41].mxu1 }
0x1cfa   :  { %v4641_v12 = vpop.f32.mrb[42].mxu1 }
0x1cfb   :  { %v4691_v0 = vpack.c.bf16 %v4641_v12, %v4638_v52  ;;  %v7088_v31 = vpop.f32.mrb[43].mxu1 }
0x1cfd   :  { %4894 = vmatprep.mubr.bf16.mxu0 %v4691_v0 }
0x1cfe   :  { %4895 = vmatmul.mubr.bf16.gmra.mrb[112].mxu0 %v4690_v46  ;;  %v7732_v46 = vld [vmem:[%s10310_s12 + $0x228] ss:$16 sps:$4 sm:$0xff]  }
0x1cff   :  { %5508 = vmatpush1.bf16.msra.mxu0 %v7732_v46 }
0x1d00   :  { %5509 = vmatprep.subr.bf16.mxu0 %v7740_v10  ;;  %v7782_v10 = vld [vmem:[%s10310_s12 + $0x32c] ss:$16 sps:$4 sm:$0xff]  }
0x1d03   :  { %5510 = vmatpush1.bf16.msra.mxu0 %v7738_v30  ;;  %v7780_v30 = vld [vmem:[%s10310_s12 + $0x328] ss:$16 sps:$4 sm:$0xff]  }
0x1d04   :  { %5511 = vmatprep.subr.bf16.mxu0 %v7746_v60  ;;  %v7788_v60 = vld [vmem:[%s10310_s12 + $0x34c] ss:$16 sps:$4 sm:$0xff]  }
0x1d07   :  { %5512 = vmatpush1.bf16.msra.mxu0 %v7744_v42  ;;  %v7786_v42 = vld [vmem:[%s10310_s12 + $0x348] ss:$16 sps:$4 sm:$0xff]  }
0x1d08   :  { %5513 = vmatprep.subr.bf16.mxu0 %v7752_v14  ;;  %v7794_v14 = vld [vmem:[%s10310_s12 + $0x36c] ss:$16 sps:$4 sm:$0xff]  }
0x1d0b   :  { %5514 = vmatpush1.bf16.msra.mxu0 %v7750_v41  ;;  %v7792_v41 = vld [vmem:[%s10310_s12 + $0x368] ss:$16 sps:$4 sm:$0xff]  }
0x1d0c   :  { %5515 = vmatprep.subr.bf16.mxu0 %v7758_v7  ;;  %v7800_v7 = vld [vmem:[%s10310_s12 + $0x38c] ss:$16 sps:$4 sm:$0xff]  }
0x1d0f   :  { %5516 = vmatpush1.bf16.msra.mxu0 %v7756_v28  ;;  %v7798_v28 = vld [vmem:[%s10310_s12 + $0x388] ss:$16 sps:$4 sm:$0xff]  }
0x1d10   :  { %5517 = vmatprep.subr.bf16.mxu0 %v7764_v26  ;;  %v7806_v26 = vld [vmem:[%s10310_s12 + $0x3ac] ss:$16 sps:$4 sm:$0xff]  }
0x1d13   :  { %5518 = vmatpush1.bf16.msra.mxu0 %v7762_v47  ;;  %v7804_v47 = vld [vmem:[%s10310_s12 + $0x3a8] ss:$16 sps:$4 sm:$0xff]  }
0x1d14   :  { %5519 = vmatprep.subr.bf16.mxu0 %v7770_v57  ;;  %v7809_v57 = vld [vmem:[%s10310_s12 + $0x3c4] ss:$16 sps:$4 sm:$0xff]  }
0x1d15   :  { %5480 = vmatprep.subr.bf16.mxu1 %v7809_v57  ;;  %v7822_v57 = vld [vmem:[#allocation21 + $0x210] ss:$8 sps:$4 sm:$0xff]  }
0x1d16   :  { %5481 = vmatpush1.bf16.msra.mxu1 %v7807_v8  ;;  %v7824_v8 = vld [vmem:[#allocation21 + $0x214] ss:$8 sps:$4 sm:$0xff]  }
0x1d17   :  { %5520 = vmatpush1.bf16.msra.mxu0 %v7768_v61  ;;  %v7812_v61 = vld [vmem:[%s10310_s12 + $0x3cc] ss:$16 sps:$4 sm:$0xff]   ;;  %5482 = vmatprep.subr.bf16.mxu1 %v7815_v20 }
0x1d18   :  { %5521 = vmatprep.subr.bf16.mxu0 %v7776_v44  ;;  %v7818_v44 = vld [vmem:[%s10310_s12 + $0x3ec] ss:$16 sps:$4 sm:$0xff]  }
0x1d19   :  { %v7830_v20 = vld [vmem:[#allocation21 + $0x234] ss:$8 sps:$4 sm:$0xff]  }
0x1d1a   :  { %5483 = vmatpush1.bf16.msra.mxu1 %v7813_v25  ;;  %v7833_v25 = vld [vmem:[#allocation21 + $0x244] ss:$8 sps:$4 sm:$0xff]  }
0x1d1b   :  { %5522 = vmatpush1.bf16.msra.mxu0 %v7774_v22  ;;  %v7816_v22 = vld [vmem:[%s10310_s12 + $0x3e8] ss:$16 sps:$4 sm:$0xff]   ;;  %s8483_s12 = smov [#allocation27]  }
0x1d1c   :  { %5523 = vmatprep.subr.bf16.mxu0 %v7782_v10  ;;  %v4937_v10 = vld [vmem:[#allocation18 + $0x2] sm:$0x3]  ;;  %s6347_s17 = sshll.u32 %s8483_s12, 4  ;;  %s6348_s17 = int_to_ptr.vmem [resolvable:$true] %s6347_s17 }
0x1d1d   :  { %v10084_v24 = vrot.slane %v4937_v10, %v8809_v11  ;;  %s8413_s5 = scalar_lea.vmem %s6348_s17, 1024  ;;  %p8418_p9 = scmp.lt.s32.totalorder %s6348_s17, %s6348_s17 }
0x1d1e   :  { %p8414_p8 = scmp.ne.s32.totalorder %s6348_s17, %s8413_s5  ;;  %p8419_p10 = scmp.lt.s32.totalorder %s8413_s5, %s8413_s5 }
0x1d1f   :  { %5524 = vmatpush1.bf16.msra.mxu0 %v7780_v30  ;;  %v10079_v30 = vrot.slane %v4935_v39, %v8812_v13  ;;  %v7860_v39 = vld [vmem:[#allocation21 + $0x2d4] ss:$8 sps:$4 sm:$0xff]  }
0x1d20   :  { %5525 = vmatprep.subr.bf16.mxu0 %v7788_v60  ;;  %p8420_p11 = por %p8419_p10, %p8418_p9 }
0x1d22   :  { %p8421_p12 = pnand %p8420_p11, %p8414_p8 }
0x1d23   :  { %5526 = vmatpush1.bf16.msra.mxu0 %v7786_v42 }
0x1d24   :  { %5527 = vmatprep.subr.bf16.mxu0 %v7794_v14  ;;  %v10087_v14 = vrot.slane %v4937_v10, %v8812_v13  ;;  %v7858_v10 = vld [vmem:[#allocation21 + $0x2d0] ss:$8 sps:$4 sm:$0xff]  }
0x1d27   :  { %5528 = vmatpush1.bf16.msra.mxu0 %v7792_v41 }
0x1d28   :  { %5529 = vmatprep.subr.bf16.mxu0 %v7800_v7 }
0x1d2b   :  { %5530 = vmatpush1.bf16.msra.mxu0 %v7798_v28 }
0x1d2c   :  { %5531 = vmatprep.subr.bf16.mxu0 %v7806_v26 }
0x1d2f   :  { %5532 = vmatpush1.bf16.msra.mxu0 %v7804_v47  ;;  %v7821_v47 = vld [vmem:[#allocation21 + $0x204] ss:$8 sps:$4 sm:$0xff]  }
0x1d30   :  { %5533 = vmatprep.subr.bf16.mxu0 %v7812_v61  ;;  %6095 = vmatprep.subr.bf16.mxu1 %v7821_v47  ;;  %v7825_v61 = vld [vmem:[#allocation21 + $0x220] ss:$8 sps:$4 sm:$0xff]  }
0x1d33   :  { %5534 = vmatpush1.bf16.msra.mxu0 %v7810_v54  ;;  %v7827_v54 = vld [vmem:[#allocation21 + $0x224] ss:$8 sps:$4 sm:$0xff]  }
0x1d34   :  { %5535 = vmatprep.subr.bf16.mxu0 %v7818_v44  ;;  %v7828_v44 = vld [vmem:[#allocation21 + $0x230] ss:$8 sps:$4 sm:$0xff]  }
0x1d37   :  { %5536 = vmatpush1.bf16.msra.mxu0 %v7816_v22  ;;  %v7831_v22 = vld [vmem:[#allocation21 + $0x240] ss:$8 sps:$4 sm:$0xff]  }
0x1dd1   :  { %v4896_v2 = vpop.f32.mrb[112].mxu0 }
0x1dd2   :  { %v4909_v40 = vadd.f32 %v4896_v2, %v9586_v23  ;;  %v4898_v3 = vpop.f32.mrb[113].mxu0  ;;  %v9947_v23 = vsub.f32 %v9815_v48, %v4951_v5 }
0x1dd3   :  { %v4910_v52 = vadd.f32 %v4898_v3, %v9589_v33  ;;  %v4900_v9 = vpop.f32.mrb[114].mxu0 }
0x1dd4   :  { %v9940_v12 = vadd.f32 %v9796_v32, %v4909_v40  ;;  %v4911_v0 = vadd.f32 %v4900_v9, %v9592_v18  ;;  %v4902_v31 = vpop.f32.mrb[115].mxu0 }
0x1dd5   :  { %v9950_v17 = vadd.f32 %v9800_v15, %v4910_v52  ;;  %v4912_v29 = vadd.f32 %v4902_v31, %v9594_v19  ;;  %v4964_v19 = vmul.f32 %v9944_v56, %v9944_v56 }
0x1dd6   :  { %v9954_v33 = vadd.f32 %v9796_v32, %v4911_v0  ;;  %v4965_v32 = vmul.f32 %v9947_v23, %v9947_v23 }
0x1dd7   :  { %v9957_v63 = vadd.f32 %v9800_v15, %v4912_v29  ;;  %v4944_v18 = vadd.f32 %v9950_v17, %v9940_v12  ;;  %v4970_v15 = vadd.f32 %v4963_v36, %v4962_v43 }
0x1dd8   :  { %v4973_v46 = vadd.f32 %v4965_v32, %v4964_v19 }
0x1dd9   :  { %4945 = vadd.xlane.f32.xlu0 %v4944_v18  ;;  %v4947_v50 = vadd.f32 %v9957_v63, %v9954_v33 }
0x1ddb   :  { %4948 = vadd.xlane.f32.xlu1 %v4947_v50 }
0x1ddd   :  { %4971 = vadd.xlane.f32.xlu0 %v4970_v15 }
0x1ddf   :  { %4974 = vadd.xlane.f32.xlu1 %v4973_v46 }
0x1e66   :  { %v4946_v1 = vpop.xlane.xlu0 %4945 }
0x1e67   :  { %v4952_v45 = vmul.f32 0.00390625, %v4946_v1  ;;  %v7836_v1 = vld [vmem:[#allocation21 + $0x254] ss:$8 sps:$4 sm:$0xff]  }
0x1e68   :  { %v4949_v62 = vpop.xlane.xlu1 %4948 }
0x1e69   :  { %v10056_v5 = vsub.f32 %v9940_v12, %v4952_v45  ;;  %v10059_v2 = vsub.f32 %v9950_v17, %v4952_v45  ;;  %v4953_v40 = vmul.f32 0.00390625, %v4949_v62  ;;  %v7834_v45 = vld [vmem:[#allocation21 + $0x250] ss:$8 sps:$4 sm:$0xff]   ;;  %v7839_v62 = vld [vmem:[#allocation21 + $0x264] ss:$8 sps:$4 sm:$0xff]  }
0x1e6a   :  { %v4972_v3 = vpop.xlane.xlu0 %4971 }
0x1e6b   :  { %v10062_v52 = vsub.f32 %v9954_v33, %v4953_v40  ;;  %v10065_v9 = vsub.f32 %v9957_v63, %v4953_v40  ;;  %v4982_v0 = vmul.f32 0.00390625, %v4972_v3  ;;  %v4966_v31 = vmul.f32 %v10056_v5, %v10056_v5  ;;  %v7837_v40 = vld [vmem:[#allocation21 + $0x260] ss:$8 sps:$4 sm:$0xff]   ;;  %v7842_v3 = vld [vmem:[#allocation21 + $0x274] ss:$8 sps:$4 sm:$0xff]  }
0x1e6c   :  { %v4975_v29 = vpop.xlane.xlu1 %4974  ;;  %v4967_v18 = vmul.f32 %v10059_v2, %v10059_v2 }
0x1e6d   :  { %v4986_v43 = vadd.f32 1e-06, %v4982_v0  ;;  %v4983_v36 = vmul.f32 0.00390625, %v4975_v29  ;;  %v4968_v50 = vmul.f32 %v10062_v52, %v10062_v52  ;;  %v4969_v19 = vmul.f32 %v10065_v9, %v10065_v9  ;;  %v7840_v0 = vld [vmem:[#allocation21 + $0x270] ss:$8 sps:$4 sm:$0xff]  }
0x1e6e   :  { %v4976_v32 = vadd.f32 %v4967_v18, %v4966_v31  ;;  %v7845_v31 = vld [vmem:[#allocation21 + $0x284] ss:$8 sps:$4 sm:$0xff]   ;;  %v7843_v29 = vld [vmem:[#allocation21 + $0x280] ss:$8 sps:$4 sm:$0xff]   ;;  %v7848_v18 = vld [vmem:[#allocation21 + $0x294] ss:$8 sps:$4 sm:$0xff]  }
0x1e6f   :  { %8035 = vrsqrt.f32 %v4986_v43  ;;  %v4987_v15 = vadd.f32 1e-06, %v4983_v36  ;;  %v4979_v46 = vadd.f32 %v4969_v19, %v4968_v50  ;;  %v7846_v43 = vld [vmem:[#allocation21 + $0x290] ss:$8 sps:$4 sm:$0xff]   ;;  %v7851_v36 = vld [vmem:[#allocation21 + $0x2a4] ss:$8 sps:$4 sm:$0xff]  }
0x1e70   :  { %4977 = vadd.xlane.f32.xlu0 %v4976_v32  ;;  %v7849_v50 = vld [vmem:[#allocation21 + $0x2a0] ss:$8 sps:$4 sm:$0xff]   ;;  %v7854_v19 = vld [vmem:[#allocation21 + $0x2b4] ss:$8 sps:$4 sm:$0xff]   ;;  %v7852_v32 = vld [vmem:[#allocation21 + $0x2b0] ss:$8 sps:$4 sm:$0xff]  }
0x1e71   :  { %8037 = vrsqrt.f32 %v4987_v15  ;;  %4980 = vadd.xlane.f32.xlu1 %v4979_v46  ;;  %v7857_v15 = vld [vmem:[#allocation21 + $0x2c4] ss:$8 sps:$4 sm:$0xff]   ;;  %v7855_v46 = vld [vmem:[#allocation21 + $0x2c0] ss:$8 sps:$4 sm:$0xff]  }
0x1e79   :  { %v8036_v35 = vpop.eup %8035 }
0x1e7a   :  { %v4994_v60 = vmul.f32 %v8036_v35, %v9933_v58  ;;  %v4995_v27 = vmul.f32 %v8036_v35, %v9936_v34  ;;  %v7863_v35 = vld [vmem:[#allocation21 + $0x2e4] ss:$8 sps:$4 sm:$0xff]  }
0x1e7b   :  { %v8038_v42 = vpop.eup %8037 }
0x1e7c   :  { %v4996_v6 = vmul.f32 %v8038_v42, %v9944_v56  ;;  %v4997_v41 = vmul.f32 %v8038_v42, %v9947_v23  ;;  %v5014_v51 = vmul.f32 %v10079_v30, %v4995_v27  ;;  %v5013_v7 = vmul.f32 %v10076_v37, %v4994_v60  ;;  %v7819_v23 = vld [vmem:[#allocation21 + $0x200] ss:$8 sps:$4 sm:$0xff]   ;;  %v7866_v27 = vld [vmem:[#allocation21 + $0x2f4] ss:$8 sps:$4 sm:$0xff]   ;;  %v7864_v42 = vld [vmem:[#allocation21 + $0x2f0] ss:$8 sps:$4 sm:$0xff]  }
0x1e7d   :  { %v7861_v60 = vld [vmem:[#allocation21 + $0x2e0] ss:$8 sps:$4 sm:$0xff]  }
0x1e7e   :  { %v5016_v49 = vmul.f32 %v10079_v30, %v4997_v41  ;;  %v5015_v58 = vmul.f32 %v10076_v37, %v4996_v6  ;;  %v5033_v34 = vadd.f32 %v10087_v14, %v5014_v51  ;;  %v5032_v4 = vadd.f32 %v10084_v24, %v5013_v7 }
0x1e80   :  { %v5035_v28 = vadd.f32 %v10087_v14, %v5016_v49  ;;  %v5034_v26 = vadd.f32 %v10084_v24, %v5015_v58  ;;  %v7869_v49 = vld [vmem:[#allocation21 + $0x304] ss:$8 sps:$4 sm:$0xff]  }
0x1e82   :  { %v5106_v16 = vpack.c.bf16 %v5035_v28, %v5033_v34  ;;  %v5105_v56 = vpack.c.bf16 %v5034_v26, %v5032_v4 }
0x1e84   :  { %5484 = vmatprep.mubr.bf16.mxu1 %v5106_v16  ;;  %5537 = vmatprep.mubr.bf16.mxu0 %v5106_v16 }
0x1e85   :  { %5485 = vmatmul.mubr.bf16.vlgmr.msra.gmra.mrb[44].mxu1 %v5105_v56  ;;  %5538 = vmatmul.mubr.bf16.vlgmr.msra.gmra.mrb[116].mxu0 %v5105_v56 }
0x1e86   :  { %6096 = vmatpush1.bf16.msra.mxu1 %v7819_v23 }
0x1e87   :  { %6097 = vmatprep.subr.bf16.mxu1 %v7824_v8 }
0x1e8a   :  { %6098 = vmatpush1.bf16.msra.mxu1 %v7822_v57 }
0x1e8b   :  { %6099 = vmatprep.subr.bf16.mxu1 %v7827_v54 }
0x1e8e   :  { %6100 = vmatpush1.bf16.msra.mxu1 %v7825_v61 }
0x1e8f   :  { %6101 = vmatprep.subr.bf16.mxu1 %v7830_v20 }
0x1e92   :  { %6102 = vmatpush1.bf16.msra.mxu1 %v7828_v44 }
0x1e93   :  { %6103 = vmatprep.subr.bf16.mxu1 %v7833_v25 }
0x1e96   :  { %6104 = vmatpush1.bf16.msra.mxu1 %v7831_v22 }
0x1e97   :  { %6105 = vmatprep.subr.bf16.mxu1 %v7836_v1 }
0x1e9a   :  { %6106 = vmatpush1.bf16.msra.mxu1 %v7834_v45 }
0x1e9b   :  { %6107 = vmatprep.subr.bf16.mxu1 %v7839_v62 }
0x1e9e   :  { %6108 = vmatpush1.bf16.msra.mxu1 %v7837_v40 }
0x1e9f   :  { %6109 = vmatprep.subr.bf16.mxu1 %v7842_v3 }
0x1ea2   :  { %6110 = vmatpush1.bf16.msra.mxu1 %v7840_v0 }
0x1ea3   :  { %6111 = vmatprep.subr.bf16.mxu1 %v7845_v31 }
0x1ea6   :  { %6112 = vmatpush1.bf16.msra.mxu1 %v7843_v29 }
0x1ea7   :  { %6113 = vmatprep.subr.bf16.mxu1 %v7848_v18 }
0x1eaa   :  { %6114 = vmatpush1.bf16.msra.mxu1 %v7846_v43 }
0x1eab   :  { %6115 = vmatprep.subr.bf16.mxu1 %v7851_v36 }
0x1eae   :  { %6116 = vmatpush1.bf16.msra.mxu1 %v7849_v50 }
0x1eaf   :  { %6117 = vmatprep.subr.bf16.mxu1 %v7854_v19 }
0x1eb2   :  { %6118 = vmatpush1.bf16.msra.mxu1 %v7852_v32 }
0x1eb3   :  { %6119 = vmatprep.subr.bf16.mxu1 %v7857_v15 }
0x1eb6   :  { %6120 = vmatpush1.bf16.msra.mxu1 %v7855_v46 }
0x1eb7   :  { %6121 = vmatprep.subr.bf16.mxu1 %v7860_v39 }
0x1eba   :  { %6122 = vmatpush1.bf16.msra.mxu1 %v7858_v10 }
0x1ebb   :  { %6123 = vmatprep.subr.bf16.mxu1 %v7863_v35 }
0x1ebe   :  { %6124 = vmatpush1.bf16.msra.mxu1 %v7861_v60 }
0x1ebf   :  { %6125 = vmatprep.subr.bf16.mxu1 %v7866_v27 }
0x1ec2   :  { %6126 = vmatpush1.bf16.msra.mxu1 %v7864_v42 }
0x1ec3   :  { %6148 = vmatprep.subr.bf16.mxu1 %v7869_v49 }
0x1efd   :  { %v4978_v6 = vpop.xlane.xlu0 %4977 }
0x1efe   :  { %v4984_v41 = vmul.f32 0.00390625, %v4978_v6  ;;  %v4981_v51 = vpop.xlane.xlu1 %4980 }
0x1eff   :  { %v4985_v7 = vmul.f32 0.00390625, %v4981_v51 }
0x1f00   :  { %v4988_v58 = vadd.f32 1e-06, %v4984_v41 }
0x1f01   :  { %v4989_v34 = vadd.f32 1e-06, %v4985_v7 }
0x1f02   :  { %8039 = vrsqrt.f32 %v4988_v58 }
0x1f03   :  { %8041 = vrsqrt.f32 %v4989_v34 }
0x1f0c   :  { %v8040_v28 = vpop.eup %8039 }
0x1f0d   :  { %v8042_v4 = vpop.eup %8041  ;;  %v4999_v26 = vmul.f32 %v8040_v28, %v10059_v2  ;;  %v4998_v16 = vmul.f32 %v8040_v28, %v10056_v5 }
0x1f0e   :  { %v5001_v56 = vmul.f32 %v8042_v4, %v10065_v9  ;;  %v5000_v23 = vmul.f32 %v8042_v4, %v10062_v52  ;;  %v5110_v52 = vld [vmem:[#allocation20 + $0x4] sm:$0xf] }
0x1f0f   :  { %v5018_v47 = vmul.f32 %v10079_v30, %v4999_v26  ;;  %v5017_v8 = vmul.f32 %v10076_v37, %v4998_v16  ;;  %v10112_v25 = vrot.slane %v5110_v52, %v8809_v11 }
0x1f10   :  { %v5020_v57 = vmul.f32 %v10079_v30, %v5001_v56  ;;  %v5019_v54 = vmul.f32 %v10076_v37, %v5000_v23  ;;  %v10115_v37 = vrot.slane %v5110_v52, %v8939_v38  ;;  %v10118_v30 = vrot.slane %v5110_v52, %v8812_v13 }
0x1f11   :  { %v5037_v61 = vadd.f32 %v10087_v14, %v5018_v47  ;;  %v5036_v2 = vadd.f32 %v10084_v24, %v5017_v8 }
0x1f12   :  { %v5039_v20 = vadd.f32 %v10087_v14, %v5020_v57  ;;  %v5038_v5 = vadd.f32 %v10084_v24, %v5019_v54  ;;  %v10121_v14 = vrot.slane %v5110_v52, %v8942_v55 }
0x1f14   :  { %v5108_v44 = vpack.c.bf16 %v5039_v20, %v5037_v61  ;;  %v5107_v9 = vpack.c.bf16 %v5038_v5, %v5036_v2 }
0x1f16   :  { %5494 = vmatprep.mubr.bf16.mxu1 %v5108_v44  ;;  %5547 = vmatprep.mubr.bf16.mxu0 %v5108_v44 }
0x1f17   :  { %5495 = vmatmul.mubr.bf16.gmra.mrb[48].mxu1 %v5107_v9  ;;  %5548 = vmatmul.mubr.bf16.gmra.mrb[120].mxu0 %v5107_v9 }
0x1f58   :  { %v5486_v24 = vpop.f32.mrb[44].mxu1  ;;  %v5539_v22 = vpop.f32.mrb[116].mxu0 }
0x1f59   :  { %v10124_v1 = vadd.f32 %v5486_v24, %v10112_v25  ;;  %v10127_v45 = vadd.f32 %v5539_v22, %v10115_v37  ;;  %v5488_v62 = vpop.f32.mrb[45].mxu1  ;;  %v5541_v40 = vpop.f32.mrb[117].mxu0 }
0x1f5a   :  { %v10130_v3 = vadd.f32 %v5488_v62, %v10118_v30  ;;  %v10133_v38 = vadd.f32 %v5541_v40, %v10121_v14  ;;  %v5490_v0 = vpop.f32.mrb[46].mxu1  ;;  %v5543_v31 = vpop.f32.mrb[118].mxu0 }
0x1f5b   :  { %v5558_v55 = vmul.f32 %v10124_v1, %v10124_v1  ;;  %v5560_v29 = vmul.f32 %v10127_v45, %v10127_v45  ;;  %v10140_v18 = vadd.f32 %v5490_v0, %v10112_v25  ;;  %v10143_v43 = vadd.f32 %v5543_v31, %v10115_v37  ;;  %v5492_v36 = vpop.f32.mrb[47].mxu1  ;;  %v5545_v50 = vpop.f32.mrb[119].mxu0 }
0x1f5c   :  { %v5559_v19 = vmul.f32 %v10130_v3, %v10130_v3  ;;  %v5561_v32 = vmul.f32 %v10133_v38, %v10133_v38  ;;  %v10150_v15 = vadd.f32 %v5492_v36, %v10118_v30  ;;  %v10153_v46 = vadd.f32 %v5545_v50, %v10121_v14 }
0x1f5d   :  { %v5574_v39 = vmul.f32 %v5558_v55, %v10124_v1  ;;  %v5576_v10 = vmul.f32 %v5560_v29, %v10127_v45  ;;  %v5562_v35 = vmul.f32 %v10140_v18, %v10140_v18  ;;  %v5564_v60 = vmul.f32 %v10143_v43, %v10143_v43 }
0x1f5e   :  { %v5575_v27 = vmul.f32 %v5559_v19, %v10130_v3  ;;  %v5577_v42 = vmul.f32 %v5561_v32, %v10133_v38  ;;  %v5563_v6 = vmul.f32 %v10150_v15, %v10150_v15  ;;  %v5565_v41 = vmul.f32 %v10153_v46, %v10153_v46 }
0x1f5f   :  { %v5590_v51 = vmul.f32 0.044715, %v5574_v39  ;;  %v5592_v7 = vmul.f32 0.044715, %v5576_v10  ;;  %v5578_v49 = vmul.f32 %v5562_v35, %v10140_v18  ;;  %v5580_v58 = vmul.f32 %v5564_v60, %v10143_v43 }
0x1f60   :  { %v5591_v34 = vmul.f32 0.044715, %v5575_v27  ;;  %v5593_v28 = vmul.f32 0.044715, %v5577_v42  ;;  %v5579_v4 = vmul.f32 %v5563_v6, %v10150_v15  ;;  %v5581_v26 = vmul.f32 %v5565_v41, %v10153_v46 }
0x1f61   :  { %v5606_v16 = vadd.f32 %v5590_v51, %v10124_v1  ;;  %v5608_v56 = vadd.f32 %v5592_v7, %v10127_v45  ;;  %v5594_v23 = vmul.f32 0.044715, %v5578_v49  ;;  %v5596_v47 = vmul.f32 0.044715, %v5580_v58 }
0x1f62   :  { %v5607_v8 = vadd.f32 %v5591_v34, %v10130_v3  ;;  %v5609_v57 = vadd.f32 %v5593_v28, %v10133_v38  ;;  %v5595_v54 = vmul.f32 0.044715, %v5579_v4  ;;  %v5597_v61 = vmul.f32 0.044715, %v5581_v26 }
0x1f63   :  { %v5622_v20 = vmul.f32 0.7978846, %v5606_v16  ;;  %v5624_v2 = vmul.f32 0.7978846, %v5608_v56  ;;  %v5610_v5 = vadd.f32 %v5594_v23, %v10140_v18  ;;  %v5612_v44 = vadd.f32 %v5596_v47, %v10143_v43 }
0x1f64   :  { %v5623_v9 = vmul.f32 0.7978846, %v5607_v8  ;;  %v5625_v52 = vmul.f32 0.7978846, %v5609_v57  ;;  %v5611_v24 = vadd.f32 %v5595_v54, %v10150_v15  ;;  %v5613_v22 = vadd.f32 %v5597_v61, %v10153_v46 }
0x1f65   :  { %8043 = vtanh.f32 %v5622_v20  ;;  %v5626_v62 = vmul.f32 0.7978846, %v5610_v5  ;;  %v5628_v40 = vmul.f32 0.7978846, %v5612_v44  ;;  %v7867_v5 = vld [vmem:[#allocation21 + $0x300] ss:$8 sps:$4 sm:$0xff]  }
0x1f66   :  { %8045 = vtanh.f32 %v5624_v2  ;;  %v5627_v0 = vmul.f32 0.7978846, %v5611_v24  ;;  %v5629_v31 = vmul.f32 0.7978846, %v5613_v22  ;;  %v7872_v44 = vld [vmem:[#allocation21 + $0x314] ss:$8 sps:$4 sm:$0xff]  }
0x1f67   :  { %8047 = vtanh.f32 %v5623_v9  ;;  %v7873_v9 = vld [vmem:[#allocation21 + $0x320] ss:$8 sps:$4 sm:$0xff]   ;;  %v7884_v22 = vld [vmem:[#allocation21 + $0x354] ss:$8 sps:$4 sm:$0xff]  }
0x1f68   :  { %8049 = vtanh.f32 %v5625_v52  ;;  %v7876_v52 = vld [vmem:[#allocation21 + $0x330] ss:$8 sps:$4 sm:$0xff]   ;;  %v7879_v24 = vld [vmem:[#allocation21 + $0x340] ss:$8 sps:$4 sm:$0xff]  }
0x1f69   :  { %8051 = vtanh.f32 %v5626_v62  ;;  %v7882_v62 = vld [vmem:[#allocation21 + $0x350] ss:$8 sps:$4 sm:$0xff]  }
0x1f6a   :  { %8053 = vtanh.f32 %v5628_v40  ;;  %v7887_v40 = vld [vmem:[#allocation21 + $0x364] ss:$8 sps:$4 sm:$0xff]  }
0x1f6b   :  { %8055 = vtanh.f32 %v5627_v0  ;;  %v7885_v0 = vld [vmem:[#allocation21 + $0x360] ss:$8 sps:$4 sm:$0xff]  }
0x1f6c   :  { %8057 = vtanh.f32 %v5629_v31  ;;  %v7890_v31 = vld [vmem:[#allocation21 + $0x374] ss:$8 sps:$4 sm:$0xff]  }
0x1f6f   :  { %v8044_v55 = vpop.eup %8043 }
0x1f70   :  { %v8046_v29 = vpop.eup %8045  ;;  %v5654_v36 = vadd.f32 1.0, %v8044_v55  ;;  %v7888_v55 = vld [vmem:[#allocation21 + $0x370] ss:$8 sps:$4 sm:$0xff]  }
0x1f71   :  { %v8048_v50 = vpop.eup %8047  ;;  %v5656_v19 = vadd.f32 1.0, %v8046_v29  ;;  %v7893_v29 = vld [vmem:[#allocation21 + $0x384] ss:$8 sps:$4 sm:$0xff]  }
0x1f72   :  { %v8050_v32 = vpop.eup %8049  ;;  %v5655_v39 = vadd.f32 1.0, %v8048_v50  ;;  %v5670_v27 = vmul.f32 0.5, %v5654_v36  ;;  %v7891_v36 = vld [vmem:[#allocation21 + $0x380] ss:$8 sps:$4 sm:$0xff]   ;;  %v7896_v50 = vld [vmem:[#allocation21 + $0x394] ss:$8 sps:$4 sm:$0xff]  }
0x1f73   :  { %v8052_v10 = vpop.eup %8051  ;;  %v5657_v35 = vadd.f32 1.0, %v8050_v32  ;;  %v5672_v41 = vmul.f32 0.5, %v5656_v19  ;;  %v7894_v19 = vld [vmem:[#allocation21 + $0x390] ss:$8 sps:$4 sm:$0xff]   ;;  %v7899_v32 = vld [vmem:[#allocation21 + $0x3a4] ss:$8 sps:$4 sm:$0xff]  }
0x1f74   :  { %v8054_v60 = vpop.eup %8053  ;;  %v5658_v42 = vadd.f32 1.0, %v8052_v10  ;;  %v5671_v34 = vmul.f32 0.5, %v5655_v39  ;;  %v5686_v16 = vmul.f32 %v5670_v27, %v10124_v1  ;;  %v7897_v39 = vld [vmem:[#allocation21 + $0x3a0] ss:$8 sps:$4 sm:$0xff]   ;;  %v7902_v10 = vld [vmem:[#allocation21 + $0x3b4] ss:$8 sps:$4 sm:$0xff]  }
0x1f75   :  { %v8056_v6 = vpop.eup %8055  ;;  %v5660_v51 = vadd.f32 1.0, %v8054_v60  ;;  %v5673_v26 = vmul.f32 0.5, %v5657_v35  ;;  %v10182_v47 = vmul.f32 %v5672_v41, %v10127_v45  ;;  %v7900_v35 = vld [vmem:[#allocation21 + $0x3b0] ss:$8 sps:$4 sm:$0xff]   ;;  %v7905_v60 = vld [vmem:[#allocation21 + $0x3c4] ss:$8 sps:$4 sm:$0xff]  }
0x1f76   :  { %v8058_v7 = vpop.eup %8057  ;;  %v5674_v49 = vmul.f32 0.5, %v5658_v42  ;;  %v5659_v58 = vadd.f32 1.0, %v8056_v6  ;;  %v5687_v61 = vmul.f32 %v5671_v34, %v10130_v3  ;;  %v7870_v3 = vld [vmem:[#allocation21 + $0x310] ss:$8 sps:$4 sm:$0xff]   ;;  %v7903_v27 = vld [vmem:[#allocation21 + $0x3c0] ss:$8 sps:$4 sm:$0xff]  }
0x1f77   :  { %v5676_v28 = vmul.f32 0.5, %v5660_v51  ;;  %v5661_v4 = vadd.f32 1.0, %v8058_v7  ;;  %v10192_v1 = vmul.f32 %v5673_v26, %v10133_v38  ;;  %v7878_v38 = vld [vmem:[#allocation21 + $0x334] ss:$8 sps:$4 sm:$0xff]   ;;  %v7906_v6 = vld [vmem:[#allocation21 + $0x3d0] ss:$8 sps:$4 sm:$0xff]  }
0x1f78   :  { %v5690_v56 = vmul.f32 %v5674_v49, %v10140_v18  ;;  %v5675_v23 = vmul.f32 0.5, %v5659_v58  ;;  %v7908_v42 = vld [vmem:[#allocation21 + $0x3d4] ss:$8 sps:$4 sm:$0xff]   ;;  %v7911_v41 = vld [vmem:[#allocation21 + $0x3e4] ss:$8 sps:$4 sm:$0xff]  }
0x1f79   :  { %v10185_v8 = vmul.f32 %v5676_v28, %v10143_v43  ;;  %v5677_v57 = vmul.f32 0.5, %v5661_v4  ;;  %v7909_v51 = vld [vmem:[#allocation21 + $0x3e0] ss:$8 sps:$4 sm:$0xff]   ;;  %v7914_v7 = vld [vmem:[#allocation21 + $0x3f4] ss:$8 sps:$4 sm:$0xff]  }
0x1f7a   :  { %v5767_v54 = vpack.c.bf16 %v5690_v56, %v5686_v16  ;;  %v5691_v20 = vmul.f32 %v5675_v23, %v10150_v15  ;;  %v7875_v15 = vld [vmem:[#allocation21 + $0x324] ss:$8 sps:$4 sm:$0xff]   ;;  %v7912_v49 = vld [vmem:[#allocation21 + $0x3f0] ss:$8 sps:$4 sm:$0xff]  }
0x1f7b   :  { %v5769_v2 = vpack.c.bf16 %v10185_v8, %v10182_v47  ;;  %v10195_v18 = vmul.f32 %v5677_v57, %v10153_v46  ;;  %v7881_v46 = vld [vmem:[#allocation21 + $0x344] ss:$8 sps:$4 sm:$0xff]  }
0x1f7c   :  { %v5768_v45 = vpack.c.bf16 %v5691_v20, %v5687_v61 }
0x1f7d   :  { %v5770_v43 = vpack.c.bf16 %v10195_v18, %v10192_v1 }
0x1f7e   :  { %6127 = vmatprep.mubr.bf16.mxu1 %v5768_v45 }
0x1f7f   :  { %6128 = vmatmul.mubr.bf16.vlgmr.msra.gmra.mrb[52].mxu1 %v5767_v54 }
0x1f80   :  { %6149 = vmatpush1.bf16.msra.mxu1 %v7867_v5 }
0x1f81   :  { %6150 = vmatprep.subr.bf16.mxu1 %v7872_v44 }
0x1f84   :  { %6151 = vmatpush1.bf16.msra.mxu1 %v7870_v3 }
0x1f85   :  { %6152 = vmatprep.subr.bf16.mxu1 %v7875_v15 }
0x1f88   :  { %6153 = vmatpush1.bf16.msra.mxu1 %v7873_v9 }
0x1f89   :  { %6154 = vmatprep.subr.bf16.mxu1 %v7878_v38 }
0x1f8c   :  { %6155 = vmatpush1.bf16.msra.mxu1 %v7876_v52 }
0x1f8d   :  { %6156 = vmatprep.subr.bf16.mxu1 %v7881_v46 }
0x1f90   :  { %6157 = vmatpush1.bf16.msra.mxu1 %v7879_v24 }
0x1f91   :  { %6158 = vmatprep.subr.bf16.mxu1 %v7884_v22 }
0x1f94   :  { %6159 = vmatpush1.bf16.msra.mxu1 %v7882_v62 }
0x1f95   :  { %6160 = vmatprep.subr.bf16.mxu1 %v7887_v40 }
0x1f98   :  { %6161 = vmatpush1.bf16.msra.mxu1 %v7885_v0 }
0x1f99   :  { %6162 = vmatprep.subr.bf16.mxu1 %v7890_v31 }
0x1f9c   :  { %6163 = vmatpush1.bf16.msra.mxu1 %v7888_v55 }
0x1f9d   :  { %6164 = vmatprep.subr.bf16.mxu1 %v7893_v29 }
0x1fa0   :  { %6165 = vmatpush1.bf16.msra.mxu1 %v7891_v36 }
0x1fa1   :  { %6166 = vmatprep.subr.bf16.mxu1 %v7896_v50 }
0x1fa4   :  { %6167 = vmatpush1.bf16.msra.mxu1 %v7894_v19 }
0x1fa5   :  { %6168 = vmatprep.subr.bf16.mxu1 %v7899_v32 }
0x1fa8   :  { %6169 = vmatpush1.bf16.msra.mxu1 %v7897_v39 }
0x1fa9   :  { %6170 = vmatprep.subr.bf16.mxu1 %v7902_v10 }
0x1fac   :  { %6171 = vmatpush1.bf16.msra.mxu1 %v7900_v35 }
0x1fad   :  { %6172 = vmatprep.subr.bf16.mxu1 %v7905_v60 }
0x1fb0   :  { %6173 = vmatpush1.bf16.msra.mxu1 %v7903_v27 }
0x1fb1   :  { %6174 = vmatprep.subr.bf16.mxu1 %v7908_v42 }
0x1fb4   :  { %6175 = vmatpush1.bf16.msra.mxu1 %v7906_v6 }
0x1fb5   :  { %6176 = vmatprep.subr.bf16.mxu1 %v7911_v41 }
0x1fb8   :  { %6177 = vmatpush1.bf16.msra.mxu1 %v7909_v51 }
0x1fb9   :  { %6178 = vmatprep.subr.bf16.mxu1 %v7914_v7 }
0x1fbc   :  { %6179 = vmatpush1.bf16.msra.mxu1 %v7912_v49 }
0x1fea   :  { %v5496_v58 = vpop.f32.mrb[48].mxu1  ;;  %v5549_v34 = vpop.f32.mrb[120].mxu0 }
0x1feb   :  { %v10200_v28 = vadd.f32 %v5496_v58, %v10112_v25  ;;  %v10203_v4 = vadd.f32 %v5549_v34, %v10115_v37  ;;  %v5498_v26 = vpop.f32.mrb[49].mxu1  ;;  %v5551_v16 = vpop.f32.mrb[121].mxu0 }
0x1fec   :  { %v10206_v56 = vadd.f32 %v5498_v26, %v10118_v30  ;;  %v10209_v23 = vadd.f32 %v5551_v16, %v10121_v14  ;;  %v5500_v57 = vpop.f32.mrb[50].mxu1  ;;  %v5553_v54 = vpop.f32.mrb[122].mxu0 }
0x1fed   :  { %v5566_v61 = vmul.f32 %v10200_v28, %v10200_v28  ;;  %v5568_v20 = vmul.f32 %v10203_v4, %v10203_v4  ;;  %v10216_v45 = vadd.f32 %v5500_v57, %v10112_v25  ;;  %v10219_v5 = vadd.f32 %v5553_v54, %v10115_v37  ;;  %v5502_v44 = vpop.f32.mrb[51].mxu1  ;;  %v5555_v3 = vpop.f32.mrb[123].mxu0 }
0x1fee   :  { %v5567_v15 = vmul.f32 %v10206_v56, %v10206_v56  ;;  %v5569_v9 = vmul.f32 %v10209_v23, %v10209_v23  ;;  %v10226_v38 = vadd.f32 %v5502_v44, %v10118_v30  ;;  %v10229_v52 = vadd.f32 %v5555_v3, %v10121_v14 }
0x1fef   :  { %v5582_v25 = vmul.f32 %v5566_v61, %v10200_v28  ;;  %v5584_v46 = vmul.f32 %v5568_v20, %v10203_v4  ;;  %v5570_v37 = vmul.f32 %v10216_v45, %v10216_v45  ;;  %v5572_v24 = vmul.f32 %v10219_v5, %v10219_v5 }
0x1ff0   :  { %v5583_v22 = vmul.f32 %v5567_v15, %v10206_v56  ;;  %v5585_v62 = vmul.f32 %v5569_v9, %v10209_v23  ;;  %v5571_v30 = vmul.f32 %v10226_v38, %v10226_v38  ;;  %v5573_v14 = vmul.f32 %v10229_v52, %v10229_v52 }
0x1ff1   :  { %v5598_v40 = vmul.f32 0.044715, %v5582_v25  ;;  %v5600_v0 = vmul.f32 0.044715, %v5584_v46  ;;  %v5586_v31 = vmul.f32 %v5570_v37, %v10216_v45  ;;  %v5588_v55 = vmul.f32 %v5572_v24, %v10219_v5 }
0x1ff2   :  { %v5599_v29 = vmul.f32 0.044715, %v5583_v22  ;;  %v5601_v36 = vmul.f32 0.044715, %v5585_v62  ;;  %v5587_v50 = vmul.f32 %v5571_v30, %v10226_v38  ;;  %v5589_v19 = vmul.f32 %v5573_v14, %v10229_v52 }
0x1ff3   :  { %v5614_v32 = vadd.f32 %v5598_v40, %v10200_v28  ;;  %v5616_v39 = vadd.f32 %v5600_v0, %v10203_v4  ;;  %v5602_v10 = vmul.f32 0.044715, %v5586_v31  ;;  %v5604_v35 = vmul.f32 0.044715, %v5588_v55 }
0x1ff4   :  { %v5615_v60 = vadd.f32 %v5599_v29, %v10206_v56  ;;  %v5617_v27 = vadd.f32 %v5601_v36, %v10209_v23  ;;  %v5603_v42 = vmul.f32 0.044715, %v5587_v50  ;;  %v5605_v6 = vmul.f32 0.044715, %v5589_v19 }
0x1ff5   :  { %v5630_v41 = vmul.f32 0.7978846, %v5614_v32  ;;  %v5632_v51 = vmul.f32 0.7978846, %v5616_v39  ;;  %v5618_v7 = vadd.f32 %v5602_v10, %v10216_v45  ;;  %v5620_v49 = vadd.f32 %v5604_v35, %v10219_v5 }
0x1ff6   :  { %v5631_v58 = vmul.f32 0.7978846, %v5615_v60  ;;  %v5633_v34 = vmul.f32 0.7978846, %v5617_v27  ;;  %v5619_v26 = vadd.f32 %v5603_v42, %v10226_v38  ;;  %v5621_v16 = vadd.f32 %v5605_v6, %v10229_v52 }
0x1ff7   :  { %8059 = vtanh.f32 %v5630_v41  ;;  %v5634_v57 = vmul.f32 0.7978846, %v5618_v7  ;;  %v5636_v54 = vmul.f32 0.7978846, %v5620_v49 }
0x1ff8   :  { %8061 = vtanh.f32 %v5632_v51  ;;  %v5635_v61 = vmul.f32 0.7978846, %v5619_v26  ;;  %v5637_v20 = vmul.f32 0.7978846, %v5621_v16 }
0x1ff9   :  { %8063 = vtanh.f32 %v5631_v58 }
0x1ffa   :  { %8065 = vtanh.f32 %v5633_v34 }
0x1ffb   :  { %8067 = vtanh.f32 %v5634_v57 }
0x1ffc   :  { %8069 = vtanh.f32 %v5636_v54 }
0x1ffd   :  { %8071 = vtanh.f32 %v5635_v61 }
0x1ffe   :  { %8073 = vtanh.f32 %v5637_v20 }
0x2001   :  { %v8060_v44 = vpop.eup %8059 }
0x2002   :  { %v8062_v3 = vpop.eup %8061  ;;  %v5662_v15 = vadd.f32 1.0, %v8060_v44 }
0x2003   :  { %v8064_v9 = vpop.eup %8063  ;;  %v5664_v25 = vadd.f32 1.0, %v8062_v3 }
0x2004   :  { %v8066_v46 = vpop.eup %8065  ;;  %v5663_v37 = vadd.f32 1.0, %v8064_v9  ;;  %v5678_v14 = vmul.f32 0.5, %v5662_v15 }
0x2005   :  { %v8068_v24 = vpop.eup %8067  ;;  %v5665_v22 = vadd.f32 1.0, %v8066_v46  ;;  %v5680_v31 = vmul.f32 0.5, %v5664_v25 }
0x2006   :  { %v8070_v62 = vpop.eup %8069  ;;  %v5666_v30 = vadd.f32 1.0, %v8068_v24  ;;  %v5679_v36 = vmul.f32 0.5, %v5663_v37  ;;  %v5694_v35 = vmul.f32 %v5678_v14, %v10200_v28  ;;  %v6210_v28 = vld [vmem:[#allocation23 + $0x2] sm:$0x3] }
0x2007   :  { %v8072_v40 = vpop.eup %8071  ;;  %v5668_v0 = vadd.f32 1.0, %v8070_v62  ;;  %v5681_v32 = vmul.f32 0.5, %v5665_v22  ;;  %v5696_v42 = vmul.f32 %v5680_v31, %v10203_v4  ;;  %v6215_v4 = vrot.slane %v6210_v28, %v8809_v11 }
0x2008   :  { %v8074_v55 = vpop.eup %8073  ;;  %v5667_v29 = vadd.f32 1.0, %v8072_v40  ;;  %v5682_v50 = vmul.f32 0.5, %v5666_v30  ;;  %v5695_v41 = vmul.f32 %v5679_v36, %v10206_v56 }
0x2009   :  { %v5669_v19 = vadd.f32 1.0, %v8074_v55  ;;  %v5684_v39 = vmul.f32 0.5, %v5668_v0  ;;  %v5697_v49 = vmul.f32 %v5681_v32, %v10209_v23  ;;  %v6219_v23 = vrot.slane %v6210_v28, %v8812_v13 }
0x200a   :  { %v5683_v10 = vmul.f32 0.5, %v5667_v29  ;;  %v5698_v60 = vmul.f32 %v5682_v50, %v10216_v45 }
0x200b   :  { %v5685_v27 = vmul.f32 0.5, %v5669_v19  ;;  %v5700_v6 = vmul.f32 %v5684_v39, %v10219_v5 }
0x200c   :  { %v5699_v51 = vmul.f32 %v5683_v10, %v10226_v38  ;;  %v5771_v7 = vpack.c.bf16 %v5698_v60, %v5694_v35 }
0x200d   :  { %v5701_v58 = vmul.f32 %v5685_v27, %v10229_v52  ;;  %v5773_v34 = vpack.c.bf16 %v5700_v6, %v5696_v42 }
0x200e   :  { %v5772_v26 = vpack.c.bf16 %v5699_v51, %v5695_v41 }
0x200f   :  { %v5774_v16 = vpack.c.bf16 %v5701_v58, %v5697_v49 }
0x2010   :  { %6137 = vmatprep.mubr.bf16.mxu1 %v5772_v26 }
0x2011   :  { %6138 = vmatmul.mubr.bf16.gmra.mrb[56].mxu1 %v5771_v7 }
0x2012   :  { %6180 = vmatprep.mubr.bf16.mxu1 %v5770_v43 }
0x2019   :  { %6181 = vmatmul.mubr.bf16.vlgmr.msra.gmra.mrb[52].mxu1 %v5769_v2 }
0x201a   :  { %6190 = vmatprep.mubr.bf16.mxu1 %v5774_v16 }
0x2021   :  { %6191 = vmatmul.mubr.bf16.gmra.mrb[56].mxu1 %v5773_v34 }
0x20ec   :  { %v6182_v56 = vpop.f32.mrb[52].mxu1 }
0x20ed   :  { %v6201_v45 = vadd.f32 %v6182_v56, %v9805_v59  ;;  %v6184_v5 = vpop.f32.mrb[53].mxu1 }
0x20ee   :  { %v6202_v38 = vadd.f32 %v6184_v5, %v9808_v21  ;;  %v6186_v52 = vpop.f32.mrb[54].mxu1 }
0x20ef   :  { %v6222_v1 = vadd.f32 %v6215_v4, %v6201_v45  ;;  %v6203_v18 = vadd.f32 %v6186_v52, %v9812_v53  ;;  %v6188_v43 = vpop.f32.mrb[55].mxu1 }
0x20f0   :  { %v6223_v47 = vadd.f32 %v6219_v23, %v6202_v38  ;;  %v6204_v8 = vadd.f32 %v6188_v43, %v9815_v48  ;;  %v6230_v38 = vld [vmem:[#allocation24] sm:$0x3] }
0x20f1   :  { %v6224_v2 = vadd.f32 %v6215_v4, %v6203_v18  ;;  %v6231_v18 = vld [vmem:[#allocation26] sm:$0x3] }
0x20f2   :  { %v6225_v57 = vadd.f32 %v6219_v23, %v6204_v8  ;;  %v6232_v54 = vadd.f32 %v6223_v47, %v6222_v1  ;;  %v6304_v8 = vrot.slane %v6230_v38, %v8812_v13 }
0x20f4   :  { %6233 = vadd.xlane.f32.xlu0 %v6232_v54  ;;  %v6192_v61 = vpop.f32.mrb[56].mxu1  ;;  %v6235_v20 = vadd.f32 %v6225_v57, %v6224_v2  ;;  %v6323_v54 = vrot.slane %v6231_v18, %v8812_v13 }
0x20f5   :  { %v6205_v44 = vadd.f32 %v6192_v61, %v9940_v12  ;;  %v6194_v59 = vpop.f32.mrb[57].mxu1 }
0x20f6   :  { %v6206_v3 = vadd.f32 %v6194_v59, %v9950_v17  ;;  %6236 = vadd.xlane.f32.xlu1 %v6235_v20  ;;  %v6196_v21 = vpop.f32.mrb[58].mxu1 }
0x20f7   :  { %v6226_v15 = vadd.f32 %v6215_v4, %v6205_v44  ;;  %v6207_v53 = vadd.f32 %v6196_v21, %v9954_v33  ;;  %v6198_v9 = vpop.f32.mrb[59].mxu1 }
0x20f8   :  { %v6227_v25 = vadd.f32 %v6219_v23, %v6206_v3  ;;  %v6208_v48 = vadd.f32 %v6198_v9, %v9957_v63 }
0x20f9   :  { %v6228_v46 = vadd.f32 %v6215_v4, %v6207_v53 }
0x20fa   :  { %v6229_v37 = vadd.f32 %v6219_v23, %v6208_v48  ;;  %v6238_v24 = vadd.f32 %v6227_v25, %v6226_v15 }
0x20fc   :  { %6239 = vadd.xlane.f32.xlu0 %v6238_v24  ;;  %v6241_v22 = vadd.f32 %v6229_v37, %v6228_v46 }
0x20fe   :  { %6242 = vadd.xlane.f32.xlu1 %v6241_v22 }
0x2181   :  { %v6234_v62 = vpop.xlane.xlu0 %6233 }
0x2182   :  { %v6244_v12 = vmul.f32 0.00390625, %v6234_v62 }
0x2183   :  { %v6237_v30 = vpop.xlane.xlu1 %6236 }
0x2184   :  { %v6248_v14 = vsub.f32 %v6222_v1, %v6244_v12  ;;  %v6249_v17 = vsub.f32 %v6223_v47, %v6244_v12  ;;  %v6245_v40 = vmul.f32 0.00390625, %v6237_v30  ;;  %v6300_v47 = vrot.slane %v6230_v38, %v8809_v11 }
0x2186   :  { %v6250_v0 = vsub.f32 %v6224_v2, %v6245_v40  ;;  %v6251_v31 = vsub.f32 %v6225_v57, %v6245_v40  ;;  %v6256_v55 = vmul.f32 %v6248_v14, %v6248_v14  ;;  %v6257_v33 = vmul.f32 %v6249_v17, %v6249_v17 }
0x2187   :  { %v6319_v57 = vrot.slane %v6231_v18, %v8809_v11 }
0x2188   :  { %v6264_v29 = vadd.f32 %v6257_v33, %v6256_v55  ;;  %v6258_v36 = vmul.f32 %v6250_v0, %v6250_v0  ;;  %v6259_v50 = vmul.f32 %v6251_v31, %v6251_v31 }
0x2189   :  { %v6240_v63 = vpop.xlane.xlu0 %6239 }
0x218a   :  { %v6246_v19 = vmul.f32 0.00390625, %v6240_v63  ;;  %6265 = vadd.xlane.f32.xlu0 %v6264_v29  ;;  %v6267_v32 = vadd.f32 %v6259_v50, %v6258_v36 }
0x218b   :  { %v6243_v39 = vpop.xlane.xlu1 %6242 }
0x218c   :  { %v6252_v10 = vsub.f32 %v6226_v15, %v6246_v19  ;;  %v6253_v35 = vsub.f32 %v6227_v25, %v6246_v19  ;;  %v6247_v60 = vmul.f32 0.00390625, %v6243_v39  ;;  %6268 = vadd.xlane.f32.xlu1 %v6267_v32 }
0x218e   :  { %v6254_v27 = vsub.f32 %v6228_v46, %v6247_v60  ;;  %v6255_v42 = vsub.f32 %v6229_v37, %v6247_v60  ;;  %v6260_v6 = vmul.f32 %v6252_v10, %v6252_v10  ;;  %v6261_v41 = vmul.f32 %v6253_v35, %v6253_v35 }
0x2190   :  { %v6270_v51 = vadd.f32 %v6261_v41, %v6260_v6  ;;  %v6262_v7 = vmul.f32 %v6254_v27, %v6254_v27  ;;  %v6263_v49 = vmul.f32 %v6255_v42, %v6255_v42 }
0x2192   :  { %6271 = vadd.xlane.f32.xlu0 %v6270_v51  ;;  %v6273_v58 = vadd.f32 %v6263_v49, %v6262_v7 }
0x2194   :  { %6274 = vadd.xlane.f32.xlu1 %v6273_v58 }
0x2217   :  { %v6266_v34 = vpop.xlane.xlu0 %6265 }
0x2218   :  { %v6276_v26 = vmul.f32 0.00390625, %v6266_v34 }
0x2219   :  { %v6269_v16 = vpop.xlane.xlu1 %6268 }
0x221a   :  { %v6280_v28 = vadd.f32 1e-06, %v6276_v26  ;;  %v6277_v4 = vmul.f32 0.00390625, %v6269_v16 }
0x221c   :  { %8075 = vrsqrt.f32 %v6280_v28  ;;  %v6281_v56 = vadd.f32 1e-06, %v6277_v4 }
0x221e   :  { %8077 = vrsqrt.f32 %v6281_v56 }
0x221f   :  { %v6272_v23 = vpop.xlane.xlu0 %6271 }
0x2220   :  { %v6278_v45 = vmul.f32 0.00390625, %v6272_v23 }
0x2221   :  { %v6275_v5 = vpop.xlane.xlu1 %6274 }
0x2222   :  { %v6282_v52 = vadd.f32 1e-06, %v6278_v45  ;;  %v6279_v1 = vmul.f32 0.00390625, %v6275_v5 }
0x2224   :  { %8079 = vrsqrt.f32 %v6282_v52  ;;  %v6283_v43 = vadd.f32 1e-06, %v6279_v1 }
0x2226   :  { %v8076_v2 = vpop.eup %8075  ;;  %8081 = vrsqrt.f32 %v6283_v43 }
0x2227   :  { %v6288_v61 = vmul.f32 %v8076_v2, %v6248_v14  ;;  %v6289_v20 = vmul.f32 %v8076_v2, %v6249_v17 }
0x2228   :  { %v8078_v44 = vpop.eup %8077 }
0x2229   :  { %v6307_v59 = vmul.f32 %v6300_v47, %v6288_v61  ;;  %v6308_v3 = vmul.f32 %v6304_v8, %v6289_v20  ;;  %v6290_v21 = vmul.f32 %v8078_v44, %v6250_v0  ;;  %v6291_v15 = vmul.f32 %v8078_v44, %v6251_v31 }
0x222b   :  { %v6326_v53 = vadd.f32 %v6319_v57, %v6307_v59  ;;  %v6327_v9 = vadd.f32 %v6323_v54, %v6308_v3  ;;  %v6309_v25 = vmul.f32 %v6300_v47, %v6290_v21  ;;  %v6310_v48 = vmul.f32 %v6304_v8, %v6291_v15 }
0x222d   :  { %6334 = vst [vmem:[#allocation27] sm:$0xff] %v6326_v53  ;;  %6335 = vst [vmem:[#allocation27 + $0x8] sm:$0xff] %v6327_v9  ;;  %v6328_v46 = vadd.f32 %v6319_v57, %v6309_v25  ;;  %v6329_v37 = vadd.f32 %v6323_v54, %v6310_v48 }
0x222e   :  { %v8080_v24 = vpop.eup %8079 }
0x222f   :  { %6336 = vst [vmem:[#allocation27 + $0x10] sm:$0xff] %v6328_v46  ;;  %6337 = vst [vmem:[#allocation27 + $0x18] sm:$0xff] %v6329_v37  ;;  %v6292_v11 = vmul.f32 %v8080_v24, %v6252_v10  ;;  %v6293_v13 = vmul.f32 %v8080_v24, %v6253_v35 }
0x2230   :  { %v8082_v22 = vpop.eup %8081 }
0x2231   :  { %v6311_v62 = vmul.f32 %v6300_v47, %v6292_v11  ;;  %v6312_v12 = vmul.f32 %v6304_v8, %v6293_v13  ;;  %v6294_v30 = vmul.f32 %v8082_v22, %v6254_v27  ;;  %v6295_v14 = vmul.f32 %v8082_v22, %v6255_v42 }
0x2233   :  { %v6330_v17 = vadd.f32 %v6319_v57, %v6311_v62  ;;  %v6331_v40 = vadd.f32 %v6323_v54, %v6312_v12  ;;  %v6313_v0 = vmul.f32 %v6300_v47, %v6294_v30  ;;  %v6314_v31 = vmul.f32 %v6304_v8, %v6295_v14 }
0x2235   :  { %6338 = vst [vmem:[#allocation27 + $0x20] sm:$0xff] %v6330_v17  ;;  %6339 = vst [vmem:[#allocation27 + $0x28] sm:$0xff] %v6331_v40  ;;  %v6332_v55 = vadd.f32 %v6319_v57, %v6313_v0  ;;  %v6333_v33 = vadd.f32 %v6323_v54, %v6314_v31 }
0x2237   :  { %6340 = vst [vmem:[#allocation27 + $0x30] sm:$0xff] %v6332_v55  ;;  %6341 = vst [vmem:[#allocation27 + $0x38] sm:$0xff] %v6333_v33 }
0x2238   :  { %8424 = shalt.err (!%p8421_p12)
}
0x2239   :  { %s8425_s25 = scalar_lea.hbm %s10316_s18, 1024 }
0x223a   :  { %p8426_p13 = scmp.ne.s32.totalorder %s10316_s18, %s8425_s25  ;;  %p8429_p0 = scmp.lt.u32.totalorder %s8425_s25, %s10316_s18 }
0x223c   :  { %p8431_p1 = pnand %p8429_p0, %p8426_p13 }
0x223e   :  { %8434 = shalt.err (!%p8431_p1)
}
0x223f   :  { %6353 = dma.vmem_to_hbm [thread:$0]  %s6348_s17, 1024, %s10316_s18, [#allocation5], %s8468_s19, %s8468_s19, %s8469_s22  }
0x2240   :  { %8451 = dma.done.wait [#allocation5], 1024  }
0x2241   :  { %8452 = vsyncadd [#allocation5], 4294966272 }
0x2242   :  { %6357 = vsyncpa [#allocation4], 1 }
0x2243   :  { %6358 = vsyncpa [#allocation7], 1 }
0x2244   :  { %6359 = vsyncpa [#allocation10], 1 }
0x2245   :  { %6360 = vsyncpa [#allocation13], 1 }
0x2246   :  { %6361 = vsyncpa [#allocation16], 1 }
0x2247   :  { %6362 = vsyncpa [#allocation19], 1 }
0x2248   :  { %6363 = vsyncpa [#allocation22], 1 }
0x2249   :  { %6364 = vsyncpa [#allocation25], 1 }
0x224a   :  { %6365 = vsyncpa [#allocation5], 1 }

</bundles_post_ra>
